<compile_context>
chip_gen: v7x
topology: tpu7x:2x2x1
jax: 0.10.0
libtpu: 0.0.40
codegen_flags: <defaults>
</compile_context>

<pallas_src>
import functools

import jax
import jax.numpy as jnp
from jax.experimental import pallas as pl
from jax.experimental.pallas import tpu as pltpu

H = 256          # GRU hidden size
IN_DIM = 1024    # GRU input feature size
NUM_LAYERS = 2
TM_BIG = 256     # row tile for the batched input-projection matmul


# ----------------------------- Pallas kernels ------------------------------ #

def _matmul_bias_kernel(x_ref, w_ref, b_ref, o_ref):
    # (TM, K) @ (K, N) + (1, N)
    o_ref[...] = (
        jnp.dot(x_ref[...], w_ref[...], preferred_element_type=jnp.float32)
        + b_ref[...]
    )


def _gru_seq_kernel(gx_ref, whh_ref, bhh_ref, o_ref, h_ref):
    # One grid step == one timestep.  h_ref is a VMEM scratch that persists
    # across grid iterations and carries the hidden state.
    t = pl.program_id(0)

    @pl.when(t == 0)
    def _():
        h_ref[...] = jnp.zeros_like(h_ref)

    h = h_ref[...]                                                  # (B, H)
    hh = jnp.dot(h, whh_ref[...], preferred_element_type=jnp.float32)
    hh = hh + bhh_ref[...]                                          # (B, 3H)
    gx = gx_ref[0]                                                  # (B, 3H)

    # PyTorch GRU gate order: reset, update, new.
    r = jax.nn.sigmoid(gx[:, 0:H] + hh[:, 0:H])
    z = jax.nn.sigmoid(gx[:, H:2 * H] + hh[:, H:2 * H])
    n = jnp.tanh(gx[:, 2 * H:3 * H] + r * hh[:, 2 * H:3 * H])
    h_new = (1.0 - z) * n + z * h

    h_ref[...] = h_new
    o_ref[0] = h_new


def _interp_kernel(m_ref, h_ref, o_ref):
    # (num_frames, T) @ (T, H) per batch element.
    o_ref[0] = jnp.dot(m_ref[...], h_ref[0], preferred_element_type=jnp.float32)


# ------------------------------ glue helpers ------------------------------- #

def _matmul_bias(x, w_t, b):
    """(rows, K) @ (K, N) + b, tiled over rows with a large MXU-friendly tile."""
    rows, kdim = x.shape
    n = w_t.shape[1]
    tm = TM_BIG if rows >= TM_BIG else ((rows + 7) // 8) * 8
    mp = ((rows + tm - 1) // tm) * tm
    if mp != rows:
        x = jnp.pad(x, ((0, mp - rows), (0, 0)))
    out = pl.pallas_call(
        _matmul_bias_kernel,
        out_shape=jax.ShapeDtypeStruct((mp, n), jnp.float32),
        grid=(mp // tm,),
        in_specs=[
            pl.BlockSpec((tm, kdim), lambda i: (i, 0)),
            pl.BlockSpec((kdim, n), lambda i: (0, 0)),
            pl.BlockSpec((1, n), lambda i: (0, 0)),
        ],
        out_specs=pl.BlockSpec((tm, n), lambda i: (i, 0)),
        compiler_params=pltpu.CompilerParams(
            dimension_semantics=("parallel",)),
        cost_estimate=pl.CostEstimate(
            flops=2 * mp * kdim * n,
            transcendentals=0,
            bytes_accessed=4 * (mp * kdim + kdim * n + mp * n)),
    )(x, w_t, b.reshape(1, -1))
    return out[:rows]


def _gru_layer(x_btc, w_ih_t, b_ih, w_hh_t, b_hh):
    """One GRU layer (batch_first input (B, T, C) -> (B, T, H))."""
    B, T, _ = x_btc.shape
    # All input projections in one big matmul (MXU-efficient).
    gx = _matmul_bias(x_btc.reshape(B * T, -1), w_ih_t, b_ih)       # (B*T, 3H)
    gx = gx.reshape(B, T, 3 * H).transpose(1, 0, 2)                 # (T, B, 3H)

    hseq = pl.pallas_call(
        _gru_seq_kernel,
        out_shape=jax.ShapeDtypeStruct((T, B, H), jnp.float32),
        grid=(T,),
        in_specs=[
            pl.BlockSpec((1, B, 3 * H), lambda t: (t, 0, 0)),
            pl.BlockSpec((H, 3 * H), lambda t: (0, 0)),
            pl.BlockSpec((1, 3 * H), lambda t: (0, 0)),
        ],
        out_specs=pl.BlockSpec((1, B, H), lambda t: (t, 0, 0)),
        scratch_shapes=[pltpu.VMEM((B, H), jnp.float32)],
        compiler_params=pltpu.CompilerParams(
            dimension_semantics=("arbitrary",)),   # sequential recurrence
    )(gx, w_hh_t, b_hh.reshape(1, -1))
    return hseq.transpose(1, 0, 2)                                  # (B, T, H)


def _interp_matrix(t_in, num_frames):
    """Dense matrix M so that out[f] = sum_t M[f, t] * in[t] reproduces
    F.interpolate(mode='linear', align_corners=False) along the time axis."""
    scale = t_in / num_frames
    f = jnp.arange(num_frames, dtype=jnp.float32)
    src = jnp.maximum(scale * (f + 0.5) - 0.5, 0.0)
    i0 = jnp.minimum(jnp.floor(src).astype(jnp.int32), t_in - 1)
    lam = src - i0.astype(jnp.float32)
    i1 = jnp.minimum(i0 + 1, t_in - 1)
    e0 = jax.nn.one_hot(i0, t_in, dtype=jnp.float32)
    e1 = jax.nn.one_hot(i1, t_in, dtype=jnp.float32)
    return (1.0 - lam)[:, None] * e0 + lam[:, None] * e1            # (F, T)


# --------------------------- parameter construction ------------------------ #

def init_params(key):
    """PyTorch-style init for nn.GRU(1024, 256, 2).  Weights stored transposed
    (in_features, 3H) so the kernels do row-major x @ W."""
    layers = []
    bound = 1.0 / (H ** 0.5)
    in_dims = [IN_DIM, H]
    for layer in range(NUM_LAYERS):
        key, k1, k2, k3, k4 = jax.random.split(key, 5)
        din = in_dims[layer]
        w_ih = jax.random.uniform(k1, (3 * H, din), minval=-bound, maxval=bound)
        w_hh = jax.random.uniform(k2, (3 * H, H), minval=-bound, maxval=bound)
        b_ih = jax.random.uniform(k3, (3 * H,), minval=-bound, maxval=bound)
        b_hh = jax.random.uniform(k4, (3 * H,), minval=-bound, maxval=bound)
        layers.append((
            jnp.transpose(w_ih).astype(jnp.float32),
            b_ih.astype(jnp.float32),
            jnp.transpose(w_hh).astype(jnp.float32),
            b_hh.astype(jnp.float32),
        ))
    return layers


# --------------------------------- forward --------------------------------- #

def forward(params, x, num_frames):
    """x: (B, T, 1024) batch_first like the PyTorch module.
    Returns (B, 256, num_frames)."""
    h = x.astype(jnp.float32)
    for layer in params:
        h = _gru_layer(h, *layer)                                   # (B, T, H)
    # Hidden-state output `_` of the GRU is discarded, as in the reference.

    B, T, _ = h.shape
    m = _interp_matrix(T, num_frames)                               # (F, T)
    out = pl.pallas_call(
        _interp_kernel,
        out_shape=jax.ShapeDtypeStruct((B, num_frames, H), jnp.float32),
        grid=(B,),
        in_specs=[
            pl.BlockSpec((num_frames, T), lambda b: (0, 0)),
            pl.BlockSpec((1, T, H), lambda b: (b, 0, 0)),
        ],
        out_specs=pl.BlockSpec((1, num_frames, H), lambda b: (b, 0, 0)),
        compiler_params=pltpu.CompilerParams(
            dimension_semantics=("parallel",)),
    )(m, h)
    return jnp.transpose(out, (0, 2, 1))                            # (B, 256, F)


if __name__ == "__main__":
    B, T, NUM_FRAMES = 2, 16, 24
    key = jax.random.PRNGKey(0)
    k_params, k_x = jax.random.split(key)

    params = init_params(k_params)
    x = jax.random.normal(k_x, (B, T, IN_DIM), dtype=jnp.float32)

    fwd = jax.jit(functools.partial(forward, num_frames=NUM_FRAMES))
    out = jax.block_until_ready(fwd(params, x))

    assert out.shape == (B, H, NUM_FRAMES), out.shape
    assert bool(jnp.all(jnp.isfinite(out)))
    print("KERNEL_OK")
</pallas_src>

<mosaic_0001>
module attributes {stable_mosaic.version = 11 : i64} {
  func.func @_matmul_bias_kernel(%arg0: i32, %arg1: memref<32x1024xf32, #tpu.memory_space<vmem>>, %arg2: memref<1024x768xf32, #tpu.memory_space<vmem>>, %arg3: memref<1x768xf32, #tpu.memory_space<vmem>>, %arg4: memref<32x768xf32, #tpu.memory_space<vmem>>) attributes {dimension_semantics = [#tpu.dimension_semantics<parallel>], iteration_bounds = array<i64: 1>, scalar_prefetch = 0 : i64, scratch_operands = 0 : i64, tpu.core_type = #tpu.core_type<tc>, window_params = [{transform_indices = @transform_0, window_bounds = array<i64: 32, 1024>}, {pipeline_mode = #tpu.pipeline_mode<synchronous>, transform_indices = @transform_1, window_bounds = array<i64: 1024, 768>}, {pipeline_mode = #tpu.pipeline_mode<synchronous>, transform_indices = @transform_2, window_bounds = array<i64: 1, 768>}, {transform_indices = @transform_3, window_bounds = array<i64: 32, 768>}]} {
    %c0 = arith.constant 0 : index
    %c0_0 = arith.constant 0 : index
    %0 = vector.load %arg1[%c0, %c0_0] : memref<32x1024xf32, #tpu.memory_space<vmem>>, vector<32x1024xf32>
    %c0_1 = arith.constant 0 : index
    %c0_2 = arith.constant 0 : index
    %1 = vector.load %arg2[%c0_1, %c0_2] : memref<1024x768xf32, #tpu.memory_space<vmem>>, vector<1024x768xf32>
    %cst = arith.constant dense<0.000000e+00> : vector<32x768xf32>
    %2 = tpu.matmul %0, %1, %cst {dimension_numbers = #tpu.dot_dimension_numbers<[1], [0], [0], [1], [0, 0, 1, 1], [], []>} : vector<32x1024xf32>, vector<1024x768xf32>, vector<32x768xf32> -> vector<32x768xf32>
    %c0_3 = arith.constant 0 : index
    %c0_4 = arith.constant 0 : index
    %3 = vector.load %arg3[%c0_3, %c0_4] : memref<1x768xf32, #tpu.memory_space<vmem>>, vector<1x768xf32>
    %4 = vector.broadcast %3 : vector<1x768xf32> to vector<32x768xf32>
    %5 = arith.addf %2, %4 : vector<32x768xf32>
    %c0_5 = arith.constant 0 : index
    %c0_6 = arith.constant 0 : index
    %6 = vector.load %arg4[%c0_5, %c0_6] : memref<32x768xf32, #tpu.memory_space<vmem>>, vector<32x768xf32>
    tpu.vector_store %arg4[%c0_5, %c0_6], %5 {strides = array<i32>} : memref<32x768xf32, #tpu.memory_space<vmem>>, vector<32x768xf32>,
    return
  }
  func.func @transform_0(%arg0: i32) -> (i32, i32) {
    %c0_i32 = arith.constant 0 : i32
    %c0_i32_0 = arith.constant 0 : i32
    return %arg0, %c0_i32 : i32, i32
  }
  func.func @transform_1(%arg0: i32) -> (i32, i32) {
    %c0_i32 = arith.constant 0 : i32
    %c0_i32_0 = arith.constant 0 : i32
    %c0_i32_1 = arith.constant 0 : i32
    return %c0_i32, %c0_i32_0 : i32, i32
  }
  func.func @transform_2(%arg0: i32) -> (i32, i32) {
    %c0_i32 = arith.constant 0 : i32
    %c0_i32_0 = arith.constant 0 : i32
    %c0_i32_1 = arith.constant 0 : i32
    return %c0_i32, %c0_i32_0 : i32, i32
  }
  func.func @transform_3(%arg0: i32) -> (i32, i32) {
    %c0_i32 = arith.constant 0 : i32
    %c0_i32_0 = arith.constant 0 : i32
    return %arg0, %c0_i32 : i32, i32
  }
}

module attributes {stable_mosaic.version = 11 : i64} {
  func.func @_matmul_bias_kernel(%arg0: i32, %arg1: memref<32x256xf32, #tpu.memory_space<vmem>>, %arg2: memref<256x768xf32, #tpu.memory_space<vmem>>, %arg3: memref<1x768xf32, #tpu.memory_space<vmem>>, %arg4: memref<32x768xf32, #tpu.memory_space<vmem>>) attributes {dimension_semantics = [#tpu.dimension_semantics<parallel>], iteration_bounds = array<i64: 1>, scalar_prefetch = 0 : i64, scratch_operands = 0 : i64, tpu.core_type = #tpu.core_type<tc>, window_params = [{transform_indices = @transform_0, window_bounds = array<i64: 32, 256>}, {pipeline_mode = #tpu.pipeline_mode<synchronous>, transform_indices = @transform_1, window_bounds = array<i64: 256, 768>}, {pipeline_mode = #tpu.pipeline_mode<synchronous>, transform_indices = @transform_2, window_bounds = array<i64: 1, 768>}, {transform_indices = @transform_3, window_bounds = array<i64: 32, 768>}]} {
    %c0 = arith.constant 0 : index
    %c0_0 = arith.constant 0 : index
    %0 = vector.load %arg1[%c0, %c0_0] : memref<32x256xf32, #tpu.memory_space<vmem>>, vector<32x256xf32>
    %c0_1 = arith.constant 0 : index
    %c0_2 = arith.constant 0 : index
    %1 = vector.load %arg2[%c0_1, %c0_2] : memref<256x768xf32, #tpu.memory_space<vmem>>, vector<256x768xf32>
    %cst = arith.constant dense<0.000000e+00> : vector<32x768xf32>
    %2 = tpu.matmul %0, %1, %cst {dimension_numbers = #tpu.dot_dimension_numbers<[1], [0], [0], [1], [0, 0, 1, 1], [], []>} : vector<32x256xf32>, vector<256x768xf32>, vector<32x768xf32> -> vector<32x768xf32>
    %c0_3 = arith.constant 0 : index
    %c0_4 = arith.constant 0 : index
    %3 = vector.load %arg3[%c0_3, %c0_4] : memref<1x768xf32, #tpu.memory_space<vmem>>, vector<1x768xf32>
    %4 = vector.broadcast %3 : vector<1x768xf32> to vector<32x768xf32>
    %5 = arith.addf %2, %4 : vector<32x768xf32>
    %c0_5 = arith.constant 0 : index
    %c0_6 = arith.constant 0 : index
    %6 = vector.load %arg4[%c0_5, %c0_6] : memref<32x768xf32, #tpu.memory_space<vmem>>, vector<32x768xf32>
    tpu.vector_store %arg4[%c0_5, %c0_6], %5 {strides = array<i32>} : memref<32x768xf32, #tpu.memory_space<vmem>>, vector<32x768xf32>,
    return
  }
  func.func @transform_0(%arg0: i32) -> (i32, i32) {
    %c0_i32 = arith.constant 0 : i32
    %c0_i32_0 = arith.constant 0 : i32
    return %arg0, %c0_i32 : i32, i32
  }
  func.func @transform_1(%arg0: i32) -> (i32, i32) {
    %c0_i32 = arith.constant 0 : i32
    %c0_i32_0 = arith.constant 0 : i32
    %c0_i32_1 = arith.constant 0 : i32
    return %c0_i32, %c0_i32_0 : i32, i32
  }
  func.func @transform_2(%arg0: i32) -> (i32, i32) {
    %c0_i32 = arith.constant 0 : i32
    %c0_i32_0 = arith.constant 0 : i32
    %c0_i32_1 = arith.constant 0 : i32
    return %c0_i32, %c0_i32_0 : i32, i32
  }
  func.func @transform_3(%arg0: i32) -> (i32, i32) {
    %c0_i32 = arith.constant 0 : i32
    %c0_i32_0 = arith.constant 0 : i32
    return %arg0, %c0_i32 : i32, i32
  }
}

module attributes {stable_mosaic.version = 11 : i64} {
  func.func @_gru_seq_kernel(%arg0: i32, %arg1: memref<1x2x768xf32, #tpu.memory_space<vmem>>, %arg2: memref<256x768xf32, #tpu.memory_space<vmem>>, %arg3: memref<1x768xf32, #tpu.memory_space<vmem>>, %arg4: memref<1x2x256xf32, #tpu.memory_space<vmem>>, %arg5: memref<2x256xf32, #tpu.memory_space<vmem>>) attributes {dimension_semantics = [#tpu.dimension_semantics<arbitrary>], iteration_bounds = array<i64: 16>, scalar_prefetch = 0 : i64, scratch_operands = 1 : i64, tpu.core_type = #tpu.core_type<tc>, window_params = [{transform_indices = @transform_0, window_bounds = array<i64: 1, 2, 768>}, {pipeline_mode = #tpu.pipeline_mode<synchronous>, transform_indices = @transform_1, window_bounds = array<i64: 256, 768>}, {pipeline_mode = #tpu.pipeline_mode<synchronous>, transform_indices = @transform_2, window_bounds = array<i64: 1, 768>}, {transform_indices = @transform_3, window_bounds = array<i64: 1, 2, 256>}]} {
    %c0_i32 = arith.constant 0 : i32
    %0 = arith.cmpi eq, %arg0, %c0_i32 : i32
    %1 = arith.extui %0 : i1 to i32
    %c0_i32_0 = arith.constant 0 : i32
    %2 = arith.cmpi ne, %1, %c0_i32_0 : i32
    scf.if %2 {
      %cst_17 = arith.constant 0.000000e+00 : f32
      %41 = vector.broadcast %cst_17 : f32 to vector<2x256xf32>
      %c0_18 = arith.constant 0 : index
      %c0_19 = arith.constant 0 : index
      %42 = vector.load %arg5[%c0_18, %c0_19] : memref<2x256xf32, #tpu.memory_space<vmem>>, vector<2x256xf32>
      tpu.vector_store %arg5[%c0_18, %c0_19], %41 {strides = array<i32>} : memref<2x256xf32, #tpu.memory_space<vmem>>, vector<2x256xf32>,
    } else {
    }
    %c0 = arith.constant 0 : index
    %c0_1 = arith.constant 0 : index
    %3 = vector.load %arg5[%c0, %c0_1] : memref<2x256xf32, #tpu.memory_space<vmem>>, vector<2x256xf32>
    %c0_2 = arith.constant 0 : index
    %c0_3 = arith.constant 0 : index
    %4 = vector.load %arg2[%c0_2, %c0_3] : memref<256x768xf32, #tpu.memory_space<vmem>>, vector<256x768xf32>
    %cst = arith.constant dense<0.000000e+00> : vector<2x768xf32>
    %5 = tpu.matmul %3, %4, %cst {dimension_numbers = #tpu.dot_dimension_numbers<[1], [0], [0], [1], [0, 0, 1, 1], [], []>} : vector<2x256xf32>, vector<256x768xf32>, vector<2x768xf32> -> vector<2x768xf32>
    %c0_4 = arith.constant 0 : index
    %c0_5 = arith.constant 0 : index
    %6 = vector.load %arg3[%c0_4, %c0_5] : memref<1x768xf32, #tpu.memory_space<vmem>>, vector<1x768xf32>
    %7 = vector.broadcast %6 : vector<1x768xf32> to vector<2x768xf32>
    %8 = arith.addf %5, %7 : vector<2x768xf32>
    %c0_6 = arith.constant 0 : index
    %c0_7 = arith.constant 0 : index
    %c0_8 = arith.constant 0 : index
    %9 = vector.load %arg1[%c0_6, %c0_7, %c0_8] : memref<1x2x768xf32, #tpu.memory_space<vmem>>, vector<1x2x768xf32>
    %10 = vector.shape_cast %9 : vector<1x2x768xf32> to vector<2x768xf32>
    %11 = vector.extract_strided_slice %10 {offsets = [0, 0], sizes = [2, 256], strides = [1, 1]} : vector<2x768xf32> to vector<2x256xf32>
    %12 = vector.extract_strided_slice %8 {offsets = [0, 0], sizes = [2, 256], strides = [1, 1]} : vector<2x768xf32> to vector<2x256xf32>
    %13 = arith.addf %11, %12 : vector<2x256xf32>
    %14 = arith.negf %13 : vector<2x256xf32>
    %15 = math.exp %14 : vector<2x256xf32>
    %cst_9 = arith.constant 1.000000e+00 : f32
    %16 = vector.broadcast %cst_9 : f32 to vector<2x256xf32>
    %17 = arith.addf %16, %15 : vector<2x256xf32>
    %18 = arith.divf %16, %17 : vector<2x256xf32>
    %19 = vector.extract_strided_slice %10 {offsets = [0, 256], sizes = [2, 256], strides = [1, 1]} : vector<2x768xf32> to vector<2x256xf32>
    %20 = vector.extract_strided_slice %8 {offsets = [0, 256], sizes = [2, 256], strides = [1, 1]} : vector<2x768xf32> to vector<2x256xf32>
    %21 = arith.addf %19, %20 : vector<2x256xf32>
    %22 = arith.negf %21 : vector<2x256xf32>
    %23 = math.exp %22 : vector<2x256xf32>
    %cst_10 = arith.constant 1.000000e+00 : f32
    %24 = vector.broadcast %cst_10 : f32 to vector<2x256xf32>
    %25 = arith.addf %24, %23 : vector<2x256xf32>
    %26 = arith.divf %24, %25 : vector<2x256xf32>
    %27 = vector.extract_strided_slice %10 {offsets = [0, 512], sizes = [2, 256], strides = [1, 1]} : vector<2x768xf32> to vector<2x256xf32>
    %28 = vector.extract_strided_slice %8 {offsets = [0, 512], sizes = [2, 256], strides = [1, 1]} : vector<2x768xf32> to vector<2x256xf32>
    %29 = arith.mulf %18, %28 : vector<2x256xf32>
    %30 = arith.addf %27, %29 : vector<2x256xf32>
    %31 = math.tanh %30 : vector<2x256xf32>
    %cst_11 = arith.constant 1.000000e+00 : f32
    %32 = vector.broadcast %cst_11 : f32 to vector<2x256xf32>
    %33 = arith.subf %32, %26 : vector<2x256xf32>
    %34 = arith.mulf %33, %31 : vector<2x256xf32>
    %35 = arith.mulf %26, %3 : vector<2x256xf32>
    %36 = arith.addf %34, %35 : vector<2x256xf32>
    %c0_12 = arith.constant 0 : index
    %c0_13 = arith.constant 0 : index
    %37 = vector.load %arg5[%c0_12, %c0_13] : memref<2x256xf32, #tpu.memory_space<vmem>>, vector<2x256xf32>
    tpu.vector_store %arg5[%c0_12, %c0_13], %36 {strides = array<i32>} : memref<2x256xf32, #tpu.memory_space<vmem>>, vector<2x256xf32>,
    %c0_14 = arith.constant 0 : index
    %c0_15 = arith.constant 0 : index
    %c0_16 = arith.constant 0 : index
    %38 = vector.load %arg4[%c0_14, %c0_15, %c0_16] : memref<1x2x256xf32, #tpu.memory_space<vmem>>, vector<1x2x256xf32>
    %39 = vector.shape_cast %38 : vector<1x2x256xf32> to vector<2x256xf32>
    %40 = vector.shape_cast %36 : vector<2x256xf32> to vector<1x2x256xf32>
    tpu.vector_store %arg4[%c0_14, %c0_15, %c0_16], %40 {strides = array<i32>} : memref<1x2x256xf32, #tpu.memory_space<vmem>>, vector<1x2x256xf32>,
    return
  }
  func.func @transform_0(%arg0: i32) -> (i32, i32, i32) {
    %c0_i32 = arith.constant 0 : i32
    %c0_i32_0 = arith.constant 0 : i32
    %c0_i32_1 = arith.constant 0 : i32
    return %arg0, %c0_i32, %c0_i32_0 : i32, i32, i32
  }
  func.func @transform_1(%arg0: i32) -> (i32, i32) {
    %c0_i32 = arith.constant 0 : i32
    %c0_i32_0 = arith.constant 0 : i32
    %c0_i32_1 = arith.constant 0 : i32
    return %c0_i32, %c0_i32_0 : i32, i32
  }
  func.func @transform_2(%arg0: i32) -> (i32, i32) {
    %c0_i32 = arith.constant 0 : i32
    %c0_i32_0 = arith.constant 0 : i32
    %c0_i32_1 = arith.constant 0 : i32
    return %c0_i32, %c0_i32_0 : i32, i32
  }
  func.func @transform_3(%arg0: i32) -> (i32, i32, i32) {
    %c0_i32 = arith.constant 0 : i32
    %c0_i32_0 = arith.constant 0 : i32
    %c0_i32_1 = arith.constant 0 : i32
    return %arg0, %c0_i32, %c0_i32_0 : i32, i32, i32
  }
}

module attributes {stable_mosaic.version = 11 : i64} {
  func.func @_interp_kernel(%arg0: i32, %arg1: memref<24x16xf32, #tpu.memory_space<vmem>>, %arg2: memref<1x16x256xf32, #tpu.memory_space<vmem>>, %arg3: memref<1x24x256xf32, #tpu.memory_space<vmem>>) attributes {dimension_semantics = [#tpu.dimension_semantics<parallel>], iteration_bounds = array<i64: 2>, scalar_prefetch = 0 : i64, scratch_operands = 0 : i64, tpu.core_type = #tpu.core_type<tc>, window_params = [{pipeline_mode = #tpu.pipeline_mode<synchronous>, transform_indices = @transform_0, window_bounds = array<i64: 24, 16>}, {transform_indices = @transform_1, window_bounds = array<i64: 1, 16, 256>}, {transform_indices = @transform_2, window_bounds = array<i64: 1, 24, 256>}]} {
    %c0 = arith.constant 0 : index
    %c0_0 = arith.constant 0 : index
    %0 = vector.load %arg1[%c0, %c0_0] : memref<24x16xf32, #tpu.memory_space<vmem>>, vector<24x16xf32>
    %c0_1 = arith.constant 0 : index
    %c0_2 = arith.constant 0 : index
    %c0_3 = arith.constant 0 : index
    %1 = vector.load %arg2[%c0_1, %c0_2, %c0_3] : memref<1x16x256xf32, #tpu.memory_space<vmem>>, vector<1x16x256xf32>
    %2 = vector.shape_cast %1 : vector<1x16x256xf32> to vector<16x256xf32>
    %cst = arith.constant dense<0.000000e+00> : vector<24x256xf32>
    %3 = tpu.matmul %0, %2, %cst {dimension_numbers = #tpu.dot_dimension_numbers<[1], [0], [0], [1], [0, 0, 1, 1], [], []>} : vector<24x16xf32>, vector<16x256xf32>, vector<24x256xf32> -> vector<24x256xf32>
    %c0_4 = arith.constant 0 : index
    %c0_5 = arith.constant 0 : index
    %c0_6 = arith.constant 0 : index
    %4 = vector.load %arg3[%c0_4, %c0_5, %c0_6] : memref<1x24x256xf32, #tpu.memory_space<vmem>>, vector<1x24x256xf32>
    %5 = vector.shape_cast %4 : vector<1x24x256xf32> to vector<24x256xf32>
    %6 = vector.shape_cast %3 : vector<24x256xf32> to vector<1x24x256xf32>
    tpu.vector_store %arg3[%c0_4, %c0_5, %c0_6], %6 {strides = array<i32>} : memref<1x24x256xf32, #tpu.memory_space<vmem>>, vector<1x24x256xf32>,
    return
  }
  func.func @transform_0(%arg0: i32) -> (i32, i32) {
    %c0_i32 = arith.constant 0 : i32
    %c0_i32_0 = arith.constant 0 : i32
    %c0_i32_1 = arith.constant 0 : i32
    return %c0_i32, %c0_i32_0 : i32, i32
  }
  func.func @transform_1(%arg0: i32) -> (i32, i32, i32) {
    %c0_i32 = arith.constant 0 : i32
    %c0_i32_0 = arith.constant 0 : i32
    %c0_i32_1 = arith.constant 0 : i32
    return %arg0, %c0_i32, %c0_i32_0 : i32, i32, i32
  }
  func.func @transform_2(%arg0: i32) -> (i32, i32, i32) {
    %c0_i32 = arith.constant 0 : i32
    %c0_i32_0 = arith.constant 0 : i32
    %c0_i32_1 = arith.constant 0 : i32
    return %arg0, %c0_i32, %c0_i32_0 : i32, i32, i32
  }
}

</mosaic_0001>

<bundles_post_ra>
// kernel: forward.9
= control target key start
LH: loop header
LB: loop body
LE: loop exit
PB: predicated region body
PF: predicated region fallthrough
CT: control target
= control target key end

     0   :  { %7 = vsyncpa [#allocation3], 0  ;;  %s582_s0 = inlined_call_operand.vmem [shape: f32[24,16], index: 0, kind: input, shape index: {}]   ;;  %s583_s1 = inlined_call_operand.vmem [shape: f32[2,16,256], index: 1, kind: input, shape index: {}]   ;;  %s584_s2 = inlined_call_operand.hbm [shape: f32[2,24,256], index: 2, kind: output, shape index: {}]  }
   0x1   :  { %9 = vsyncpa [#allocation3 + $0x1], 0  ;;  %s470_s9 = smov 0   ;;  %s472_s10 = smov 0  }
   0x2   :  { %s474_s11 = smov 0   ;;  %s476_s12 = smov 0  }
   0x3 LB: > { %s491_s13 = sadd.s32 4294967295, %s449_s12   ;;  %s324_s14 = sadd.s32 4294967294, %s449_s12   ;;  %s449_s12 = sphi %s476_s12, %s590_s12   ;;  %s445_s11 = sphi %s474_s11, %s589_s11   ;;  %s441_s10 = sphi %s472_s10, %s588_s10   ;;  %s437_s9 = sphi %s470_s9, %s587_s9  }
   0x4   : > { %s495_s15 = sadd.s32 1, %s449_s12   ;;  %s69_s16 = sadd.s32 1, %s445_s11 }
   0x5   : > { %s66_s17 = ssub.s32 %s449_s12, %s495_s15  ;;  %p79_p0 = scmp.ne.s32.totalorder %s445_s11, %s441_s10 }
   0x6   : > { %p67_p1 = scmp.eq.s32.totalorder %s66_s17, 0  ;;  %p80_p2 = scmp.eq.s32.totalorder %s491_s13, 1 }
   0x7   : > { %p85_p3 = scmp.ne.s32.totalorder %s441_s10, %s437_s9  ;;  %p86_p4 = scmp.eq.s32.totalorder %s324_s14, 1 }
   0x8   : > { %s506_s18 = scalar_select %p67_p1, %s445_s11, %s69_s16  }
   0x9   : > { %p508_p5 = por %p80_p2, %p79_p0  ;;  %p512_p6 = por %p86_p4, %p85_p3 }
   0xa   : > { %p327_p7 = scmp.ge.s32.totalorder %s449_s12, 1  ;;  %p115_p8 = scmp.lt.s32.totalorder %s449_s12, 3 }
   0xc   : > { %p116_p9 = pnand %p327_p7, %p115_p8 }
   0xd   : > { %p137_p10 = scmp.lt.s32.totalorder (!%p116_p9), %s491_s13, 1  ;;  %v451_v0 = vmov (!%p116_p9), 0.0   ;;  %v143_v7 = vld [vmem:[%s582_s0 + $0x8] sm:$0xff] (!%p116_p9)  ;;  %vm149_vm0 = vcmask (!%p116_p9), 130048   ;;  %v142_v8 = vld [vmem:[%s582_s0] sm:$0xff] (!%p116_p9)  ;;  %v144_v9 = vld [vmem:[%s582_s0 + $0x10] sm:$0xff] (!%p116_p9) }
   0xe   : > { %119 = sbr.rel (%p116_p9) target bundleno = 264 (0x108), region = 28  ;;  %229 = vmatprep.mubr.f32.mxu1 (!%p116_p9), %v451_v0  ;;  %223 = vmatprep.mubr.f32.mxu0 (!%p116_p9), %v451_v0  ;;  %s134_s4 = sand.u32 (!%p116_p9), 1, %s441_s10  }
   0xf   : > { %s343_s5 = smul.u32 (!%p116_p9), 48, %s134_s4  ;;  %s541_s17 = scalar_lea.sflag (!%p116_p9), [#allocation3], %s134_s4 }
  0x10   : > { %s344_s6 = smul.u32 (!%p116_p9), 768, %s491_s13 }
  0x11   : > { %s136_s7 = scalar_lea.vmem (!%p116_p9), [#allocation2], %s343_s5 }
  0x12   : > { %s262_s8 = sshll.u32 (!%p116_p9), %s136_s7, 4  ;;  %s534_s8 = int_to_ptr.vmem [resolvable:$true] %s262_s8 }
  0x15   : > { %s138_s21 = scalar_select %p137_p10, %s491_s13, 1 }
  0x16   : > { %s539_s13 = scalar_lea.hbm %s584_s2, %s344_s6 }
  0x17   : > { %s336_s22 = sshll.u32 %s138_s21, 5  ;;  %s387_s21 = scalar_lea.vmem %s534_s8, 768 }
  0x18   : > { %s141_s25 = scalar_lea.vmem %s583_s1, %s336_s22  ;;  %p388_p11 = scmp.ne.s32.totalorder %s534_s8, %s387_s21 }
  0x19   : > { %v146_v1 = vld [vmem:[%s141_s25 + $0x8] sm:$0xff]  ;;  %v148_v2 = vld [vmem:[%s141_s25 + $0x18] sm:$0xff]  ;;  %v145_v3 = vld [vmem:[%s141_s25] sm:$0xff]  ;;  %s452_s22 = smov [#allocation2]  }
  0x1a   : > { %v337_v4 = vpack.c.bf16 %v148_v2, %v146_v1  ;;  %v147_v5 = vld [vmem:[%s141_s25 + $0x10] sm:$0xff]  ;;  %p389_p12 = pnand %p388_p11, %p508_p5  ;;  %s391_s23 = sshll.u32 %s452_s22, 4  ;;  %s392_s23 = int_to_ptr.vmem [resolvable:$false] %s391_s23 }
  0x1b   : > { %v339_v6 = vpack.c.bf16 %v147_v5, %v145_v3  ;;  %s393_s24 = scalar_lea.vmem %s392_s23, 1536  ;;  %p394_p0 = scmp.lt.s32.totalorder %s534_s8, %s392_s23 }
  0x1c   : > { %341 = vmatprep.subr.bf16.mxu1 %v337_v4  ;;  %338 = vmatprep.subr.bf16.mxu0 %v337_v4  ;;  %p390_p13 = pneg %p389_p12  ;;  %p395_p1 = scmp.lt.s32.totalorder %s393_s24, %s387_s21 }
  0x1d   : > { %342 = vmatpush1.bf16.msra.mxu1 %v339_v6  ;;  %340 = vmatpush1.bf16.msra.mxu0 %v339_v6 }
  0x1e   : > { %p396_p2 = por %p395_p1, %p394_p0 }
  0x20   : > { %331 = vmatmul.mubr.msk.f32.vlgmr.msra.gmra.mrb[0].mxu1 %vm149_vm0, %v143_v7  ;;  %330 = vmatmul.mubr.msk.f32.vlgmr.msra.gmra.mrb[0].mxu0 %vm149_vm0, %v142_v8  ;;  %p397_p3 = pnand %p396_p2, %p390_p13 }
  0x21   : > { %235 = vmatprep.mubr.f32.mxu1 %v451_v0 }
  0x24   : > { %332 = vmatmul.mubr.msk.f32.gmra.mrb[2].mxu1 %vm149_vm0, %v144_v9 }
  0xf3   : > { %v231_v10 = vpop.f32.mrb[0].mxu1  ;;  %v225_v11 = vpop.f32.mrb[0].mxu0 }
  0xf4   : > { %244 = vst [vmem:[%s136_s7 + $0x10] sm:$0xff] %v231_v10  ;;  %v233_v12 = vpop.f32.mrb[1].mxu1  ;;  %242 = vst [vmem:[%s136_s7] sm:$0xff] %v225_v11  ;;  %v227_v13 = vpop.f32.mrb[1].mxu0 }
  0xf5   : > { %245 = vst [vmem:[%s136_s7 + $0x18] sm:$0xff] %v233_v12  ;;  %243 = vst [vmem:[%s136_s7 + $0x8] sm:$0xff] %v227_v13 }
  0xf7   : > { %v237_v14 = vpop.f32.mrb[2].mxu1 }
  0xf8   : > { %246 = vst [vmem:[%s136_s7 + $0x20] sm:$0xff] %v237_v14  ;;  %v239_v15 = vpop.f32.mrb[3].mxu1 }
  0xf9   : > { %247 = vst [vmem:[%s136_s7 + $0x28] sm:$0xff] %v239_v15 }
  0xfa   : > { %400 = shalt.err (!%p397_p3)
}
  0xfb   : > { %s401_s25 = scalar_lea.hbm %s539_s13, 768  ;;  %s405_s28 = scalar_lea.hbm %s584_s2, 1536 }
  0xfc   : > { %p402_p4 = scmp.ne.s32.totalorder %s539_s13, %s401_s25  ;;  %p406_p9 = scmp.lt.u32.totalorder %s539_s13, %s584_s2 }
  0xfd   : > { %p407_p10 = scmp.lt.u32.totalorder %s405_s28, %s401_s25  ;;  %p409_p12 = scmp.lt.u32.totalorder %s401_s25, %s539_s13 }
  0xfe   : > { %p403_p7 = pnand %p402_p4, %p508_p5 }
  0xff   : > { %p408_p11 = por %p407_p10, %p406_p9 }
 0x100   : > { %p404_p8 = pneg %p403_p7 }
 0x101   : > { %p410_p13 = por %p409_p12, %p408_p11 }
 0x103   : > { %p411_p0 = pnand %p410_p13, %p404_p8 }
 0x105   : > { %414 = shalt.err (!%p411_p0)
}
 0x106   : > { %s453_s3 = smov 256   ;;  %s454_s4 = smov 16  }
 0x107   : > { %345 = dma.vmem_to_hbm [thread:$0]  (%p508_p5), %s534_s8, 768, %s539_s13, %s541_s17, %s453_s3, %s453_s3, %s454_s4  }
 0x108 PF: > { %p351_p1 = scmp.ge.s32.totalorder %s449_s12, 2  ;;  %s277_s5 = sand.u32 1, %s437_s9  }
 0x109   : > { %s278_s6 = scalar_lea.sflag [#allocation3], %s277_s5 }
 0x10a   : > { %p348_p2 = pnand %p351_p1, %p512_p6 }
 0x10c   : > { %432 = dma.done.wait (!%p348_p2), %s278_s6, 768  }
 0x10d   : > { %434 = vsyncadd (!%p348_p2), %s278_s6, 4294966528  ;;  %p12_p3 = scmp.ge.s32.totalorder %s495_s15, 4   ;;  %s587_s9 = smov %s441_s10 }
 0x10e   : > { %s588_s10 = smov %s445_s11  ;;  %s589_s11 = smov %s506_s18 }
 0x10f   : > { %s590_s12 = smov %s495_s15  ;;  %14 = sbr.rel (!%p12_p3) target bundleno = 3 (0x3), region = 63 }
 0x116   :  { %283 = vsyncpa [#allocation3], 1 }
 0x117   :  { %285 = vsyncpa [#allocation3 + $0x1], 1 }

// kernel: forward.7
= control target key start
LH: loop header
LB: loop body
LE: loop exit
PB: predicated region body
PF: predicated region fallthrough
CT: control target
= control target key end

     0   :  { %s1503_s1 = inlined_call_operand.vmem [shape: f32[256,768], index: 1, kind: input, shape index: {}]   ;;  %s1504_s0 = inlined_call_operand.vmem [shape: f32[32,256], index: 0, kind: input, shape index: {}]   ;;  %s1505_s2 = inlined_call_operand.vmem [shape: f32[1,768], index: 2, kind: input, shape index: {}]   ;;  %s1506_s3 = inlined_call_operand.vmem [shape: f32[32,768], index: 3, kind: output, shape index: {}]  }
   0x1   :  { %v23_v0 = vld [vmem:[%s1503_s1 + $0x8] sm:$0xff]  ;;  %v29_v1 = vld [vmem:[%s1503_s1 + $0x38] sm:$0xff]  ;;  %v22_v5 = vld [vmem:[%s1503_s1] sm:$0xff] }
   0x2   :  { %v25_v2 = vld [vmem:[%s1503_s1 + $0x18] sm:$0xff]  ;;  %v541_v3 = vpack.c.bf16 %v29_v1, %v23_v0  ;;  %v31_v4 = vld [vmem:[%s1503_s1 + $0x48] sm:$0xff]  ;;  %v28_v6 = vld [vmem:[%s1503_s1 + $0x30] sm:$0xff] }
   0x3   :  { %v605_v7 = vpack.c.bf16 %v31_v4, %v25_v2  ;;  %v543_v8 = vpack.c.bf16 %v28_v6, %v22_v5  ;;  %v24_v9 = vld [vmem:[%s1503_s1 + $0x10] sm:$0xff]  ;;  %v30_v10 = vld [vmem:[%s1503_s1 + $0x40] sm:$0xff]  ;;  %v35_v11 = vld [vmem:[%s1503_s1 + $0x68] sm:$0xff] }
   0x4   :  { %542 = vmatprep.subr.bf16.mxu0 %v541_v3  ;;  %v607_v12 = vpack.c.bf16 %v30_v10, %v24_v9  ;;  %v41_v13 = vld [vmem:[%s1503_s1 + $0x98] sm:$0xff]  ;;  %v43_v15 = vld [vmem:[%s1503_s1 + $0xa8] sm:$0xff]  ;;  %v34_v18 = vld [vmem:[%s1503_s1 + $0x60] sm:$0xff] }
   0x5   :  { %v37_v14 = vld [vmem:[%s1503_s1 + $0x78] sm:$0xff]  ;;  %606 = vmatprep.subr.bf16.mxu1 %v605_v7  ;;  %544 = vmatpush1.bf16.msra.mxu0 %v543_v8  ;;  %v545_v16 = vpack.c.bf16 %v41_v13, %v35_v11  ;;  %v40_v19 = vld [vmem:[%s1503_s1 + $0x90] sm:$0xff]  ;;  %v42_v22 = vld [vmem:[%s1503_s1 + $0xa0] sm:$0xff] }
   0x6   :  { %v609_v17 = vpack.c.bf16 %v43_v15, %v37_v14  ;;  %v36_v20 = vld [vmem:[%s1503_s1 + $0x70] sm:$0xff]  ;;  %608 = vmatpush1.bf16.msra.mxu1 %v607_v12  ;;  %v547_v21 = vpack.c.bf16 %v40_v19, %v34_v18  ;;  %v47_v23 = vld [vmem:[%s1503_s1 + $0xc8] sm:$0xff]  ;;  %v53_v24 = vld [vmem:[%s1503_s1 + $0xf8] sm:$0xff] }
   0x7   :  { %546 = vmatprep.subr.bf16.mxu0 %v545_v16  ;;  %v611_v25 = vpack.c.bf16 %v42_v22, %v36_v20  ;;  %v549_v26 = vpack.c.bf16 %v53_v24, %v47_v23  ;;  %v49_v27 = vld [vmem:[%s1503_s1 + $0xd8] sm:$0xff]  ;;  %v55_v28 = vld [vmem:[%s1503_s1 + $0x108] sm:$0xff]  ;;  %v46_v29 = vld [vmem:[%s1503_s1 + $0xc0] sm:$0xff] }
   0x8   :  { %610 = vmatprep.subr.bf16.mxu1 %v609_v17  ;;  %v613_v30 = vpack.c.bf16 %v55_v28, %v49_v27  ;;  %v52_v31 = vld [vmem:[%s1503_s1 + $0xf0] sm:$0xff]  ;;  %v54_v33 = vld [vmem:[%s1503_s1 + $0x100] sm:$0xff]  ;;  %v59_v35 = vld [vmem:[%s1503_s1 + $0x128] sm:$0xff] }
   0x9   :  { %v48_v32 = vld [vmem:[%s1503_s1 + $0xd0] sm:$0xff]  ;;  %548 = vmatpush1.bf16.msra.mxu0 %v547_v21  ;;  %v551_v34 = vpack.c.bf16 %v52_v31, %v46_v29  ;;  %v65_v36 = vld [vmem:[%s1503_s1 + $0x158] sm:$0xff]  ;;  %v67_v40 = vld [vmem:[%s1503_s1 + $0x168] sm:$0xff] }
   0xa   :  { %v61_v37 = vld [vmem:[%s1503_s1 + $0x138] sm:$0xff]  ;;  %612 = vmatpush1.bf16.msra.mxu1 %v611_v25  ;;  %550 = vmatprep.subr.bf16.mxu0 %v549_v26  ;;  %v615_v38 = vpack.c.bf16 %v54_v33, %v48_v32  ;;  %v553_v39 = vpack.c.bf16 %v65_v36, %v59_v35  ;;  %v58_v41 = vld [vmem:[%s1503_s1 + $0x120] sm:$0xff]  ;;  %v64_v42 = vld [vmem:[%s1503_s1 + $0x150] sm:$0xff] }
   0xb   :  { %614 = vmatprep.subr.bf16.mxu1 %v613_v30  ;;  %v617_v43 = vpack.c.bf16 %v67_v40, %v61_v37  ;;  %v60_v44 = vld [vmem:[%s1503_s1 + $0x130] sm:$0xff]  ;;  %v66_v45 = vld [vmem:[%s1503_s1 + $0x160] sm:$0xff]  ;;  %v71_v46 = vld [vmem:[%s1503_s1 + $0x188] sm:$0xff]  ;;  %v555_v50 = vpack.c.bf16 %v64_v42, %v58_v41 }
   0xc   :  { %v77_v47 = vld [vmem:[%s1503_s1 + $0x1b8] sm:$0xff]  ;;  %v79_v49 = vld [vmem:[%s1503_s1 + $0x1c8] sm:$0xff]  ;;  %v619_v51 = vpack.c.bf16 %v66_v45, %v60_v44  ;;  %v70_v53 = vld [vmem:[%s1503_s1 + $0x180] sm:$0xff] }
   0xd   :  { %v73_v48 = vld [vmem:[%s1503_s1 + $0x198] sm:$0xff]  ;;  %552 = vmatpush1.bf16.msra.mxu0 %v551_v34  ;;  %v557_v52 = vpack.c.bf16 %v77_v47, %v71_v46  ;;  %v76_v54 = vld [vmem:[%s1503_s1 + $0x1b0] sm:$0xff]  ;;  %v78_v57 = vld [vmem:[%s1503_s1 + $0x1c0] sm:$0xff] }
   0xe   :  { %616 = vmatpush1.bf16.msra.mxu1 %v615_v38  ;;  %554 = vmatprep.subr.bf16.mxu0 %v553_v39  ;;  %v72_v55 = vld [vmem:[%s1503_s1 + $0x190] sm:$0xff]  ;;  %v621_v56 = vpack.c.bf16 %v79_v49, %v73_v48  ;;  %v83_v58 = vld [vmem:[%s1503_s1 + $0x1e8] sm:$0xff]  ;;  %v89_v59 = vld [vmem:[%s1503_s1 + $0x218] sm:$0xff]  ;;  %v559_v62 = vpack.c.bf16 %v76_v54, %v70_v53 }
   0xf   :  { %618 = vmatprep.subr.bf16.mxu1 %v617_v43  ;;  %v85_v60 = vld [vmem:[%s1503_s1 + $0x1f8] sm:$0xff]  ;;  %v91_v61 = vld [vmem:[%s1503_s1 + $0x228] sm:$0xff]  ;;  %v623_v63 = vpack.c.bf16 %v78_v57, %v72_v55  ;;  %v561_v0 = vpack.c.bf16 %v89_v59, %v83_v58  ;;  %v82_v1 = vld [vmem:[%s1503_s1 + $0x1e0] sm:$0xff] }
  0x10   :  { %v88_v2 = vld [vmem:[%s1503_s1 + $0x210] sm:$0xff]  ;;  %v625_v4 = vpack.c.bf16 %v91_v61, %v85_v60  ;;  %v90_v5 = vld [vmem:[%s1503_s1 + $0x220] sm:$0xff]  ;;  %v95_v6 = vld [vmem:[%s1503_s1 + $0x248] sm:$0xff] }
  0x11   :  { %556 = vmatpush1.bf16.msra.mxu0 %v555_v50  ;;  %v84_v3 = vld [vmem:[%s1503_s1 + $0x1f0] sm:$0xff]  ;;  %v101_v7 = vld [vmem:[%s1503_s1 + $0x278] sm:$0xff]  ;;  %v103_v9 = vld [vmem:[%s1503_s1 + $0x288] sm:$0xff]  ;;  %v563_v10 = vpack.c.bf16 %v88_v2, %v82_v1 }
  0x12   :  { %620 = vmatpush1.bf16.msra.mxu1 %v619_v51  ;;  %558 = vmatprep.subr.bf16.mxu0 %v557_v52  ;;  %v97_v8 = vld [vmem:[%s1503_s1 + $0x258] sm:$0xff]  ;;  %v627_v11 = vpack.c.bf16 %v90_v5, %v84_v3  ;;  %v565_v12 = vpack.c.bf16 %v101_v7, %v95_v6  ;;  %v94_v13 = vld [vmem:[%s1503_s1 + $0x240] sm:$0xff]  ;;  %v100_v14 = vld [vmem:[%s1503_s1 + $0x270] sm:$0xff] }
  0x13   :  { %622 = vmatprep.subr.bf16.mxu1 %v621_v56  ;;  %v96_v15 = vld [vmem:[%s1503_s1 + $0x250] sm:$0xff]  ;;  %v629_v16 = vpack.c.bf16 %v103_v9, %v97_v8  ;;  %v102_v17 = vld [vmem:[%s1503_s1 + $0x280] sm:$0xff]  ;;  %v107_v18 = vld [vmem:[%s1503_s1 + $0x2a8] sm:$0xff]  ;;  %v567_v22 = vpack.c.bf16 %v100_v14, %v94_v13 }
  0x14   :  { %v113_v19 = vld [vmem:[%s1503_s1 + $0x2d8] sm:$0xff]  ;;  %v115_v21 = vld [vmem:[%s1503_s1 + $0x2e8] sm:$0xff]  ;;  %v631_v23 = vpack.c.bf16 %v102_v17, %v96_v15  ;;  %v106_v25 = vld [vmem:[%s1503_s1 + $0x2a0] sm:$0xff] }
  0x15   :  { %560 = vmatpush1.bf16.msra.mxu0 %v559_v62  ;;  %v109_v20 = vld [vmem:[%s1503_s1 + $0x2b8] sm:$0xff]  ;;  %v569_v24 = vpack.c.bf16 %v113_v19, %v107_v18  ;;  %v112_v26 = vld [vmem:[%s1503_s1 + $0x2d0] sm:$0xff]  ;;  %v114_v29 = vld [vmem:[%s1503_s1 + $0x2e0] sm:$0xff] }
  0x16   :  { %624 = vmatpush1.bf16.msra.mxu1 %v623_v63  ;;  %562 = vmatprep.subr.bf16.mxu0 %v561_v0  ;;  %v108_v27 = vld [vmem:[%s1503_s1 + $0x2b0] sm:$0xff]  ;;  %v633_v28 = vpack.c.bf16 %v115_v21, %v109_v20  ;;  %v119_v30 = vld [vmem:[%s1503_s1 + $0x308] sm:$0xff]  ;;  %v125_v31 = vld [vmem:[%s1503_s1 + $0x338] sm:$0xff]  ;;  %v571_v34 = vpack.c.bf16 %v112_v26, %v106_v25 }
  0x17   :  { %626 = vmatprep.subr.bf16.mxu1 %v625_v4  ;;  %v121_v32 = vld [vmem:[%s1503_s1 + $0x318] sm:$0xff]  ;;  %v127_v33 = vld [vmem:[%s1503_s1 + $0x348] sm:$0xff]  ;;  %v635_v35 = vpack.c.bf16 %v114_v29, %v108_v27  ;;  %v573_v36 = vpack.c.bf16 %v125_v31, %v119_v30  ;;  %v118_v37 = vld [vmem:[%s1503_s1 + $0x300] sm:$0xff] }
  0x18   :  { %v124_v38 = vld [vmem:[%s1503_s1 + $0x330] sm:$0xff]  ;;  %v637_v40 = vpack.c.bf16 %v127_v33, %v121_v32  ;;  %v126_v41 = vld [vmem:[%s1503_s1 + $0x340] sm:$0xff]  ;;  %v131_v42 = vld [vmem:[%s1503_s1 + $0x368] sm:$0xff] }
  0x19   :  { %564 = vmatpush1.bf16.msra.mxu0 %v563_v10  ;;  %v120_v39 = vld [vmem:[%s1503_s1 + $0x310] sm:$0xff]  ;;  %v137_v43 = vld [vmem:[%s1503_s1 + $0x398] sm:$0xff]  ;;  %v139_v45 = vld [vmem:[%s1503_s1 + $0x3a8] sm:$0xff]  ;;  %v575_v46 = vpack.c.bf16 %v124_v38, %v118_v37 }
  0x1a   :  { %628 = vmatpush1.bf16.msra.mxu1 %v627_v11  ;;  %566 = vmatprep.subr.bf16.mxu0 %v565_v12  ;;  %v133_v44 = vld [vmem:[%s1503_s1 + $0x378] sm:$0xff]  ;;  %v639_v47 = vpack.c.bf16 %v126_v41, %v120_v39  ;;  %v577_v48 = vpack.c.bf16 %v137_v43, %v131_v42  ;;  %v130_v49 = vld [vmem:[%s1503_s1 + $0x360] sm:$0xff]  ;;  %v136_v50 = vld [vmem:[%s1503_s1 + $0x390] sm:$0xff] }
  0x1b   :  { %630 = vmatprep.subr.bf16.mxu1 %v629_v16  ;;  %v132_v51 = vld [vmem:[%s1503_s1 + $0x370] sm:$0xff]  ;;  %v641_v52 = vpack.c.bf16 %v139_v45, %v133_v44  ;;  %v138_v53 = vld [vmem:[%s1503_s1 + $0x3a0] sm:$0xff]  ;;  %v143_v54 = vld [vmem:[%s1503_s1 + $0x3c8] sm:$0xff]  ;;  %v579_v58 = vpack.c.bf16 %v136_v50, %v130_v49 }
  0x1c   :  { %v149_v55 = vld [vmem:[%s1503_s1 + $0x3f8] sm:$0xff]  ;;  %v151_v57 = vld [vmem:[%s1503_s1 + $0x408] sm:$0xff]  ;;  %v643_v59 = vpack.c.bf16 %v138_v53, %v132_v51  ;;  %v142_v61 = vld [vmem:[%s1503_s1 + $0x3c0] sm:$0xff] }
  0x1d   :  { %568 = vmatpush1.bf16.msra.mxu0 %v567_v22  ;;  %v145_v56 = vld [vmem:[%s1503_s1 + $0x3d8] sm:$0xff]  ;;  %v581_v60 = vpack.c.bf16 %v149_v55, %v143_v54  ;;  %v148_v62 = vld [vmem:[%s1503_s1 + $0x3f0] sm:$0xff]  ;;  %v150_v1 = vld [vmem:[%s1503_s1 + $0x400] sm:$0xff] }
  0x1e   :  { %632 = vmatpush1.bf16.msra.mxu1 %v631_v23  ;;  %570 = vmatprep.subr.bf16.mxu0 %v569_v24  ;;  %v144_v63 = vld [vmem:[%s1503_s1 + $0x3d0] sm:$0xff]  ;;  %v645_v0 = vpack.c.bf16 %v151_v57, %v145_v56  ;;  %v155_v2 = vld [vmem:[%s1503_s1 + $0x428] sm:$0xff]  ;;  %v161_v3 = vld [vmem:[%s1503_s1 + $0x458] sm:$0xff]  ;;  %v583_v6 = vpack.c.bf16 %v148_v62, %v142_v61 }
  0x1f   :  { %634 = vmatprep.subr.bf16.mxu1 %v633_v28  ;;  %v157_v4 = vld [vmem:[%s1503_s1 + $0x438] sm:$0xff]  ;;  %v163_v5 = vld [vmem:[%s1503_s1 + $0x468] sm:$0xff]  ;;  %v154_v7 = vld [vmem:[%s1503_s1 + $0x420] sm:$0xff]  ;;  %v647_v8 = vpack.c.bf16 %v150_v1, %v144_v63  ;;  %v585_v9 = vpack.c.bf16 %v161_v3, %v155_v2 }
  0x20   :  { %v160_v10 = vld [vmem:[%s1503_s1 + $0x450] sm:$0xff]  ;;  %v162_v12 = vld [vmem:[%s1503_s1 + $0x460] sm:$0xff]  ;;  %v649_v13 = vpack.c.bf16 %v163_v5, %v157_v4  ;;  %v167_v14 = vld [vmem:[%s1503_s1 + $0x488] sm:$0xff] }
  0x21   :  { %572 = vmatpush1.bf16.msra.mxu0 %v571_v34  ;;  %v156_v11 = vld [vmem:[%s1503_s1 + $0x430] sm:$0xff]  ;;  %v173_v15 = vld [vmem:[%s1503_s1 + $0x4b8] sm:$0xff]  ;;  %v1082_v16 = vld [vmem:[%s1504_s0 + $0x8] sm:$0xff]  ;;  %v587_v19 = vpack.c.bf16 %v160_v10, %v154_v7 }
  0x22   :  { %636 = vmatpush1.bf16.msra.mxu1 %v635_v35  ;;  %574 = vmatprep.subr.bf16.mxu0 %v573_v36  ;;  %v169_v17 = vld [vmem:[%s1503_s1 + $0x498] sm:$0xff]  ;;  %v175_v18 = vld [vmem:[%s1503_s1 + $0x4c8] sm:$0xff]  ;;  %v651_v20 = vpack.c.bf16 %v162_v12, %v156_v11  ;;  %v589_v21 = vpack.c.bf16 %v173_v15, %v167_v14  ;;  %v166_v22 = vld [vmem:[%s1503_s1 + $0x480] sm:$0xff] }
  0x23   :  { %638 = vmatprep.subr.bf16.mxu1 %v637_v40  ;;  %310 = vmatprep.mubr.f32.mxu0 %v1082_v16  ;;  %v172_v23 = vld [vmem:[%s1503_s1 + $0x4b0] sm:$0xff]  ;;  %v653_v25 = vpack.c.bf16 %v175_v18, %v169_v17  ;;  %v174_v26 = vld [vmem:[%s1503_s1 + $0x4c0] sm:$0xff]  ;;  %v179_v27 = vld [vmem:[%s1503_s1 + $0x4e8] sm:$0xff] }
  0x24   :  { %399 = vmatprep.mubr.f32.mxu1 %v1082_v16  ;;  %v168_v24 = vld [vmem:[%s1503_s1 + $0x490] sm:$0xff]  ;;  %v185_v28 = vld [vmem:[%s1503_s1 + $0x518] sm:$0xff]  ;;  %v187_v30 = vld [vmem:[%s1503_s1 + $0x528] sm:$0xff]  ;;  %v591_v31 = vpack.c.bf16 %v172_v23, %v166_v22 }
  0x25   :  { %576 = vmatpush1.bf16.msra.mxu0 %v575_v46  ;;  %v181_v29 = vld [vmem:[%s1503_s1 + $0x4f8] sm:$0xff]  ;;  %v655_v32 = vpack.c.bf16 %v174_v26, %v168_v24  ;;  %v593_v33 = vpack.c.bf16 %v185_v28, %v179_v27  ;;  %v178_v34 = vld [vmem:[%s1503_s1 + $0x4e0] sm:$0xff]  ;;  %v184_v35 = vld [vmem:[%s1503_s1 + $0x510] sm:$0xff] }
  0x26   :  { %640 = vmatpush1.bf16.msra.mxu1 %v639_v47  ;;  %578 = vmatprep.subr.bf16.mxu0 %v577_v48  ;;  %v180_v36 = vld [vmem:[%s1503_s1 + $0x4f0] sm:$0xff]  ;;  %v657_v37 = vpack.c.bf16 %v187_v30, %v181_v29  ;;  %v186_v38 = vld [vmem:[%s1503_s1 + $0x520] sm:$0xff]  ;;  %v191_v39 = vld [vmem:[%s1503_s1 + $0x548] sm:$0xff]  ;;  %v595_v43 = vpack.c.bf16 %v184_v35, %v178_v34 }
  0x27   :  { %642 = vmatprep.subr.bf16.mxu1 %v641_v52  ;;  %v197_v40 = vld [vmem:[%s1503_s1 + $0x578] sm:$0xff]  ;;  %v199_v42 = vld [vmem:[%s1503_s1 + $0x588] sm:$0xff]  ;;  %v659_v44 = vpack.c.bf16 %v186_v38, %v180_v36  ;;  %v190_v46 = vld [vmem:[%s1503_s1 + $0x540] sm:$0xff] }
  0x28   :  { %v193_v41 = vld [vmem:[%s1503_s1 + $0x558] sm:$0xff]  ;;  %v597_v45 = vpack.c.bf16 %v197_v40, %v191_v39  ;;  %v196_v47 = vld [vmem:[%s1503_s1 + $0x570] sm:$0xff]  ;;  %v198_v50 = vld [vmem:[%s1503_s1 + $0x580] sm:$0xff] }
  0x29   :  { %580 = vmatpush1.bf16.msra.mxu0 %v579_v58  ;;  %v192_v48 = vld [vmem:[%s1503_s1 + $0x550] sm:$0xff]  ;;  %v661_v49 = vpack.c.bf16 %v199_v42, %v193_v41  ;;  %v203_v51 = vld [vmem:[%s1503_s1 + $0x5a8] sm:$0xff]  ;;  %v209_v52 = vld [vmem:[%s1503_s1 + $0x5d8] sm:$0xff]  ;;  %v599_v55 = vpack.c.bf16 %v196_v47, %v190_v46 }
  0x2a   :  { %644 = vmatpush1.bf16.msra.mxu1 %v643_v59  ;;  %582 = vmatprep.subr.bf16.mxu0 %v581_v60  ;;  %v205_v53 = vld [vmem:[%s1503_s1 + $0x5b8] sm:$0xff]  ;;  %v211_v54 = vld [vmem:[%s1503_s1 + $0x5e8] sm:$0xff]  ;;  %v663_v56 = vpack.c.bf16 %v198_v50, %v192_v48  ;;  %v601_v57 = vpack.c.bf16 %v209_v52, %v203_v51  ;;  %v202_v58 = vld [vmem:[%s1503_s1 + $0x5a0] sm:$0xff] }
  0x2b   :  { %646 = vmatprep.subr.bf16.mxu1 %v645_v0  ;;  %v208_v59 = vld [vmem:[%s1503_s1 + $0x5d0] sm:$0xff]  ;;  %v665_v61 = vpack.c.bf16 %v211_v54, %v205_v53  ;;  %v210_v62 = vld [vmem:[%s1503_s1 + $0x5e0] sm:$0xff]  ;;  %v27_v63 = vld [vmem:[%s1503_s1 + $0x28] sm:$0xff] }
  0x2c   :  { %v204_v60 = vld [vmem:[%s1503_s1 + $0x5b0] sm:$0xff]  ;;  %v33_v0 = vld [vmem:[%s1503_s1 + $0x58] sm:$0xff]  ;;  %v603_v1 = vpack.c.bf16 %v208_v59, %v202_v58  ;;  %v26_v4 = vld [vmem:[%s1503_s1 + $0x20] sm:$0xff] }
  0x2d   :  { %584 = vmatpush1.bf16.msra.mxu0 %v583_v6  ;;  %v667_v2 = vpack.c.bf16 %v210_v62, %v204_v60  ;;  %v669_v3 = vpack.c.bf16 %v33_v0, %v27_v63  ;;  %v32_v5 = vld [vmem:[%s1503_s1 + $0x50] sm:$0xff]  ;;  %v39_v6 = vld [vmem:[%s1503_s1 + $0x88] sm:$0xff]  ;;  %v45_v7 = vld [vmem:[%s1503_s1 + $0xb8] sm:$0xff] }
  0x2e   :  { %648 = vmatpush1.bf16.msra.mxu1 %v647_v8  ;;  %586 = vmatprep.subr.bf16.mxu0 %v585_v9  ;;  %v1197_v8 = vld [vmem:[%s1504_s0] sm:$0xff]  ;;  %v671_v9 = vpack.c.bf16 %v32_v5, %v26_v4  ;;  %v673_v10 = vpack.c.bf16 %v45_v7, %v39_v6  ;;  %v44_v12 = vld [vmem:[%s1503_s1 + $0xb0] sm:$0xff]  ;;  %v57_v14 = vld [vmem:[%s1503_s1 + $0x118] sm:$0xff] }
  0x2f   :  { %650 = vmatprep.subr.bf16.mxu1 %v649_v13  ;;  %v38_v11 = vld [vmem:[%s1503_s1 + $0x80] sm:$0xff]  ;;  %v51_v13 = vld [vmem:[%s1503_s1 + $0xe8] sm:$0xff]  ;;  %v1215_v15 = vld [vmem:[%s1504_s0 + $0x18] sm:$0xff] }
  0x30   :  { %v675_v17 = vpack.c.bf16 %v44_v12, %v38_v11  ;;  %v1221_v18 = vld [vmem:[%s1504_s0 + $0x10] sm:$0xff]  ;;  %v63_v22 = vld [vmem:[%s1503_s1 + $0x148] sm:$0xff]  ;;  %v69_v23 = vld [vmem:[%s1503_s1 + $0x178] sm:$0xff] }
  0x31   :  { %588 = vmatpush1.bf16.msra.mxu0 %v587_v19  ;;  %v677_v19 = vpack.c.bf16 %v57_v14, %v51_v13  ;;  %v19_v24 = vld [vmem:[%s1504_s0 + $0x28] sm:$0xff]  ;;  %v1245_v26 = vld [vmem:[%s1504_s0 + $0x20] sm:$0xff]  ;;  %v681_v27 = vpack.c.bf16 %v69_v23, %v63_v22  ;;  %v68_v29 = vld [vmem:[%s1503_s1 + $0x170] sm:$0xff] }
  0x32   :  { %652 = vmatpush1.bf16.msra.mxu1 %v651_v20  ;;  %590 = vmatprep.subr.bf16.mxu0 %v589_v21  ;;  %v50_v20 = vld [vmem:[%s1503_s1 + $0xe0] sm:$0xff]  ;;  %v56_v21 = vld [vmem:[%s1503_s1 + $0x110] sm:$0xff]  ;;  %v75_v30 = vld [vmem:[%s1503_s1 + $0x1a8] sm:$0xff] }
  0x33   :  { %654 = vmatprep.subr.bf16.mxu1 %v653_v25  ;;  %v679_v25 = vpack.c.bf16 %v56_v21, %v50_v20  ;;  %v62_v28 = vld [vmem:[%s1503_s1 + $0x140] sm:$0xff]  ;;  %v1269_v34 = vld [vmem:[%s1504_s0 + $0x30] sm:$0xff]  ;;  %v87_v38 = vld [vmem:[%s1503_s1 + $0x208] sm:$0xff] }
  0x34   :  { %v74_v36 = vld [vmem:[%s1503_s1 + $0x1a0] sm:$0xff]  ;;  %v93_v39 = vld [vmem:[%s1503_s1 + $0x238] sm:$0xff]  ;;  %v111_v50 = vld [vmem:[%s1503_s1 + $0x2c8] sm:$0xff] }
  0x35   :  { %592 = vmatpush1.bf16.msra.mxu0 %v591_v31  ;;  %v81_v31 = vld [vmem:[%s1503_s1 + $0x1d8] sm:$0xff]  ;;  %v689_v41 = vpack.c.bf16 %v93_v39, %v87_v38  ;;  %v86_v42 = vld [vmem:[%s1503_s1 + $0x200] sm:$0xff]  ;;  %v116_v54 = vld [vmem:[%s1503_s1 + $0x2f0] sm:$0xff] }
  0x36   :  { %656 = vmatpush1.bf16.msra.mxu1 %v655_v32  ;;  %594 = vmatprep.subr.bf16.mxu0 %v593_v33  ;;  %v1263_v32 = vld [vmem:[%s1504_s0 + $0x38] sm:$0xff]  ;;  %v683_v33 = vpack.c.bf16 %v68_v29, %v62_v28  ;;  %v685_v35 = vpack.c.bf16 %v81_v31, %v75_v30  ;;  %v98_v48 = vld [vmem:[%s1503_s1 + $0x260] sm:$0xff]  ;;  %v128_v60 = vld [vmem:[%s1503_s1 + $0x350] sm:$0xff] }
  0x37   :  { %658 = vmatprep.subr.bf16.mxu1 %v657_v37  ;;  %v80_v37 = vld [vmem:[%s1503_s1 + $0x1d0] sm:$0xff]  ;;  %v110_v53 = vld [vmem:[%s1503_s1 + $0x2c0] sm:$0xff]  ;;  %v141_v62 = vld [vmem:[%s1503_s1 + $0x3b8] sm:$0xff] }
  0x38   :  { %v687_v40 = vpack.c.bf16 %v80_v37, %v74_v36  ;;  %v122_v59 = vld [vmem:[%s1503_s1 + $0x320] sm:$0xff]  ;;  %v153_v4 = vld [vmem:[%s1503_s1 + $0x418] sm:$0xff]  ;;  %v188_v31 = vld [vmem:[%s1503_s1 + $0x530] sm:$0xff] }
  0x39   :  { %596 = vmatpush1.bf16.msra.mxu0 %v595_v43  ;;  %v92_v43 = vld [vmem:[%s1503_s1 + $0x230] sm:$0xff]  ;;  %v703_v63 = vpack.c.bf16 %v128_v60, %v122_v59  ;;  %v146_v7 = vld [vmem:[%s1503_s1 + $0x3e0] sm:$0xff]  ;;  %v165_v11 = vld [vmem:[%s1503_s1 + $0x478] sm:$0xff] }
  0x3a   :  { %660 = vmatpush1.bf16.msra.mxu1 %v659_v44  ;;  %598 = vmatprep.subr.bf16.mxu0 %v597_v45  ;;  %v99_v44 = vld [vmem:[%s1503_s1 + $0x268] sm:$0xff]  ;;  %v105_v45 = vld [vmem:[%s1503_s1 + $0x298] sm:$0xff]  ;;  %v691_v46 = vpack.c.bf16 %v92_v43, %v86_v42  ;;  %v158_v14 = vld [vmem:[%s1503_s1 + $0x440] sm:$0xff] }
  0x3b   :  { %662 = vmatprep.subr.bf16.mxu1 %v661_v49  ;;  %v693_v47 = vpack.c.bf16 %v105_v45, %v99_v44  ;;  %v104_v49 = vld [vmem:[%s1503_s1 + $0x290] sm:$0xff]  ;;  %v177_v20 = vld [vmem:[%s1503_s1 + $0x4d8] sm:$0xff]  ;;  %v170_v23 = vld [vmem:[%s1503_s1 + $0x4a0] sm:$0xff] }
  0x3c   :  { %v695_v51 = vpack.c.bf16 %v104_v49, %v98_v48  ;;  %v182_v30 = vld [vmem:[%s1503_s1 + $0x500] sm:$0xff]  ;;  %v200_v39 = vld [vmem:[%s1503_s1 + $0x590] sm:$0xff] }
  0x3d   :  { %600 = vmatpush1.bf16.msra.mxu0 %v599_v55  ;;  %v123_v55 = vld [vmem:[%s1503_s1 + $0x328] sm:$0xff]  ;;  %v723_v36 = vpack.c.bf16 %v188_v31, %v182_v30  ;;  %v194_v38 = vld [vmem:[%s1503_s1 + $0x560] sm:$0xff]  ;;  %v212_v45 = vld [vmem:[%s1503_s1 + $0x5f0] sm:$0xff] }
  0x3e   :  { %664 = vmatpush1.bf16.msra.mxu1 %v663_v56  ;;  %602 = vmatprep.subr.bf16.mxu0 %v601_v57  ;;  %v129_v56 = vld [vmem:[%s1503_s1 + $0x358] sm:$0xff]  ;;  %v699_v57 = vpack.c.bf16 %v116_v54, %v110_v53  ;;  %v727_v42 = vpack.c.bf16 %v200_v39, %v194_v38  ;;  %v206_v44 = vld [vmem:[%s1503_s1 + $0x5c0] sm:$0xff] }
  0x3f   :  { %666 = vmatprep.subr.bf16.mxu1 %v665_v61  ;;  %v701_v58 = vpack.c.bf16 %v129_v56, %v123_v55  ;;  %v135_v61 = vld [vmem:[%s1503_s1 + $0x388] sm:$0xff] }
  0x40   :  { %v705_v0 = vpack.c.bf16 %v141_v62, %v135_v61 }
  0x41   :  { %604 = vmatpush1.bf16.msra.mxu0 %v603_v1  ;;  %v134_v1 = vld [vmem:[%s1503_s1 + $0x380] sm:$0xff] }
  0x42   :  { %668 = vmatpush1.bf16.msra.mxu1 %v667_v2  ;;  %670 = vmatprep.subr.bf16.mxu0 %v669_v3  ;;  %v140_v2 = vld [vmem:[%s1503_s1 + $0x3b0] sm:$0xff] }
  0x43   :  { %733 = vmatprep.subr.bf16.mxu1 %v669_v3  ;;  %v147_v3 = vld [vmem:[%s1503_s1 + $0x3e8] sm:$0xff]  ;;  %v707_v5 = vpack.c.bf16 %v140_v2, %v134_v1 }
  0x44   :  { %311 = vmatmul.mubr.f32.vlgmr.msra.gmra.mrb[0].mxu0 %v1197_v8  ;;  %v709_v6 = vpack.c.bf16 %v153_v4, %v147_v3 }
  0x45   :  { %400 = vmatmul.mubr.f32.vlgmr.msra.gmra.mrb[0].mxu1 %v1197_v8  ;;  %672 = vmatpush1.bf16.msra.mxu0 %v671_v9 }
  0x46   :  { %749 = vmatpush1.bf16.msra.mxu1 %v671_v9  ;;  %674 = vmatprep.subr.bf16.mxu0 %v673_v10  ;;  %v152_v9 = vld [vmem:[%s1503_s1 + $0x410] sm:$0xff] }
  0x47   :  { %734 = vmatprep.subr.bf16.mxu1 %v673_v10  ;;  %316 = vmatprep.mubr.f32.mxu0 %v1215_v15  ;;  %v159_v10 = vld [vmem:[%s1503_s1 + $0x448] sm:$0xff]  ;;  %v711_v12 = vpack.c.bf16 %v152_v9, %v146_v7 }
  0x48   :  { %405 = vmatprep.mubr.f32.mxu1 %v1215_v15  ;;  %317 = vmatmul.mubr.f32.gmra.mrb[2].mxu0 %v1221_v18  ;;  %v713_v13 = vpack.c.bf16 %v165_v11, %v159_v10 }
  0x49   :  { %676 = vmatpush1.bf16.msra.mxu0 %v675_v17  ;;  %406 = vmatmul.mubr.f32.gmra.mrb[2].mxu1 %v1221_v18 }
  0x4a   :  { %750 = vmatpush1.bf16.msra.mxu1 %v675_v17  ;;  %678 = vmatprep.subr.bf16.mxu0 %v677_v19  ;;  %v164_v17 = vld [vmem:[%s1503_s1 + $0x470] sm:$0xff] }
  0x4b   :  { %735 = vmatprep.subr.bf16.mxu1 %v677_v19  ;;  %322 = vmatprep.mubr.f32.mxu0 %v19_v24  ;;  %v171_v19 = vld [vmem:[%s1503_s1 + $0x4a8] sm:$0xff]  ;;  %v715_v21 = vpack.c.bf16 %v164_v17, %v158_v14 }
  0x4c   :  { %411 = vmatprep.mubr.f32.mxu1 %v19_v24  ;;  %323 = vmatmul.mubr.f32.gmra.mrb[4].mxu0 %v1245_v26  ;;  %v717_v22 = vpack.c.bf16 %v177_v20, %v171_v19 }
  0x4d   :  { %680 = vmatpush1.bf16.msra.mxu0 %v679_v25  ;;  %412 = vmatmul.mubr.f32.gmra.mrb[4].mxu1 %v1245_v26 }
  0x4e   :  { %751 = vmatpush1.bf16.msra.mxu1 %v679_v25  ;;  %682 = vmatprep.subr.bf16.mxu0 %v681_v27  ;;  %v183_v25 = vld [vmem:[%s1503_s1 + $0x508] sm:$0xff] }
  0x4f   :  { %736 = vmatprep.subr.bf16.mxu1 %v681_v27  ;;  %328 = vmatprep.mubr.f32.mxu0 %v1263_v32  ;;  %v189_v27 = vld [vmem:[%s1503_s1 + $0x538] sm:$0xff] }
  0x50   :  { %417 = vmatprep.mubr.f32.mxu1 %v1263_v32  ;;  %329 = vmatmul.mubr.f32.gmra.mrb[6].mxu0 %v1269_v34  ;;  %v721_v29 = vpack.c.bf16 %v189_v27, %v183_v25 }
  0x51   :  { %684 = vmatpush1.bf16.msra.mxu0 %v683_v33  ;;  %418 = vmatmul.mubr.f32.gmra.mrb[6].mxu1 %v1269_v34 }
  0x52   :  { %752 = vmatpush1.bf16.msra.mxu1 %v683_v33  ;;  %686 = vmatprep.subr.bf16.mxu0 %v685_v35  ;;  %v195_v33 = vld [vmem:[%s1503_s1 + $0x568] sm:$0xff] }
  0x53   :  { %737 = vmatprep.subr.bf16.mxu1 %v685_v35  ;;  %488 = vmatprep.mubr.f32.mxu0 %v1082_v16  ;;  %v117_v16 = vld [vmem:[%s1503_s1 + $0x2f8] sm:$0xff] }
  0x54   :  { %500 = vmatprep.mubr.f32.mxu1 %v19_v24  ;;  %v697_v52 = vpack.c.bf16 %v117_v16, %v111_v50  ;;  %v176_v24 = vld [vmem:[%s1503_s1 + $0x4d0] sm:$0xff]  ;;  %v201_v35 = vld [vmem:[%s1503_s1 + $0x598] sm:$0xff]  ;;  %v214_v50 = vld [vmem:[%s1505_s2] sm:$0x3f] }
  0x55   :  { %688 = vmatpush1.bf16.msra.mxu0 %v687_v40  ;;  %v719_v28 = vpack.c.bf16 %v176_v24, %v170_v23  ;;  %v725_v37 = vpack.c.bf16 %v201_v35, %v195_v33 }
  0x56   :  { %753 = vmatpush1.bf16.msra.mxu1 %v687_v40  ;;  %690 = vmatprep.subr.bf16.mxu0 %v689_v41  ;;  %v207_v40 = vld [vmem:[%s1503_s1 + $0x5c8] sm:$0xff] }
  0x57   :  { %738 = vmatprep.subr.bf16.mxu1 %v689_v41  ;;  %v213_v41 = vld [vmem:[%s1503_s1 + $0x5f8] sm:$0xff] }
  0x58   :  { %v729_v43 = vpack.c.bf16 %v213_v41, %v207_v40 }
  0x59   :  { %692 = vmatpush1.bf16.msra.mxu0 %v691_v46 }
  0x5a   :  { %754 = vmatpush1.bf16.msra.mxu1 %v691_v46  ;;  %694 = vmatprep.subr.bf16.mxu0 %v693_v47  ;;  %v731_v46 = vpack.c.bf16 %v212_v45, %v206_v44 }
  0x5b   :  { %739 = vmatprep.subr.bf16.mxu1 %v693_v47  ;;  %v216_v47 = vlaneseq }
  0x5d   :  { %696 = vmatpush1.bf16.msra.mxu0 %v695_v51  ;;  %v1420_v48 = vshrl.u32 %v216_v47, 7 }
  0x5e   :  { %755 = vmatpush1.bf16.msra.mxu1 %v695_v51  ;;  %698 = vmatprep.subr.bf16.mxu0 %v697_v52 }
  0x5f   :  { %740 = vmatprep.subr.bf16.mxu1 %v697_v52  ;;  %v218_v49 = vsub.s32 0, %v1420_v48  ;;  %v234_v23 = vsub.s32 4, %v1420_v48  ;;  %v238_v24 = vsub.s32 5, %v1420_v48 }
  0x61   :  { %700 = vmatpush1.bf16.msra.mxu0 %v699_v57  ;;  %v235_v25 = vrot.slane %v214_v50, %v234_v23  ;;  %v239_v27 = vrot.slane %v214_v50, %v238_v24 }
  0x62   :  { %756 = vmatpush1.bf16.msra.mxu1 %v699_v57  ;;  %702 = vmatprep.subr.bf16.mxu0 %v701_v58 }
  0x63   :  { %741 = vmatprep.subr.bf16.mxu1 %v701_v58 }
  0x65   :  { %704 = vmatpush1.bf16.msra.mxu0 %v703_v63 }
  0x66   :  { %757 = vmatpush1.bf16.msra.mxu1 %v703_v63  ;;  %706 = vmatprep.subr.bf16.mxu0 %v705_v0 }
  0x67   :  { %742 = vmatprep.subr.bf16.mxu1 %v705_v0 }
  0x69   :  { %708 = vmatpush1.bf16.msra.mxu0 %v707_v5 }
  0x6a   :  { %758 = vmatpush1.bf16.msra.mxu1 %v707_v5  ;;  %710 = vmatprep.subr.bf16.mxu0 %v709_v6 }
  0x6b   :  { %743 = vmatprep.subr.bf16.mxu1 %v709_v6 }
  0x6d   :  { %712 = vmatpush1.bf16.msra.mxu0 %v711_v12 }
  0x6e   :  { %759 = vmatpush1.bf16.msra.mxu1 %v711_v12  ;;  %714 = vmatprep.subr.bf16.mxu0 %v713_v13 }
  0x6f   :  { %744 = vmatprep.subr.bf16.mxu1 %v713_v13 }
  0x71   :  { %716 = vmatpush1.bf16.msra.mxu0 %v715_v21 }
  0x72   :  { %760 = vmatpush1.bf16.msra.mxu1 %v715_v21  ;;  %718 = vmatprep.subr.bf16.mxu0 %v717_v22 }
  0x73   :  { %745 = vmatprep.subr.bf16.mxu1 %v717_v22 }
  0x75   :  { %720 = vmatpush1.bf16.msra.mxu0 %v719_v28 }
  0x76   :  { %761 = vmatpush1.bf16.msra.mxu1 %v719_v28  ;;  %722 = vmatprep.subr.bf16.mxu0 %v721_v29 }
  0x77   :  { %746 = vmatprep.subr.bf16.mxu1 %v721_v29 }
  0x79   :  { %724 = vmatpush1.bf16.msra.mxu0 %v723_v36 }
  0x7a   :  { %762 = vmatpush1.bf16.msra.mxu1 %v723_v36  ;;  %726 = vmatprep.subr.bf16.mxu0 %v725_v37 }
  0x7b   :  { %747 = vmatprep.subr.bf16.mxu1 %v725_v37 }
  0x7d   :  { %728 = vmatpush1.bf16.msra.mxu0 %v727_v42 }
  0x7e   :  { %763 = vmatpush1.bf16.msra.mxu1 %v727_v42  ;;  %730 = vmatprep.subr.bf16.mxu0 %v729_v43 }
  0x7f   :  { %748 = vmatprep.subr.bf16.mxu1 %v729_v43 }
  0x81   :  { %732 = vmatpush1.bf16.msra.mxu0 %v731_v46 }
  0x82   :  { %764 = vmatpush1.bf16.msra.mxu1 %v731_v46 }
  0x84   :  { %489 = vmatmul.mubr.f32.vlgmr.msra.gmra.mrb[8].mxu0 %v1197_v8  ;;  %v226_v8 = vsub.s32 2, %v1420_v48 }
  0x85   :  { %501 = vmatmul.mubr.f32.vlgmr.msra.gmra.mrb[8].mxu1 %v1245_v26  ;;  %494 = vmatprep.mubr.f32.mxu0 %v1215_v15  ;;  %v222_v26 = vsub.s32 1, %v1420_v48  ;;  %v230_v15 = vsub.s32 3, %v1420_v48 }
  0x86   :  { %506 = vmatprep.mubr.f32.mxu1 %v1263_v32  ;;  %v219_v32 = vrot.slane %v214_v50, %v218_v49  ;;  %v227_v16 = vrot.slane %v214_v50, %v226_v8 }
  0x87   :  { %v231_v51 = vrot.slane %v214_v50, %v230_v15 }
  0x88   :  { %495 = vmatmul.mubr.f32.gmra.mrb[10].mxu0 %v1221_v18  ;;  %v223_v18 = vrot.slane %v214_v50, %v222_v26 }
  0x89   :  { %507 = vmatmul.mubr.f32.gmra.mrb[10].mxu1 %v1269_v34 }
 0x117   :  { %v312_v34 = vpop.f32.mrb[0].mxu0 }
 0x118   :  { %v313_v52 = vadd.f32 %v312_v34, %v219_v32  ;;  %v401_v53 = vpop.f32.mrb[0].mxu1  ;;  %v314_v54 = vpop.f32.mrb[1].mxu0 }
 0x119   :  { %v402_v55 = vadd.f32 %v401_v53, %v227_v16  ;;  %v315_v56 = vadd.f32 %v314_v54, %v223_v18  ;;  %v403_v57 = vpop.f32.mrb[1].mxu1 }
 0x11a   :  { %513 = vst [vmem:[%s1506_s3] sm:$0xff] %v313_v52  ;;  %v404_v58 = vadd.f32 %v403_v57, %v231_v51 }
 0x11b   :  { %515 = vst [vmem:[%s1506_s3 + $0x10] sm:$0xff] %v402_v55  ;;  %514 = vst [vmem:[%s1506_s3 + $0x8] sm:$0xff] %v315_v56  ;;  %v318_v59 = vpop.f32.mrb[2].mxu0 }
 0x11c   :  { %516 = vst [vmem:[%s1506_s3 + $0x18] sm:$0xff] %v404_v58  ;;  %v319_v60 = vadd.f32 %v318_v59, %v219_v32  ;;  %v407_v61 = vpop.f32.mrb[2].mxu1  ;;  %v320_v62 = vpop.f32.mrb[3].mxu0 }
 0x11d   :  { %v408_v63 = vadd.f32 %v407_v61, %v227_v16  ;;  %v321_v0 = vadd.f32 %v320_v62, %v223_v18  ;;  %v409_v1 = vpop.f32.mrb[3].mxu1 }
 0x11e   :  { %519 = vst [vmem:[%s1506_s3 + $0x30] sm:$0xff] %v319_v60  ;;  %v410_v2 = vadd.f32 %v409_v1, %v231_v51 }
 0x11f   :  { %521 = vst [vmem:[%s1506_s3 + $0x40] sm:$0xff] %v408_v63  ;;  %520 = vst [vmem:[%s1506_s3 + $0x38] sm:$0xff] %v321_v0  ;;  %v324_v3 = vpop.f32.mrb[4].mxu0 }
 0x120   :  { %522 = vst [vmem:[%s1506_s3 + $0x48] sm:$0xff] %v410_v2  ;;  %v325_v4 = vadd.f32 %v324_v3, %v219_v32  ;;  %v413_v5 = vpop.f32.mrb[4].mxu1  ;;  %v326_v6 = vpop.f32.mrb[5].mxu0 }
 0x121   :  { %v414_v7 = vadd.f32 %v413_v5, %v227_v16  ;;  %v327_v9 = vadd.f32 %v326_v6, %v223_v18  ;;  %v415_v10 = vpop.f32.mrb[5].mxu1 }
 0x122   :  { %525 = vst [vmem:[%s1506_s3 + $0x60] sm:$0xff] %v325_v4  ;;  %v416_v11 = vadd.f32 %v415_v10, %v231_v51 }
 0x123   :  { %527 = vst [vmem:[%s1506_s3 + $0x70] sm:$0xff] %v414_v7  ;;  %526 = vst [vmem:[%s1506_s3 + $0x68] sm:$0xff] %v327_v9  ;;  %v330_v12 = vpop.f32.mrb[6].mxu0 }
 0x124   :  { %528 = vst [vmem:[%s1506_s3 + $0x78] sm:$0xff] %v416_v11  ;;  %v331_v13 = vadd.f32 %v330_v12, %v219_v32  ;;  %v419_v14 = vpop.f32.mrb[6].mxu1  ;;  %v332_v17 = vpop.f32.mrb[7].mxu0 }
 0x125   :  { %v420_v19 = vadd.f32 %v419_v14, %v227_v16  ;;  %v333_v20 = vadd.f32 %v332_v17, %v223_v18  ;;  %v421_v21 = vpop.f32.mrb[7].mxu1 }
 0x126   :  { %531 = vst [vmem:[%s1506_s3 + $0x90] sm:$0xff] %v331_v13  ;;  %v422_v22 = vadd.f32 %v421_v21, %v231_v51 }
 0x127   :  { %533 = vst [vmem:[%s1506_s3 + $0xa0] sm:$0xff] %v420_v19  ;;  %532 = vst [vmem:[%s1506_s3 + $0x98] sm:$0xff] %v333_v20 }
 0x128   :  { %534 = vst [vmem:[%s1506_s3 + $0xa8] sm:$0xff] %v422_v22 }
 0x157   :  { %v490_v28 = vpop.f32.mrb[8].mxu0 }
 0x158   :  { %v491_v29 = vadd.f32 %v490_v28, %v235_v25  ;;  %v502_v30 = vpop.f32.mrb[8].mxu1  ;;  %v492_v31 = vpop.f32.mrb[9].mxu0 }
 0x159   :  { %v503_v33 = vadd.f32 %v502_v30, %v235_v25  ;;  %v493_v35 = vadd.f32 %v492_v31, %v239_v27  ;;  %v504_v36 = vpop.f32.mrb[9].mxu1 }
 0x15a   :  { %517 = vst [vmem:[%s1506_s3 + $0x20] sm:$0xff] %v491_v29  ;;  %v505_v37 = vadd.f32 %v504_v36, %v239_v27 }
 0x15b   :  { %529 = vst [vmem:[%s1506_s3 + $0x80] sm:$0xff] %v503_v33  ;;  %518 = vst [vmem:[%s1506_s3 + $0x28] sm:$0xff] %v493_v35  ;;  %v496_v38 = vpop.f32.mrb[10].mxu0 }
 0x15c   :  { %530 = vst [vmem:[%s1506_s3 + $0x88] sm:$0xff] %v505_v37  ;;  %v497_v39 = vadd.f32 %v496_v38, %v235_v25  ;;  %v508_v40 = vpop.f32.mrb[10].mxu1  ;;  %v498_v41 = vpop.f32.mrb[11].mxu0 }
 0x15d   :  { %v509_v42 = vadd.f32 %v508_v40, %v235_v25  ;;  %v499_v43 = vadd.f32 %v498_v41, %v239_v27  ;;  %v510_v44 = vpop.f32.mrb[11].mxu1 }
 0x15e   :  { %523 = vst [vmem:[%s1506_s3 + $0x50] sm:$0xff] %v497_v39  ;;  %v511_v45 = vadd.f32 %v510_v44, %v239_v27 }
 0x15f   :  { %535 = vst [vmem:[%s1506_s3 + $0xb0] sm:$0xff] %v509_v42  ;;  %524 = vst [vmem:[%s1506_s3 + $0x58] sm:$0xff] %v499_v43 }
 0x160   :  { %536 = vst [vmem:[%s1506_s3 + $0xb8] sm:$0xff] %v511_v45 }

// kernel: forward.6
= control target key start
LH: loop header
LB: loop body
LE: loop exit
PB: predicated region body
PF: predicated region fallthrough
CT: control target
= control target key end

     0   :  { %s998_s12 = smov 0   ;;  %s1632_s0 = inlined_call_operand.vmem [shape: f32[16,2,768], index: 0, kind: input, shape index: {}]   ;;  %s1633_s1 = inlined_call_operand.vmem [shape: f32[256,768], index: 1, kind: input, shape index: {}]   ;;  %s1634_s2 = inlined_call_operand.vmem [shape: f32[1,768], index: 2, kind: input, shape index: {}]   ;;  %s1635_s3 = inlined_call_operand.vmem [shape: f32[16,2,256], index: 3, kind: output, shape index: {}]  }
   0x1 LB: > { %s741_s13 = sadd.s32 4294967295, %s974_s12   ;;  %p745_p0 = scmp.ge.s32.totalorder %s974_s12, 1  ;;  %s974_s12 = sphi %s998_s12, %s13_s12  }
   0x2   : > { %p137_p1 = scmp.lt.s32.totalorder %s974_s12, 17 }
   0x4   : > { %p138_p2 = pnand %p745_p0, %p137_p1 }
   0x5   : > { %p161_p3 = scmp.lt.s32.totalorder (!%p138_p2), %s741_s13, 15  ;;  %p749_p4 = scmp.ne.s32.totalorder (!%p138_p2), %s741_s13, 0 }
   0x6   : > { %141 = sbr.rel (%p138_p2) target bundleno = 391 (0x187), region = 32 }
   0xd   : > { %s162_s14 = scalar_select %p161_p3, %s741_s13, 15 }
   0xe   : > { %174 = sbr.rel (%p749_p4) target bundleno = 21 (0x15), region = 36  ;;  %v976_v0 = vmov (!%p749_p4), 0.0  }
   0xf   : > { %s947_s15 = smul.u32 12, %s162_s14  ;;  %s754_s16 = sshll.u32 %s162_s14, 2  ;;  %175 = vst [vmem:[#allocation2] sm:$0xf] (!%p749_p4), %v976_v0 }
  0x10   : > { %s1009_s19 = scalar_lea.vmem %s1635_s3, %s754_s16 }
  0x11   : > { %s1014_s22 = scalar_lea.vmem %s1632_s0, %s947_s15 }
  0x15 PF: > { %v178_v1 = vld [vmem:[%s1633_s1 + $0x8] sm:$0xff]  ;;  %v184_v2 = vld [vmem:[%s1633_s1 + $0x38] sm:$0xff]  ;;  %v177_v3 = vld [vmem:[%s1633_s1] sm:$0xff]  ;;  %v371_v32 = vlaneseq  ;;  %v977_v33 = vmov 1983009808  }
  0x16   : > { %v755_v4 = vpack.c.bf16 %v184_v2, %v178_v1  ;;  %v183_v5 = vld [vmem:[%s1633_s1 + $0x30] sm:$0xff]  ;;  %v190_v6 = vld [vmem:[%s1633_s1 + $0x68] sm:$0xff]  ;;  %v196_v7 = vld [vmem:[%s1633_s1 + $0x98] sm:$0xff]  ;;  %v403_v34 = vunpack.c.l.s4 %v977_v33 }
  0x17   : > { %v757_v8 = vpack.c.bf16 %v183_v5, %v177_v3  ;;  %v759_v9 = vpack.c.bf16 %v196_v7, %v190_v6  ;;  %v189_v10 = vld [vmem:[%s1633_s1 + $0x60] sm:$0xff]  ;;  %v195_v11 = vld [vmem:[%s1633_s1 + $0x90] sm:$0xff]  ;;  %v202_v12 = vld [vmem:[%s1633_s1 + $0xc8] sm:$0xff]  ;;  %v1112_v49 = vshrl.u32 %v371_v32, 7 }
  0x18   : > { %756 = vmatprep.subr.bf16.mxu0 %v755_v4  ;;  %v208_v13 = vld [vmem:[%s1633_s1 + $0xf8] sm:$0xff]  ;;  %v761_v14 = vpack.c.bf16 %v195_v11, %v189_v10  ;;  %v201_v16 = vld [vmem:[%s1633_s1 + $0xc0] sm:$0xff]  ;;  %v207_v17 = vld [vmem:[%s1633_s1 + $0xf0] sm:$0xff]  ;;  %v404_v50 = vunpack.c.0.s8 %v403_v34 }
  0x19   : > { %758 = vmatpush1.bf16.msra.mxu0 %v757_v8  ;;  %v763_v15 = vpack.c.bf16 %v208_v13, %v202_v12  ;;  %v214_v18 = vld [vmem:[%s1633_s1 + $0x128] sm:$0xff]  ;;  %v220_v19 = vld [vmem:[%s1633_s1 + $0x158] sm:$0xff]  ;;  %v765_v20 = vpack.c.bf16 %v207_v17, %v201_v16  ;;  %v213_v22 = vld [vmem:[%s1633_s1 + $0x120] sm:$0xff] }
  0x1a   : > { %760 = vmatprep.subr.bf16.mxu0 %v759_v9  ;;  %v767_v21 = vpack.c.bf16 %v220_v19, %v214_v18  ;;  %v219_v23 = vld [vmem:[%s1633_s1 + $0x150] sm:$0xff]  ;;  %v226_v24 = vld [vmem:[%s1633_s1 + $0x188] sm:$0xff]  ;;  %v232_v25 = vld [vmem:[%s1633_s1 + $0x1b8] sm:$0xff]  ;;  %v1145_v2 = vsub.s32 %v404_v50, %v1112_v49 }
  0x1b   : > { %v769_v26 = vpack.c.bf16 %v219_v23, %v213_v22  ;;  %v771_v27 = vpack.c.bf16 %v232_v25, %v226_v24  ;;  %v225_v28 = vld [vmem:[%s1633_s1 + $0x180] sm:$0xff]  ;;  %v231_v29 = vld [vmem:[%s1633_s1 + $0x1b0] sm:$0xff]  ;;  %v238_v30 = vld [vmem:[%s1633_s1 + $0x1e8] sm:$0xff] }
  0x1c   : > { %v244_v31 = vld [vmem:[%s1633_s1 + $0x218] sm:$0xff]  ;;  %v773_v35 = vpack.c.bf16 %v231_v29, %v225_v28  ;;  %v237_v36 = vld [vmem:[%s1633_s1 + $0x1e0] sm:$0xff]  ;;  %v243_v39 = vld [vmem:[%s1633_s1 + $0x210] sm:$0xff] }
  0x1d   : > { %762 = vmatpush1.bf16.msra.mxu0 %v761_v14  ;;  %v180_v37 = vld [vmem:[%s1633_s1 + $0x18] sm:$0xff]  ;;  %v775_v38 = vpack.c.bf16 %v244_v31, %v238_v30  ;;  %v250_v40 = vld [vmem:[%s1633_s1 + $0x248] sm:$0xff]  ;;  %v179_v44 = vld [vmem:[%s1633_s1 + $0x10] sm:$0xff]  ;;  %v777_v51 = vpack.c.bf16 %v243_v39, %v237_v36 }
  0x1e   : > { %764 = vmatprep.subr.bf16.mxu0 %v763_v15  ;;  %v186_v41 = vld [vmem:[%s1633_s1 + $0x48] sm:$0xff]  ;;  %v256_v42 = vld [vmem:[%s1633_s1 + $0x278] sm:$0xff]  ;;  %v185_v45 = vld [vmem:[%s1633_s1 + $0x40] sm:$0xff] }
  0x1f   : > { %v819_v43 = vpack.c.bf16 %v186_v41, %v180_v37  ;;  %v821_v46 = vpack.c.bf16 %v185_v45, %v179_v44  ;;  %v192_v47 = vld [vmem:[%s1633_s1 + $0x78] sm:$0xff]  ;;  %v198_v48 = vld [vmem:[%s1633_s1 + $0xa8] sm:$0xff]  ;;  %v249_v52 = vld [vmem:[%s1633_s1 + $0x240] sm:$0xff]  ;;  %v779_v55 = vpack.c.bf16 %v256_v42, %v250_v40 }
  0x20   : > { %v823_v53 = vpack.c.bf16 %v198_v48, %v192_v47  ;;  %v191_v54 = vld [vmem:[%s1633_s1 + $0x70] sm:$0xff]  ;;  %v262_v57 = vld [vmem:[%s1633_s1 + $0x2a8] sm:$0xff]  ;;  %v197_v58 = vld [vmem:[%s1633_s1 + $0xa0] sm:$0xff] }
  0x21   : > { %766 = vmatpush1.bf16.msra.mxu0 %v765_v20  ;;  %820 = vmatprep.subr.bf16.mxu1 %v819_v43  ;;  %v255_v56 = vld [vmem:[%s1633_s1 + $0x270] sm:$0xff]  ;;  %v268_v59 = vld [vmem:[%s1633_s1 + $0x2d8] sm:$0xff]  ;;  %v825_v60 = vpack.c.bf16 %v197_v58, %v191_v54  ;;  %v210_v62 = vld [vmem:[%s1633_s1 + $0x108] sm:$0xff] }
  0x22   : > { %768 = vmatprep.subr.bf16.mxu0 %v767_v21  ;;  %822 = vmatpush1.bf16.msra.mxu1 %v821_v46  ;;  %v204_v61 = vld [vmem:[%s1633_s1 + $0xd8] sm:$0xff]  ;;  %v203_v0 = vld [vmem:[%s1633_s1 + $0xd0] sm:$0xff]  ;;  %v209_v1 = vld [vmem:[%s1633_s1 + $0x100] sm:$0xff]  ;;  %v781_v3 = vpack.c.bf16 %v255_v56, %v249_v52  ;;  %v783_v7 = vpack.c.bf16 %v268_v59, %v262_v57 }
  0x23   : > { %824 = vmatprep.subr.bf16.mxu1 %v823_v53  ;;  %v827_v63 = vpack.c.bf16 %v210_v62, %v204_v61  ;;  %v261_v4 = vld [vmem:[%s1633_s1 + $0x2a0] sm:$0xff]  ;;  %v267_v5 = vld [vmem:[%s1633_s1 + $0x2d0] sm:$0xff]  ;;  %v216_v6 = vld [vmem:[%s1633_s1 + $0x138] sm:$0xff]  ;;  %v829_v10 = vpack.c.bf16 %v209_v1, %v203_v0 }
  0x24   : > { %v274_v8 = vld [vmem:[%s1633_s1 + $0x308] sm:$0xff]  ;;  %v280_v9 = vld [vmem:[%s1633_s1 + $0x338] sm:$0xff]  ;;  %v215_v13 = vld [vmem:[%s1633_s1 + $0x130] sm:$0xff]  ;;  %v785_v19 = vpack.c.bf16 %v267_v5, %v261_v4 }
  0x25   : > { %770 = vmatpush1.bf16.msra.mxu0 %v769_v26  ;;  %v222_v11 = vld [vmem:[%s1633_s1 + $0x168] sm:$0xff]  ;;  %v221_v14 = vld [vmem:[%s1633_s1 + $0x160] sm:$0xff]  ;;  %v228_v17 = vld [vmem:[%s1633_s1 + $0x198] sm:$0xff]  ;;  %v787_v20 = vpack.c.bf16 %v280_v9, %v274_v8 }
  0x26   : > { %772 = vmatprep.subr.bf16.mxu0 %v771_v27  ;;  %826 = vmatpush1.bf16.msra.mxu1 %v825_v60  ;;  %v831_v12 = vpack.c.bf16 %v222_v11, %v216_v6  ;;  %v1171_v15 = vld [vmem:[#allocation2] sm:$0xf]  ;;  %v234_v18 = vld [vmem:[%s1633_s1 + $0x1c8] sm:$0xff]  ;;  %v279_v22 = vld [vmem:[%s1633_s1 + $0x330] sm:$0xff]  ;;  %v833_v24 = vpack.c.bf16 %v221_v14, %v215_v13 }
  0x27   : > { %828 = vmatprep.subr.bf16.mxu1 %v827_v63  ;;  %v1175_v16 = vrot.slane %v1171_v15, %v1145_v2  ;;  %v273_v21 = vld [vmem:[%s1633_s1 + $0x300] sm:$0xff]  ;;  %v286_v23 = vld [vmem:[%s1633_s1 + $0x368] sm:$0xff]  ;;  %v292_v26 = vld [vmem:[%s1633_s1 + $0x398] sm:$0xff]  ;;  %v835_v27 = vpack.c.bf16 %v234_v18, %v228_v17 }
  0x28   : > { %v227_v28 = vld [vmem:[%s1633_s1 + $0x190] sm:$0xff]  ;;  %v233_v29 = vld [vmem:[%s1633_s1 + $0x1c0] sm:$0xff]  ;;  %v240_v30 = vld [vmem:[%s1633_s1 + $0x1f8] sm:$0xff]  ;;  %v789_v32 = vpack.c.bf16 %v279_v22, %v273_v21  ;;  %v791_v33 = vpack.c.bf16 %v292_v26, %v286_v23 }
  0x29   : > { %774 = vmatpush1.bf16.msra.mxu0 %v773_v35  ;;  %v1194_v25 = vcombine.high %v1175_v16, %v1175_v16  ;;  %v246_v31 = vld [vmem:[%s1633_s1 + $0x228] sm:$0xff]  ;;  %v285_v34 = vld [vmem:[%s1633_s1 + $0x360] sm:$0xff]  ;;  %v291_v35 = vld [vmem:[%s1633_s1 + $0x390] sm:$0xff]  ;;  %v837_v37 = vpack.c.bf16 %v233_v29, %v227_v28 }
  0x2a   : > { %776 = vmatprep.subr.bf16.mxu0 %v775_v38  ;;  %830 = vmatpush1.bf16.msra.mxu1 %v829_v10  ;;  %v298_v36 = vld [vmem:[%s1633_s1 + $0x3c8] sm:$0xff]  ;;  %v304_v38 = vld [vmem:[%s1633_s1 + $0x3f8] sm:$0xff]  ;;  %v839_v39 = vpack.c.bf16 %v246_v31, %v240_v30  ;;  %v239_v40 = vld [vmem:[%s1633_s1 + $0x1f0] sm:$0xff]  ;;  %v793_v44 = vpack.c.bf16 %v291_v35, %v285_v34 }
  0x2b   : > { %832 = vmatprep.subr.bf16.mxu1 %v831_v12  ;;  %476 = vmatprep.mubr.f32.mxu0 %v1194_v25  ;;  %v245_v41 = vld [vmem:[%s1633_s1 + $0x220] sm:$0xff]  ;;  %v252_v42 = vld [vmem:[%s1633_s1 + $0x258] sm:$0xff]  ;;  %v258_v43 = vld [vmem:[%s1633_s1 + $0x288] sm:$0xff]  ;;  %v795_v45 = vpack.c.bf16 %v304_v38, %v298_v36 }
  0x2c   : > { %547 = vmatprep.mubr.f32.mxu1 %v1194_v25  ;;  %v297_v46 = vld [vmem:[%s1633_s1 + $0x3c0] sm:$0xff]  ;;  %v303_v47 = vld [vmem:[%s1633_s1 + $0x3f0] sm:$0xff]  ;;  %v310_v48 = vld [vmem:[%s1633_s1 + $0x428] sm:$0xff]  ;;  %v841_v50 = vpack.c.bf16 %v245_v41, %v239_v40  ;;  %v843_v52 = vpack.c.bf16 %v258_v43, %v252_v42 }
  0x2d   : > { %778 = vmatpush1.bf16.msra.mxu0 %v777_v51  ;;  %v316_v51 = vld [vmem:[%s1633_s1 + $0x458] sm:$0xff]  ;;  %v251_v53 = vld [vmem:[%s1633_s1 + $0x250] sm:$0xff]  ;;  %v257_v54 = vld [vmem:[%s1633_s1 + $0x280] sm:$0xff]  ;;  %v797_v57 = vpack.c.bf16 %v303_v47, %v297_v46 }
  0x2e   : > { %780 = vmatprep.subr.bf16.mxu0 %v779_v55  ;;  %834 = vmatpush1.bf16.msra.mxu1 %v833_v24  ;;  %v264_v55 = vld [vmem:[%s1633_s1 + $0x2b8] sm:$0xff]  ;;  %v270_v56 = vld [vmem:[%s1633_s1 + $0x2e8] sm:$0xff]  ;;  %v799_v58 = vpack.c.bf16 %v316_v51, %v310_v48  ;;  %v309_v59 = vld [vmem:[%s1633_s1 + $0x420] sm:$0xff]  ;;  %v845_v62 = vpack.c.bf16 %v257_v54, %v251_v53 }
  0x2f   : > { %836 = vmatprep.subr.bf16.mxu1 %v835_v27  ;;  %v315_v60 = vld [vmem:[%s1633_s1 + $0x450] sm:$0xff]  ;;  %v322_v61 = vld [vmem:[%s1633_s1 + $0x488] sm:$0xff]  ;;  %v328_v63 = vld [vmem:[%s1633_s1 + $0x4b8] sm:$0xff]  ;;  %v847_v0 = vpack.c.bf16 %v270_v56, %v264_v55 }
  0x30   : > { %v263_v1 = vld [vmem:[%s1633_s1 + $0x2b0] sm:$0xff]  ;;  %v276_v4 = vld [vmem:[%s1633_s1 + $0x318] sm:$0xff]  ;;  %v282_v5 = vld [vmem:[%s1633_s1 + $0x348] sm:$0xff]  ;;  %v801_v6 = vpack.c.bf16 %v315_v60, %v309_v59 }
  0x31   : > { %782 = vmatpush1.bf16.msra.mxu0 %v781_v3  ;;  %v269_v3 = vld [vmem:[%s1633_s1 + $0x2e0] sm:$0xff]  ;;  %v327_v9 = vld [vmem:[%s1633_s1 + $0x4b0] sm:$0xff]  ;;  %v334_v10 = vld [vmem:[%s1633_s1 + $0x4e8] sm:$0xff]  ;;  %v851_v13 = vpack.c.bf16 %v282_v5, %v276_v4 }
  0x32   : > { %784 = vmatprep.subr.bf16.mxu0 %v783_v7  ;;  %838 = vmatpush1.bf16.msra.mxu1 %v837_v37  ;;  %v803_v7 = vpack.c.bf16 %v328_v63, %v322_v61  ;;  %v321_v8 = vld [vmem:[%s1633_s1 + $0x480] sm:$0xff]  ;;  %v849_v11 = vpack.c.bf16 %v269_v3, %v263_v1  ;;  %v340_v12 = vld [vmem:[%s1633_s1 + $0x518] sm:$0xff]  ;;  %v275_v14 = vld [vmem:[%s1633_s1 + $0x310] sm:$0xff] }
  0x33   : > { %840 = vmatprep.subr.bf16.mxu1 %v839_v39  ;;  %v281_v17 = vld [vmem:[%s1633_s1 + $0x340] sm:$0xff]  ;;  %v288_v18 = vld [vmem:[%s1633_s1 + $0x378] sm:$0xff]  ;;  %v807_v21 = vpack.c.bf16 %v340_v12, %v334_v10  ;;  %v339_v23 = vld [vmem:[%s1633_s1 + $0x510] sm:$0xff] }
  0x34   : > { %v333_v22 = vld [vmem:[%s1633_s1 + $0x4e0] sm:$0xff]  ;;  %v346_v24 = vld [vmem:[%s1633_s1 + $0x548] sm:$0xff]  ;;  %v853_v26 = vpack.c.bf16 %v281_v17, %v275_v14  ;;  %v352_v27 = vld [vmem:[%s1633_s1 + $0x578] sm:$0xff] }
  0x35   : > { %786 = vmatpush1.bf16.msra.mxu0 %v785_v19  ;;  %v294_v19 = vld [vmem:[%s1633_s1 + $0x3a8] sm:$0xff]  ;;  %v287_v29 = vld [vmem:[%s1633_s1 + $0x370] sm:$0xff]  ;;  %v293_v30 = vld [vmem:[%s1633_s1 + $0x3a0] sm:$0xff]  ;;  %v811_v34 = vpack.c.bf16 %v352_v27, %v346_v24 }
  0x36   : > { %788 = vmatprep.subr.bf16.mxu0 %v787_v20  ;;  %842 = vmatpush1.bf16.msra.mxu1 %v841_v50  ;;  %v805_v20 = vpack.c.bf16 %v327_v9, %v321_v8  ;;  %v855_v28 = vpack.c.bf16 %v294_v19, %v288_v18  ;;  %v300_v31 = vld [vmem:[%s1633_s1 + $0x3d8] sm:$0xff]  ;;  %v345_v35 = vld [vmem:[%s1633_s1 + $0x540] sm:$0xff]  ;;  %v351_v36 = vld [vmem:[%s1633_s1 + $0x570] sm:$0xff]  ;;  %v857_v38 = vpack.c.bf16 %v293_v30, %v287_v29 }
  0x37   : > { %844 = vmatprep.subr.bf16.mxu1 %v843_v52  ;;  %v358_v37 = vld [vmem:[%s1633_s1 + $0x5a8] sm:$0xff]  ;;  %v364_v39 = vld [vmem:[%s1633_s1 + $0x5d8] sm:$0xff]  ;;  %v299_v41 = vld [vmem:[%s1633_s1 + $0x3d0] sm:$0xff] }
  0x38   : > { %v305_v42 = vld [vmem:[%s1633_s1 + $0x400] sm:$0xff]  ;;  %v312_v43 = vld [vmem:[%s1633_s1 + $0x438] sm:$0xff]  ;;  %v815_v46 = vpack.c.bf16 %v364_v39, %v358_v37  ;;  %v363_v48 = vld [vmem:[%s1633_s1 + $0x5d0] sm:$0xff] }
  0x39   : > { %790 = vmatpush1.bf16.msra.mxu0 %v789_v32  ;;  %v306_v32 = vld [vmem:[%s1633_s1 + $0x408] sm:$0xff]  ;;  %v357_v47 = vld [vmem:[%s1633_s1 + $0x5a0] sm:$0xff]  ;;  %v861_v51 = vpack.c.bf16 %v305_v42, %v299_v41  ;;  %v188_v52 = vld [vmem:[%s1633_s1 + $0x58] sm:$0xff] }
  0x3a   : > { %792 = vmatprep.subr.bf16.mxu0 %v791_v33  ;;  %846 = vmatpush1.bf16.msra.mxu1 %v845_v62  ;;  %v809_v33 = vpack.c.bf16 %v339_v23, %v333_v22  ;;  %v859_v40 = vpack.c.bf16 %v306_v32, %v300_v31  ;;  %v182_v50 = vld [vmem:[%s1633_s1 + $0x28] sm:$0xff]  ;;  %v311_v54 = vld [vmem:[%s1633_s1 + $0x430] sm:$0xff]  ;;  %v317_v55 = vld [vmem:[%s1633_s1 + $0x460] sm:$0xff] }
  0x3b   : > { %848 = vmatprep.subr.bf16.mxu1 %v847_v0  ;;  %v324_v56 = vld [vmem:[%s1633_s1 + $0x498] sm:$0xff]  ;;  %v883_v59 = vpack.c.bf16 %v188_v52, %v182_v50  ;;  %v181_v60 = vld [vmem:[%s1633_s1 + $0x20] sm:$0xff]  ;;  %v187_v61 = vld [vmem:[%s1633_s1 + $0x50] sm:$0xff]  ;;  %v865_v63 = vpack.c.bf16 %v317_v55, %v311_v54 }
  0x3c   : > { %v194_v62 = vld [vmem:[%s1633_s1 + $0x88] sm:$0xff]  ;;  %v200_v0 = vld [vmem:[%s1633_s1 + $0xb8] sm:$0xff]  ;;  %v323_v3 = vld [vmem:[%s1633_s1 + $0x490] sm:$0xff] }
  0x3d   : > { %794 = vmatpush1.bf16.msra.mxu0 %v793_v44  ;;  %v318_v44 = vld [vmem:[%s1633_s1 + $0x468] sm:$0xff]  ;;  %v329_v4 = vld [vmem:[%s1633_s1 + $0x4c0] sm:$0xff]  ;;  %v336_v5 = vld [vmem:[%s1633_s1 + $0x4f8] sm:$0xff]  ;;  %v887_v8 = vpack.c.bf16 %v200_v0, %v194_v62 }
  0x3e   : > { %796 = vmatprep.subr.bf16.mxu0 %v795_v45  ;;  %850 = vmatpush1.bf16.msra.mxu1 %v849_v11  ;;  %v813_v45 = vpack.c.bf16 %v351_v36, %v345_v35  ;;  %v863_v53 = vpack.c.bf16 %v318_v44, %v312_v43  ;;  %v193_v9 = vld [vmem:[%s1633_s1 + $0x80] sm:$0xff]  ;;  %v199_v10 = vld [vmem:[%s1633_s1 + $0xb0] sm:$0xff]  ;;  %v206_v11 = vld [vmem:[%s1633_s1 + $0xe8] sm:$0xff]  ;;  %v869_v12 = vpack.c.bf16 %v329_v4, %v323_v3 }
  0x3f   : > { %852 = vmatprep.subr.bf16.mxu1 %v851_v13  ;;  %v212_v13 = vld [vmem:[%s1633_s1 + $0x118] sm:$0xff]  ;;  %v335_v17 = vld [vmem:[%s1633_s1 + $0x4f0] sm:$0xff]  ;;  %v341_v18 = vld [vmem:[%s1633_s1 + $0x520] sm:$0xff] }
  0x40   : > { %v348_v19 = vld [vmem:[%s1633_s1 + $0x558] sm:$0xff]  ;;  %v891_v22 = vpack.c.bf16 %v212_v13, %v206_v11  ;;  %v205_v23 = vld [vmem:[%s1633_s1 + $0xe0] sm:$0xff]  ;;  %v211_v24 = vld [vmem:[%s1633_s1 + $0x110] sm:$0xff]  ;;  %v873_v27 = vpack.c.bf16 %v341_v18, %v335_v17 }
  0x41   : > { %798 = vmatpush1.bf16.msra.mxu0 %v797_v57  ;;  %v330_v57 = vld [vmem:[%s1633_s1 + $0x4c8] sm:$0xff]  ;;  %v347_v29 = vld [vmem:[%s1633_s1 + $0x550] sm:$0xff]  ;;  %v353_v30 = vld [vmem:[%s1633_s1 + $0x580] sm:$0xff] }
  0x42   : > { %800 = vmatprep.subr.bf16.mxu0 %v799_v58  ;;  %854 = vmatpush1.bf16.msra.mxu1 %v853_v26  ;;  %v817_v58 = vpack.c.bf16 %v363_v48, %v357_v47  ;;  %v867_v1 = vpack.c.bf16 %v330_v57, %v324_v56  ;;  %v218_v26 = vld [vmem:[%s1633_s1 + $0x148] sm:$0xff]  ;;  %v360_v31 = vld [vmem:[%s1633_s1 + $0x5b8] sm:$0xff]  ;;  %v217_v35 = vld [vmem:[%s1633_s1 + $0x140] sm:$0xff] }
  0x43   : > { %856 = vmatprep.subr.bf16.mxu1 %v855_v28  ;;  %v366_v32 = vld [vmem:[%s1633_s1 + $0x5e8] sm:$0xff]  ;;  %v223_v36 = vld [vmem:[%s1633_s1 + $0x170] sm:$0xff]  ;;  %v236_v39 = vld [vmem:[%s1633_s1 + $0x1d8] sm:$0xff] }
  0x44   : > { %v230_v37 = vld [vmem:[%s1633_s1 + $0x1a8] sm:$0xff]  ;;  %v359_v41 = vld [vmem:[%s1633_s1 + $0x5b0] sm:$0xff]  ;;  %v365_v42 = vld [vmem:[%s1633_s1 + $0x5e0] sm:$0xff]  ;;  %v897_v43 = vpack.c.bf16 %v223_v36, %v217_v35 }
  0x45   : > { %802 = vmatpush1.bf16.msra.mxu0 %v801_v6  ;;  %v342_v6 = vld [vmem:[%s1633_s1 + $0x528] sm:$0xff]  ;;  %v899_v44 = vpack.c.bf16 %v236_v39, %v230_v37  ;;  %v881_v47 = vpack.c.bf16 %v365_v42, %v359_v41  ;;  %v248_v50 = vld [vmem:[%s1633_s1 + $0x238] sm:$0xff]  ;;  %v247_v54 = vld [vmem:[%s1633_s1 + $0x230] sm:$0xff] }
  0x46   : > { %804 = vmatprep.subr.bf16.mxu0 %v803_v7  ;;  %858 = vmatpush1.bf16.msra.mxu1 %v857_v38  ;;  %v885_v7 = vpack.c.bf16 %v187_v61, %v181_v60  ;;  %v871_v14 = vpack.c.bf16 %v342_v6, %v336_v5  ;;  %v877_v38 = vpack.c.bf16 %v353_v30, %v347_v29  ;;  %v242_v48 = vld [vmem:[%s1633_s1 + $0x208] sm:$0xff]  ;;  %v260_v56 = vld [vmem:[%s1633_s1 + $0x298] sm:$0xff]  ;;  %v259_v60 = vld [vmem:[%s1633_s1 + $0x290] sm:$0xff] }
  0x47   : > { %860 = vmatprep.subr.bf16.mxu1 %v859_v40  ;;  %v879_v40 = vpack.c.bf16 %v366_v32, %v360_v31  ;;  %v903_v52 = vpack.c.bf16 %v248_v50, %v242_v48  ;;  %v254_v55 = vld [vmem:[%s1633_s1 + $0x268] sm:$0xff]  ;;  %v272_v62 = vld [vmem:[%s1633_s1 + $0x2f8] sm:$0xff]  ;;  %v271_v3 = vld [vmem:[%s1633_s1 + $0x2f0] sm:$0xff] }
  0x48   : > { %v266_v61 = vld [vmem:[%s1633_s1 + $0x2c8] sm:$0xff]  ;;  %v284_v5 = vld [vmem:[%s1633_s1 + $0x358] sm:$0xff]  ;;  %v295_v17 = vld [vmem:[%s1633_s1 + $0x3b0] sm:$0xff] }
  0x49   : > { %806 = vmatpush1.bf16.msra.mxu0 %v805_v20  ;;  %v354_v20 = vld [vmem:[%s1633_s1 + $0x588] sm:$0xff]  ;;  %v911_v0 = vpack.c.bf16 %v272_v62, %v266_v61  ;;  %v296_v11 = vld [vmem:[%s1633_s1 + $0x3b8] sm:$0xff]  ;;  %v319_v29 = vld [vmem:[%s1633_s1 + $0x470] sm:$0xff] }
  0x4a   : > { %808 = vmatprep.subr.bf16.mxu0 %v807_v21  ;;  %862 = vmatpush1.bf16.msra.mxu1 %v861_v51  ;;  %v889_v21 = vpack.c.bf16 %v199_v10, %v193_v9  ;;  %v875_v28 = vpack.c.bf16 %v354_v20, %v348_v19  ;;  %v278_v4 = vld [vmem:[%s1633_s1 + $0x328] sm:$0xff]  ;;  %v283_v9 = vld [vmem:[%s1633_s1 + $0x350] sm:$0xff]  ;;  %v308_v19 = vld [vmem:[%s1633_s1 + $0x418] sm:$0xff] }
  0x4b   : > { %864 = vmatprep.subr.bf16.mxu1 %v863_v53  ;;  %v241_v53 = vld [vmem:[%s1633_s1 + $0x200] sm:$0xff]  ;;  %v290_v10 = vld [vmem:[%s1633_s1 + $0x388] sm:$0xff]  ;;  %v332_v31 = vld [vmem:[%s1633_s1 + $0x4d8] sm:$0xff] }
  0x4c   : > { %v905_v57 = vpack.c.bf16 %v247_v54, %v241_v53  ;;  %v919_v13 = vpack.c.bf16 %v296_v11, %v290_v10  ;;  %v302_v18 = vld [vmem:[%s1633_s1 + $0x3e8] sm:$0xff]  ;;  %v331_v35 = vld [vmem:[%s1633_s1 + $0x4d0] sm:$0xff]  ;;  %v344_v37 = vld [vmem:[%s1633_s1 + $0x538] sm:$0xff] }
  0x4d   : > { %810 = vmatpush1.bf16.msra.mxu0 %v809_v33  ;;  %v893_v33 = vpack.c.bf16 %v211_v24, %v205_v23  ;;  %v307_v23 = vld [vmem:[%s1633_s1 + $0x410] sm:$0xff]  ;;  %v314_v24 = vld [vmem:[%s1633_s1 + $0x448] sm:$0xff]  ;;  %v368_v50 = vld [vmem:[%s1633_s1 + $0x5f8] sm:$0xff] }
  0x4e   : > { %812 = vmatprep.subr.bf16.mxu0 %v811_v34  ;;  %866 = vmatpush1.bf16.msra.mxu1 %v865_v63  ;;  %v326_v30 = vld [vmem:[%s1633_s1 + $0x4a8] sm:$0xff]  ;;  %v343_v41 = vld [vmem:[%s1633_s1 + $0x530] sm:$0xff]  ;;  %v361_v53 = vld [vmem:[%s1633_s1 + $0x5c0] sm:$0xff] }
  0x4f   : > { %868 = vmatprep.subr.bf16.mxu1 %v867_v1  ;;  %v265_v1 = vld [vmem:[%s1633_s1 + $0x2c0] sm:$0xff]  ;;  %v338_v36 = vld [vmem:[%s1633_s1 + $0x508] sm:$0xff]  ;;  %v367_v54 = vld [vmem:[%s1633_s1 + $0x5f0] sm:$0xff] }
  0x50   : > { %v913_v6 = vpack.c.bf16 %v271_v3, %v265_v1  ;;  %v935_v39 = vpack.c.bf16 %v344_v37, %v338_v36  ;;  %v350_v42 = vld [vmem:[%s1633_s1 + $0x568] sm:$0xff]  ;;  %v381_v3 = vsub.s32 2, %v1112_v49 }
  0x51   : > { %814 = vmatpush1.bf16.msra.mxu0 %v813_v45  ;;  %v229_v45 = vld [vmem:[%s1633_s1 + $0x1a0] sm:$0xff]  ;;  %v362_v48 = vld [vmem:[%s1633_s1 + $0x5c8] sm:$0xff] }
  0x52   : > { %816 = vmatprep.subr.bf16.mxu0 %v815_v46  ;;  %870 = vmatpush1.bf16.msra.mxu1 %v869_v12  ;;  %v235_v46 = vld [vmem:[%s1633_s1 + $0x1d0] sm:$0xff]  ;;  %v626_v36 = vld [vmem:[%s1014_s22 + $0x8] sm:$0xf] }
  0x53   : > { %872 = vmatprep.subr.bf16.mxu1 %v871_v14  ;;  %v901_v51 = vpack.c.bf16 %v235_v46, %v229_v45  ;;  %v289_v14 = vld [vmem:[%s1633_s1 + $0x380] sm:$0xff] }
  0x54   : > { %v921_v20 = vpack.c.bf16 %v295_v17, %v289_v14  ;;  %v349_v46 = vld [vmem:[%s1633_s1 + $0x560] sm:$0xff] }
  0x55   : > { %818 = vmatpush1.bf16.msra.mxu0 %v817_v58  ;;  %v907_v58 = vpack.c.bf16 %v260_v56, %v254_v55  ;;  %v945_v55 = vpack.c.bf16 %v367_v54, %v361_v53  ;;  %v373_v56 = vsub.s32 0, %v1112_v49 }
  0x56   : > { %884 = vmatprep.subr.bf16.mxu0 %v883_v59  ;;  %874 = vmatpush1.bf16.msra.mxu1 %v873_v27  ;;  %v253_v59 = vld [vmem:[%s1633_s1 + $0x260] sm:$0xff] }
  0x57   : > { %876 = vmatprep.subr.bf16.mxu1 %v875_v28  ;;  %v909_v63 = vpack.c.bf16 %v259_v60, %v253_v59  ;;  %v313_v28 = vld [vmem:[%s1633_s1 + $0x440] sm:$0xff] }
  0x58   : > { %477 = vmatmul.mubr.f32.vlgmr.msra.gmra.mrb[0].mxu0 %v1175_v16  ;;  %v929_v32 = vpack.c.bf16 %v319_v29, %v313_v28 }
  0x59   : > { %886 = vmatpush1.bf16.msra.mxu0 %v885_v7  ;;  %618 = vmatprep.mubr.f32.mxu0 %v1194_v25  ;;  %v224_v25 = vld [vmem:[%s1633_s1 + $0x178] sm:$0xff]  ;;  %v915_v7 = vpack.c.bf16 %v284_v5, %v278_v4 }
  0x5a   : > { %888 = vmatprep.subr.bf16.mxu0 %v887_v8  ;;  %v895_v34 = vpack.c.bf16 %v224_v25, %v218_v26  ;;  %878 = vmatpush1.bf16.msra.mxu1 %v877_v38  ;;  %v277_v8 = vld [vmem:[%s1633_s1 + $0x320] sm:$0xff]  ;;  %v320_v26 = vld [vmem:[%s1633_s1 + $0x478] sm:$0xff] }
  0x5b   : > { %880 = vmatprep.subr.bf16.mxu1 %v879_v40  ;;  %v917_v12 = vpack.c.bf16 %v283_v9, %v277_v8  ;;  %v927_v25 = vpack.c.bf16 %v320_v26, %v314_v24  ;;  %v337_v40 = vld [vmem:[%s1633_s1 + $0x500] sm:$0xff]  ;;  %v393_v24 = vsub.s32 5, %v1112_v49 }
  0x5d   : > { %890 = vmatpush1.bf16.msra.mxu0 %v889_v21  ;;  %v923_v21 = vpack.c.bf16 %v308_v19, %v302_v18 }
  0x5e   : > { %892 = vmatprep.subr.bf16.mxu0 %v891_v22  ;;  %882 = vmatpush1.bf16.msra.mxu1 %v881_v47  ;;  %v301_v22 = vld [vmem:[%s1633_s1 + $0x3e0] sm:$0xff]  ;;  %v355_v47 = vld [vmem:[%s1633_s1 + $0x590] sm:$0xff] }
  0x5f   : > { %v925_v27 = vpack.c.bf16 %v307_v23, %v301_v22  ;;  %v389_v23 = vsub.s32 4, %v1112_v49 }
  0x61   : > { %894 = vmatpush1.bf16.msra.mxu0 %v893_v33  ;;  %548 = vmatmul.mubr.f32.vlgmr.msra.gmra.mrb[0].mxu1 %v1175_v16  ;;  %v931_v33 = vpack.c.bf16 %v332_v31, %v326_v30 }
  0x62   : > { %896 = vmatprep.subr.bf16.mxu0 %v895_v34  ;;  %v325_v34 = vld [vmem:[%s1633_s1 + $0x4a0] sm:$0xff] }
  0x63   : > { %v933_v38 = vpack.c.bf16 %v331_v35, %v325_v34 }
  0x65   : > { %898 = vmatpush1.bf16.msra.mxu0 %v897_v43  ;;  %v356_v43 = vld [vmem:[%s1633_s1 + $0x598] sm:$0xff] }
  0x66   : > { %900 = vmatprep.subr.bf16.mxu0 %v899_v44  ;;  %v937_v44 = vpack.c.bf16 %v343_v41, %v337_v40  ;;  %v939_v45 = vpack.c.bf16 %v356_v43, %v350_v42 }
  0x69   : > { %902 = vmatpush1.bf16.msra.mxu0 %v901_v51  ;;  %v941_v51 = vpack.c.bf16 %v355_v47, %v349_v46 }
  0x6a   : > { %904 = vmatprep.subr.bf16.mxu0 %v903_v52  ;;  %v943_v52 = vpack.c.bf16 %v368_v50, %v362_v48 }
  0x6d   : > { %906 = vmatpush1.bf16.msra.mxu0 %v905_v57  ;;  %v369_v57 = vld [vmem:[%s1634_s2] sm:$0x3f] }
  0x6e   : > { %908 = vmatprep.subr.bf16.mxu0 %v907_v58  ;;  %v377_v58 = vsub.s32 1, %v1112_v49  ;;  %v374_v59 = vrot.slane %v369_v57, %v373_v56  ;;  %v382_v4 = vrot.slane %v369_v57, %v381_v3  ;;  %v390_v26 = vrot.slane %v369_v57, %v389_v23 }
  0x70   : > { %v378_v60 = vrot.slane %v369_v57, %v377_v58 }
  0x71   : > { %910 = vmatpush1.bf16.msra.mxu0 %v909_v63 }
  0x72   : > { %912 = vmatprep.subr.bf16.mxu0 %v911_v0 }
  0x75   : > { %914 = vmatpush1.bf16.msra.mxu0 %v913_v6 }
  0x76   : > { %916 = vmatprep.subr.bf16.mxu0 %v915_v7 }
  0x79   : > { %918 = vmatpush1.bf16.msra.mxu0 %v917_v12  ;;  %v625_v12 = vld [vmem:[%s1014_s22] sm:$0xff] }
  0x7a   : > { %920 = vmatprep.subr.bf16.mxu0 %v919_v13  ;;  %v646_v17 = vrot.slane %v625_v12, 4 }
  0x7d   : > { %922 = vmatpush1.bf16.msra.mxu0 %v921_v20 }
  0x7e   : > { %924 = vmatprep.subr.bf16.mxu0 %v923_v21 }
  0x81   : > { %926 = vmatpush1.bf16.msra.mxu0 %v925_v27  ;;  %v394_v27 = vrot.slane %v369_v57, %v393_v24 }
  0x82   : > { %928 = vmatprep.subr.bf16.mxu0 %v927_v25 }
  0x85   : > { %930 = vmatpush1.bf16.msra.mxu0 %v929_v32 }
  0x86   : > { %932 = vmatprep.subr.bf16.mxu0 %v931_v33 }
  0x89   : > { %934 = vmatpush1.bf16.msra.mxu0 %v933_v38 }
  0x8a   : > { %936 = vmatprep.subr.bf16.mxu0 %v935_v39 }
  0x8d   : > { %938 = vmatpush1.bf16.msra.mxu0 %v937_v44 }
  0x8e   : > { %940 = vmatprep.subr.bf16.mxu0 %v939_v45 }
  0x91   : > { %942 = vmatpush1.bf16.msra.mxu0 %v941_v51 }
  0x92   : > { %944 = vmatprep.subr.bf16.mxu0 %v943_v52 }
  0x95   : > { %946 = vmatpush1.bf16.msra.mxu0 %v945_v55 }
  0x98   : > { %619 = vmatmul.mubr.f32.vlgmr.msra.gmra.mrb[2].mxu0 %v1175_v16  ;;  %v385_v16 = vsub.s32 3, %v1112_v49 }
  0x9a   : > { %v386_v5 = vrot.slane %v369_v57, %v385_v16 }
 0x12b   : > { %v478_v61 = vpop.f32.mrb[0].mxu0 }
 0x12c   : > { %v479_v62 = vadd.f32 %v478_v61, %v374_v59  ;;  %v480_v63 = vpop.f32.mrb[1].mxu0 }
 0x12d   : > { %v481_v0 = vadd.f32 %v480_v63, %v378_v60 }
 0x12f   : > { %v629_v1 = vcombine.low %v479_v62, %v481_v0 }
 0x131   : > { %v636_v11 = vrot.slane %v629_v1, %v1145_v2 }
 0x133   : > { %v638_v13 = vadd.f32 %v636_v11, %v625_v12 }
 0x134   : > { %v549_v6 = vpop.f32.mrb[0].mxu1 }
 0x135   : > { %v550_v7 = vadd.f32 %v549_v6, %v382_v4  ;;  %v551_v8 = vpop.f32.mrb[1].mxu1  ;;  %v750_v14 = vmul.f32 -1.442695, %v638_v13 }
 0x136   : > { %v552_v9 = vadd.f32 %v551_v8, %v386_v5 }
 0x137   : > { %958 = vpow2.f32 %v750_v14 }
 0x138   : > { %v650_v10 = vcombine.low %v550_v7, %v552_v9 }
 0x13a   : > { %v657_v18 = vrot.slane %v650_v10, %v1145_v2 }
 0x13c   : > { %v659_v19 = vadd.f32 %v657_v18, %v646_v17 }
 0x13e   : > { %v751_v20 = vmul.f32 -1.442695, %v659_v19 }
 0x140   : > { %960 = vpow2.f32 %v751_v20 }
 0x141   : > { %v959_v21 = vpop.eup %958 }
 0x142   : > { %v642_v22 = vadd.f32 1.0, %v959_v21 }
 0x144   : > { %962 = vrcp.f32 %v642_v22 }
 0x14a   : > { %v961_v25 = vpop.eup %960 }
 0x14b   : > { %v663_v31 = vadd.f32 1.0, %v961_v25 }
 0x14d   : > { %964 = vrcp.f32 %v663_v31 }
 0x14e   : > { %v963_v35 = vpop.eup %962 }
 0x157   : > { %v965_v49 = vpop.eup %964 }
 0x158   : > { %v680_v39 = vsub.f32 1.0, %v965_v49  ;;  %v682_v41 = vmul.f32 %v965_v49, %v1171_v15 }
 0x16b   : > { %v620_v28 = vpop.f32.mrb[2].mxu0 }
 0x16c   : > { %v621_v29 = vadd.f32 %v620_v28, %v390_v26  ;;  %v622_v30 = vpop.f32.mrb[3].mxu0 }
 0x16d   : > { %v623_v32 = vadd.f32 %v622_v30, %v394_v27 }
 0x16f   : > { %v668_v33 = vcombine.low %v621_v29, %v623_v32 }
 0x171   : > { %v675_v34 = vrot.slane %v668_v33, %v1145_v2 }
 0x173   : > { %v677_v37 = vmul.f32 %v963_v35, %v675_v34 }
 0x175   : > { %v678_v38 = vadd.f32 %v677_v37, %v626_v36 }
 0x177   : > { %966 = vtanh.f32 %v678_v38 }
 0x181   : > { %v967_v40 = vpop.eup %966 }
 0x182   : > { %v681_v42 = vmul.f32 %v967_v40, %v680_v39 }
 0x184   : > { %v683_v43 = vadd.f32 %v682_v41, %v681_v42 }
 0x186   : > { %684 = vst [vmem:[#allocation2] sm:$0xf] %v683_v43  ;;  %685 = vst [vmem:[%s1009_s19] sm:$0xf] %v683_v43 }
 0x187 PF: > { %s13_s12 = sadd.s32 1, %s974_s12  }
 0x188   : > { %p10_p5 = scmp.ge.s32.totalorder %s13_s12, 18  }
 0x18a   :  { %12 = sbr.rel (!%p10_p5) target bundleno = 1 (0x1), region = 66 }

// kernel: forward.5
= control target key start
LH: loop header
LB: loop body
LE: loop exit
PB: predicated region body
PF: predicated region fallthrough
CT: control target
= control target key end

     0   :  { %8 = vsyncpa [#allocation3], 0  ;;  %s3079_s0 = inlined_call_operand.hbm [shape: f32[32,1024], index: 0, kind: input, shape index: {}]   ;;  %s3080_s1 = inlined_call_operand.hbm [shape: f32[1024,768], index: 1, kind: input, shape index: {}]   ;;  %s3081_s2 = inlined_call_operand.vmem [shape: f32[1,768], index: 2, kind: input, shape index: {}]   ;;  %s3082_s3 = inlined_call_operand.vmem [shape: f32[32,768], index: 3, kind: output, shape index: {}]  }
   0x1   :  { %9 = vsyncpa [#allocation5], 0  ;;  %s2921_s12 = smov [#allocation2]   ;;  %s2873_s16 = scalar_lea.hbm %s3079_s0, 4096 }
   0x2   :  { %s15_s13 = sshll.u32 %s2921_s12, 4  ;;  %p2874_p0 = scmp.ne.s32.totalorder %s3079_s0, %s2873_s16  ;;  %s16_s13 = int_to_ptr.vmem [resolvable:$true] %s15_s13 }
   0x3   :  { %p2877_p1 = scmp.lt.u32.totalorder %s2873_s16, %s3079_s0 }
   0x5   :  { %p2879_p2 = pnand %p2877_p1, %p2874_p0 }
   0x7   :  { %2882 = shalt.err (!%p2879_p2)
}
   0x8   :  { %s2883_s21 = scalar_lea.vmem %s16_s13, 4096  ;;  %p2888_p4 = scmp.lt.s32.totalorder %s16_s13, %s16_s13 }
   0x9   :  { %p2884_p3 = scmp.ne.s32.totalorder %s16_s13, %s2883_s21  ;;  %p2889_p5 = scmp.lt.s32.totalorder %s2883_s21, %s2883_s21 }
   0xb   :  { %p2890_p6 = por %p2889_p5, %p2888_p4 }
   0xd   :  { %p2891_p7 = pnand %p2890_p6, %p2884_p3 }
   0xf   :  { %2894 = shalt.err (!%p2891_p7)
}
  0x10   :  { %s2922_s22 = smov 1024   ;;  %s2923_s23 = smov 64  }
  0x11   :  { %21 = dma.hbm_to_vmem [thread:$0]  %s3079_s0, 4096, %s16_s13, [#allocation3], %s2922_s22, %s2922_s22, %s2923_s23  }
  0x12   :  { %s2924_s26 = smov [#allocation4]   ;;  %s2895_s30 = scalar_lea.hbm %s3080_s1, 98304 }
  0x13   :  { %s27_s27 = sshll.u32 %s2924_s26, 4  ;;  %p2896_p8 = scmp.ne.s32.totalorder %s3080_s1, %s2895_s30  ;;  %s28_s27 = int_to_ptr.vmem [resolvable:$true] %s27_s27 }
  0x14   :  { %p2899_p9 = scmp.lt.u32.totalorder %s2895_s30, %s3080_s1 }
  0x16   :  { %p2901_p10 = pnand %p2899_p9, %p2896_p8 }
  0x18   :  { %2904 = shalt.err (!%p2901_p10)
}
  0x19   :  { %s2905_s8 = scalar_lea.vmem %s28_s27, 98304  ;;  %p2910_p12 = scmp.lt.s32.totalorder %s28_s27, %s28_s27 }
  0x1a   :  { %p2906_p11 = scmp.ne.s32.totalorder %s28_s27, %s2905_s8  ;;  %p2911_p13 = scmp.lt.s32.totalorder %s2905_s8, %s2905_s8 }
  0x1c   :  { %p2912_p0 = por %p2911_p13, %p2910_p12 }
  0x1e   :  { %p2913_p1 = pnand %p2912_p0, %p2906_p11 }
  0x20   :  { %2916 = shalt.err (!%p2913_p1)
}
  0x21   :  { %s2925_s0 = smov 768   ;;  %s2926_s9 = smov 48  }
  0x22   :  { %33 = dma.hbm_to_vmem [thread:$0]  %s3080_s1, 98304, %s28_s27, [#allocation5], %s2925_s0, %s2925_s0, %s2926_s9  }
  0x23   :  { %2917 = dma.done.wait [#allocation3], 4096  }
  0x24   :  { %2918 = vsyncadd [#allocation3], 4294963200 }
  0x25   :  { %2919 = dma.done.wait [#allocation5], 98304  }
  0x26   :  { %2920 = vsyncadd [#allocation5], 4294868992  ;;  %v75_v0 = vld [vmem:[#allocation4 + $0x8] sm:$0xff]  ;;  %v81_v1 = vld [vmem:[#allocation4 + $0x38] sm:$0xff] }
  0x27   :  { %v459_v2 = vld [vmem:[#allocation4 + $0xc08] sm:$0xff]  ;;  %v1972_v3 = vpack.c.bf16 %v81_v1, %v75_v0  ;;  %v465_v4 = vld [vmem:[#allocation4 + $0xc38] sm:$0xff]  ;;  %v74_v5 = vld [vmem:[#allocation4] sm:$0xff] }
  0x28   :  { %v80_v6 = vld [vmem:[#allocation4 + $0x30] sm:$0xff]  ;;  %v2100_v7 = vpack.c.bf16 %v465_v4, %v459_v2  ;;  %v458_v9 = vld [vmem:[#allocation4 + $0xc00] sm:$0xff]  ;;  %v87_v11 = vld [vmem:[#allocation4 + $0x68] sm:$0xff] }
  0x29   :  { %v1974_v8 = vpack.c.bf16 %v80_v6, %v74_v5  ;;  %v464_v10 = vld [vmem:[#allocation4 + $0xc30] sm:$0xff]  ;;  %1973 = vmatprep.subr.bf16.mxu1 %v1972_v3  ;;  %v93_v13 = vld [vmem:[#allocation4 + $0x98] sm:$0xff]  ;;  %v471_v14 = vld [vmem:[#allocation4 + $0xc68] sm:$0xff] }
  0x2a   :  { %v2102_v12 = vpack.c.bf16 %v464_v10, %v458_v9  ;;  %v477_v15 = vld [vmem:[#allocation4 + $0xc98] sm:$0xff]  ;;  %2101 = vmatprep.subr.bf16.mxu0 %v2100_v7  ;;  %v1976_v16 = vpack.c.bf16 %v93_v13, %v87_v11  ;;  %v86_v18 = vld [vmem:[#allocation4 + $0x60] sm:$0xff]  ;;  %v92_v19 = vld [vmem:[#allocation4 + $0x90] sm:$0xff] }
  0x2b   :  { %1975 = vmatpush1.bf16.msra.mxu1 %v1974_v8  ;;  %v2104_v17 = vpack.c.bf16 %v477_v15, %v471_v14  ;;  %v470_v20 = vld [vmem:[#allocation4 + $0xc60] sm:$0xff]  ;;  %v1978_v21 = vpack.c.bf16 %v92_v19, %v86_v18  ;;  %v476_v22 = vld [vmem:[#allocation4 + $0xc90] sm:$0xff]  ;;  %v99_v23 = vld [vmem:[#allocation4 + $0xc8] sm:$0xff] }
  0x2c   :  { %2103 = vmatpush1.bf16.msra.mxu0 %v2102_v12  ;;  %v105_v24 = vld [vmem:[#allocation4 + $0xf8] sm:$0xff]  ;;  %1977 = vmatprep.subr.bf16.mxu1 %v1976_v16  ;;  %v2106_v25 = vpack.c.bf16 %v476_v22, %v470_v20  ;;  %v483_v27 = vld [vmem:[#allocation4 + $0xcc8] sm:$0xff]  ;;  %v98_v29 = vld [vmem:[#allocation4 + $0xc0] sm:$0xff] }
  0x2d   :  { %2105 = vmatprep.subr.bf16.mxu0 %v2104_v17  ;;  %v1980_v26 = vpack.c.bf16 %v105_v24, %v99_v23  ;;  %v489_v28 = vld [vmem:[#allocation4 + $0xcf8] sm:$0xff]  ;;  %v104_v31 = vld [vmem:[#allocation4 + $0xf0] sm:$0xff]  ;;  %v482_v32 = vld [vmem:[#allocation4 + $0xcc0] sm:$0xff] }
  0x2e   :  { %v2108_v30 = vpack.c.bf16 %v489_v28, %v483_v27  ;;  %v488_v33 = vld [vmem:[#allocation4 + $0xcf0] sm:$0xff]  ;;  %v1982_v34 = vpack.c.bf16 %v104_v31, %v98_v29  ;;  %v111_v35 = vld [vmem:[#allocation4 + $0x128] sm:$0xff]  ;;  %v117_v36 = vld [vmem:[#allocation4 + $0x158] sm:$0xff] }
  0x2f   :  { %1979 = vmatpush1.bf16.msra.mxu1 %v1978_v21  ;;  %v495_v37 = vld [vmem:[#allocation4 + $0xd28] sm:$0xff]  ;;  %v2110_v38 = vpack.c.bf16 %v488_v33, %v482_v32  ;;  %v1984_v39 = vpack.c.bf16 %v117_v36, %v111_v35  ;;  %v501_v40 = vld [vmem:[#allocation4 + $0xd58] sm:$0xff]  ;;  %v110_v41 = vld [vmem:[#allocation4 + $0x120] sm:$0xff] }
  0x30   :  { %2107 = vmatpush1.bf16.msra.mxu0 %v2106_v25  ;;  %1981 = vmatprep.subr.bf16.mxu1 %v1980_v26  ;;  %v116_v42 = vld [vmem:[#allocation4 + $0x150] sm:$0xff]  ;;  %v2112_v43 = vpack.c.bf16 %v501_v40, %v495_v37  ;;  %v494_v44 = vld [vmem:[#allocation4 + $0xd20] sm:$0xff]  ;;  %v123_v46 = vld [vmem:[#allocation4 + $0x188] sm:$0xff] }
  0x31   :  { %2109 = vmatprep.subr.bf16.mxu0 %v2108_v30  ;;  %v500_v45 = vld [vmem:[#allocation4 + $0xd50] sm:$0xff]  ;;  %v129_v47 = vld [vmem:[#allocation4 + $0x1b8] sm:$0xff]  ;;  %v507_v48 = vld [vmem:[#allocation4 + $0xd88] sm:$0xff]  ;;  %v1986_v50 = vpack.c.bf16 %v116_v42, %v110_v41 }
  0x32   :  { %v513_v49 = vld [vmem:[#allocation4 + $0xdb8] sm:$0xff]  ;;  %v2114_v51 = vpack.c.bf16 %v500_v45, %v494_v44  ;;  %v1988_v52 = vpack.c.bf16 %v129_v47, %v123_v46  ;;  %v122_v53 = vld [vmem:[#allocation4 + $0x180] sm:$0xff]  ;;  %v128_v54 = vld [vmem:[#allocation4 + $0x1b0] sm:$0xff] }
  0x33   :  { %1983 = vmatpush1.bf16.msra.mxu1 %v1982_v34  ;;  %v506_v55 = vld [vmem:[#allocation4 + $0xd80] sm:$0xff]  ;;  %v2116_v56 = vpack.c.bf16 %v513_v49, %v507_v48  ;;  %v512_v57 = vld [vmem:[#allocation4 + $0xdb0] sm:$0xff]  ;;  %v135_v58 = vld [vmem:[#allocation4 + $0x1e8] sm:$0xff]  ;;  %v1990_v62 = vpack.c.bf16 %v128_v54, %v122_v53 }
  0x34   :  { %2111 = vmatpush1.bf16.msra.mxu0 %v2110_v38  ;;  %1985 = vmatprep.subr.bf16.mxu1 %v1984_v39  ;;  %v141_v59 = vld [vmem:[#allocation4 + $0x218] sm:$0xff]  ;;  %v519_v60 = vld [vmem:[#allocation4 + $0xde8] sm:$0xff]  ;;  %v2118_v63 = vpack.c.bf16 %v512_v57, %v506_v55  ;;  %v134_v1 = vld [vmem:[#allocation4 + $0x1e0] sm:$0xff] }
  0x35   :  { %2113 = vmatprep.subr.bf16.mxu0 %v2112_v43  ;;  %v525_v61 = vld [vmem:[#allocation4 + $0xe18] sm:$0xff]  ;;  %v1992_v0 = vpack.c.bf16 %v141_v59, %v135_v58  ;;  %v140_v2 = vld [vmem:[#allocation4 + $0x210] sm:$0xff]  ;;  %v518_v3 = vld [vmem:[#allocation4 + $0xde0] sm:$0xff] }
  0x36   :  { %v2120_v4 = vpack.c.bf16 %v525_v61, %v519_v60  ;;  %v524_v5 = vld [vmem:[#allocation4 + $0xe10] sm:$0xff]  ;;  %v147_v6 = vld [vmem:[#allocation4 + $0x248] sm:$0xff]  ;;  %v153_v7 = vld [vmem:[#allocation4 + $0x278] sm:$0xff]  ;;  %v1994_v10 = vpack.c.bf16 %v140_v2, %v134_v1 }
  0x37   :  { %1987 = vmatpush1.bf16.msra.mxu1 %v1986_v50  ;;  %v531_v8 = vld [vmem:[#allocation4 + $0xe48] sm:$0xff]  ;;  %v537_v9 = vld [vmem:[#allocation4 + $0xe78] sm:$0xff]  ;;  %v2122_v11 = vpack.c.bf16 %v524_v5, %v518_v3  ;;  %v1996_v12 = vpack.c.bf16 %v153_v7, %v147_v6  ;;  %v146_v13 = vld [vmem:[#allocation4 + $0x240] sm:$0xff] }
  0x38   :  { %2115 = vmatpush1.bf16.msra.mxu0 %v2114_v51  ;;  %1989 = vmatprep.subr.bf16.mxu1 %v1988_v52  ;;  %v152_v14 = vld [vmem:[#allocation4 + $0x270] sm:$0xff]  ;;  %v530_v15 = vld [vmem:[#allocation4 + $0xe40] sm:$0xff]  ;;  %v2124_v16 = vpack.c.bf16 %v537_v9, %v531_v8  ;;  %v159_v18 = vld [vmem:[#allocation4 + $0x2a8] sm:$0xff] }
  0x39   :  { %2117 = vmatprep.subr.bf16.mxu0 %v2116_v56  ;;  %v536_v17 = vld [vmem:[#allocation4 + $0xe70] sm:$0xff]  ;;  %v165_v19 = vld [vmem:[#allocation4 + $0x2d8] sm:$0xff]  ;;  %v543_v20 = vld [vmem:[#allocation4 + $0xea8] sm:$0xff]  ;;  %v1998_v22 = vpack.c.bf16 %v152_v14, %v146_v13 }
  0x3a   :  { %v549_v21 = vld [vmem:[#allocation4 + $0xed8] sm:$0xff]  ;;  %v2126_v23 = vpack.c.bf16 %v536_v17, %v530_v15  ;;  %v2000_v24 = vpack.c.bf16 %v165_v19, %v159_v18  ;;  %v158_v25 = vld [vmem:[#allocation4 + $0x2a0] sm:$0xff]  ;;  %v164_v26 = vld [vmem:[#allocation4 + $0x2d0] sm:$0xff] }
  0x3b   :  { %1991 = vmatpush1.bf16.msra.mxu1 %v1990_v62  ;;  %v542_v27 = vld [vmem:[#allocation4 + $0xea0] sm:$0xff]  ;;  %v2128_v28 = vpack.c.bf16 %v549_v21, %v543_v20  ;;  %v548_v29 = vld [vmem:[#allocation4 + $0xed0] sm:$0xff]  ;;  %v171_v30 = vld [vmem:[#allocation4 + $0x308] sm:$0xff]  ;;  %v2002_v34 = vpack.c.bf16 %v164_v26, %v158_v25 }
  0x3c   :  { %2119 = vmatpush1.bf16.msra.mxu0 %v2118_v63  ;;  %1993 = vmatprep.subr.bf16.mxu1 %v1992_v0  ;;  %v177_v31 = vld [vmem:[#allocation4 + $0x338] sm:$0xff]  ;;  %v555_v32 = vld [vmem:[#allocation4 + $0xf08] sm:$0xff]  ;;  %v2130_v35 = vpack.c.bf16 %v548_v29, %v542_v27  ;;  %v170_v37 = vld [vmem:[#allocation4 + $0x300] sm:$0xff] }
  0x3d   :  { %2121 = vmatprep.subr.bf16.mxu0 %v2120_v4  ;;  %v561_v33 = vld [vmem:[#allocation4 + $0xf38] sm:$0xff]  ;;  %v2004_v36 = vpack.c.bf16 %v177_v31, %v171_v30  ;;  %v176_v38 = vld [vmem:[#allocation4 + $0x330] sm:$0xff]  ;;  %v554_v39 = vld [vmem:[#allocation4 + $0xf00] sm:$0xff] }
  0x3e   :  { %v2132_v40 = vpack.c.bf16 %v561_v33, %v555_v32  ;;  %v560_v41 = vld [vmem:[#allocation4 + $0xf30] sm:$0xff]  ;;  %v183_v42 = vld [vmem:[#allocation4 + $0x368] sm:$0xff]  ;;  %v189_v43 = vld [vmem:[#allocation4 + $0x398] sm:$0xff]  ;;  %v2006_v46 = vpack.c.bf16 %v176_v38, %v170_v37 }
  0x3f   :  { %1995 = vmatpush1.bf16.msra.mxu1 %v1994_v10  ;;  %v567_v44 = vld [vmem:[#allocation4 + $0xf68] sm:$0xff]  ;;  %v573_v45 = vld [vmem:[#allocation4 + $0xf98] sm:$0xff]  ;;  %v2134_v47 = vpack.c.bf16 %v560_v41, %v554_v39  ;;  %v2008_v48 = vpack.c.bf16 %v189_v43, %v183_v42  ;;  %v182_v49 = vld [vmem:[#allocation4 + $0x360] sm:$0xff] }
  0x40   :  { %2123 = vmatpush1.bf16.msra.mxu0 %v2122_v11  ;;  %1997 = vmatprep.subr.bf16.mxu1 %v1996_v12  ;;  %v188_v50 = vld [vmem:[#allocation4 + $0x390] sm:$0xff]  ;;  %v566_v51 = vld [vmem:[#allocation4 + $0xf60] sm:$0xff]  ;;  %v2136_v52 = vpack.c.bf16 %v573_v45, %v567_v44  ;;  %v195_v54 = vld [vmem:[#allocation4 + $0x3c8] sm:$0xff] }
  0x41   :  { %2125 = vmatprep.subr.bf16.mxu0 %v2124_v16  ;;  %v572_v53 = vld [vmem:[#allocation4 + $0xf90] sm:$0xff]  ;;  %v201_v55 = vld [vmem:[#allocation4 + $0x3f8] sm:$0xff]  ;;  %v579_v56 = vld [vmem:[#allocation4 + $0xfc8] sm:$0xff]  ;;  %v2010_v58 = vpack.c.bf16 %v188_v50, %v182_v49 }
  0x42   :  { %v585_v57 = vld [vmem:[#allocation4 + $0xff8] sm:$0xff]  ;;  %v2138_v59 = vpack.c.bf16 %v572_v53, %v566_v51  ;;  %v2012_v60 = vpack.c.bf16 %v201_v55, %v195_v54  ;;  %v194_v61 = vld [vmem:[#allocation4 + $0x3c0] sm:$0xff]  ;;  %v200_v62 = vld [vmem:[#allocation4 + $0x3f0] sm:$0xff] }
  0x43   :  { %1999 = vmatpush1.bf16.msra.mxu1 %v1998_v22  ;;  %v578_v63 = vld [vmem:[#allocation4 + $0xfc0] sm:$0xff]  ;;  %v2140_v0 = vpack.c.bf16 %v585_v57, %v579_v56  ;;  %v584_v1 = vld [vmem:[#allocation4 + $0xff0] sm:$0xff]  ;;  %v207_v2 = vld [vmem:[#allocation4 + $0x428] sm:$0xff]  ;;  %v2014_v6 = vpack.c.bf16 %v200_v62, %v194_v61 }
  0x44   :  { %2127 = vmatpush1.bf16.msra.mxu0 %v2126_v23  ;;  %2001 = vmatprep.subr.bf16.mxu1 %v2000_v24  ;;  %v213_v3 = vld [vmem:[#allocation4 + $0x458] sm:$0xff]  ;;  %v591_v4 = vld [vmem:[#allocation4 + $0x1028] sm:$0xff]  ;;  %v206_v7 = vld [vmem:[#allocation4 + $0x420] sm:$0xff]  ;;  %v2142_v8 = vpack.c.bf16 %v584_v1, %v578_v63 }
  0x45   :  { %2129 = vmatprep.subr.bf16.mxu0 %v2128_v28  ;;  %v597_v5 = vld [vmem:[#allocation4 + $0x1058] sm:$0xff]  ;;  %v2016_v9 = vpack.c.bf16 %v213_v3, %v207_v2  ;;  %v212_v10 = vld [vmem:[#allocation4 + $0x450] sm:$0xff]  ;;  %v590_v11 = vld [vmem:[#allocation4 + $0x1020] sm:$0xff] }
  0x46   :  { %v596_v12 = vld [vmem:[#allocation4 + $0x1050] sm:$0xff]  ;;  %v2144_v13 = vpack.c.bf16 %v597_v5, %v591_v4  ;;  %v219_v14 = vld [vmem:[#allocation4 + $0x488] sm:$0xff]  ;;  %v225_v15 = vld [vmem:[#allocation4 + $0x4b8] sm:$0xff]  ;;  %v2018_v20 = vpack.c.bf16 %v212_v10, %v206_v7 }
  0x47   :  { %2003 = vmatpush1.bf16.msra.mxu1 %v2002_v34  ;;  %v2971_v16 = vld [vmem:[#allocation2 + $0x8] sm:$0xff]  ;;  %v609_v18 = vld [vmem:[#allocation4 + $0x10b8] sm:$0xff]  ;;  %v2146_v21 = vpack.c.bf16 %v596_v12, %v590_v11  ;;  %v2020_v22 = vpack.c.bf16 %v225_v15, %v219_v14  ;;  %v218_v23 = vld [vmem:[#allocation4 + $0x480] sm:$0xff] }
  0x48   :  { %2131 = vmatpush1.bf16.msra.mxu0 %v2130_v35  ;;  %2005 = vmatprep.subr.bf16.mxu1 %v2004_v36  ;;  %v603_v17 = vld [vmem:[#allocation4 + $0x1088] sm:$0xff]  ;;  %v224_v24 = vld [vmem:[#allocation4 + $0x4b0] sm:$0xff]  ;;  %v602_v25 = vld [vmem:[#allocation4 + $0x1080] sm:$0xff] }
  0x49   :  { %2133 = vmatprep.subr.bf16.mxu0 %v2132_v40  ;;  %938 = vmatprep.mubr.f32.mxu1 %v2971_v16  ;;  %v47_v19 = vld [vmem:[#allocation2 + $0x28] sm:$0xff]  ;;  %v2148_v26 = vpack.c.bf16 %v609_v18, %v603_v17  ;;  %v608_v27 = vld [vmem:[#allocation4 + $0x10b0] sm:$0xff]  ;;  %v237_v29 = vld [vmem:[#allocation4 + $0x518] sm:$0xff]  ;;  %v2022_v32 = vpack.c.bf16 %v224_v24, %v218_v23 }
  0x4a   :  { %1116 = vmatprep.mubr.f32.mxu0 %v47_v19  ;;  %v231_v28 = vld [vmem:[#allocation4 + $0x4e8] sm:$0xff]  ;;  %v621_v31 = vld [vmem:[#allocation4 + $0x1118] sm:$0xff]  ;;  %v2150_v33 = vpack.c.bf16 %v608_v27, %v602_v25  ;;  %v230_v35 = vld [vmem:[#allocation4 + $0x4e0] sm:$0xff] }
  0x4b   :  { %2007 = vmatpush1.bf16.msra.mxu1 %v2006_v46  ;;  %v615_v30 = vld [vmem:[#allocation4 + $0x10e8] sm:$0xff]  ;;  %v2024_v34 = vpack.c.bf16 %v237_v29, %v231_v28  ;;  %v236_v36 = vld [vmem:[#allocation4 + $0x510] sm:$0xff]  ;;  %v614_v37 = vld [vmem:[#allocation4 + $0x10e0] sm:$0xff] }
  0x4c   :  { %2135 = vmatpush1.bf16.msra.mxu0 %v2134_v47  ;;  %2009 = vmatprep.subr.bf16.mxu1 %v2008_v48  ;;  %v2152_v38 = vpack.c.bf16 %v621_v31, %v615_v30  ;;  %v620_v39 = vld [vmem:[#allocation4 + $0x1110] sm:$0xff]  ;;  %v243_v40 = vld [vmem:[#allocation4 + $0x548] sm:$0xff]  ;;  %v249_v41 = vld [vmem:[#allocation4 + $0x578] sm:$0xff]  ;;  %v2026_v44 = vpack.c.bf16 %v236_v36, %v230_v35 }
  0x4d   :  { %2137 = vmatprep.subr.bf16.mxu0 %v2136_v52  ;;  %v627_v42 = vld [vmem:[#allocation4 + $0x1148] sm:$0xff]  ;;  %v633_v43 = vld [vmem:[#allocation4 + $0x1178] sm:$0xff]  ;;  %v2154_v45 = vpack.c.bf16 %v620_v39, %v614_v37  ;;  %v2028_v46 = vpack.c.bf16 %v249_v41, %v243_v40  ;;  %v242_v47 = vld [vmem:[#allocation4 + $0x540] sm:$0xff] }
  0x4e   :  { %v248_v48 = vld [vmem:[#allocation4 + $0x570] sm:$0xff]  ;;  %v626_v49 = vld [vmem:[#allocation4 + $0x1140] sm:$0xff]  ;;  %v2156_v50 = vpack.c.bf16 %v633_v43, %v627_v42  ;;  %v255_v52 = vld [vmem:[#allocation4 + $0x5a8] sm:$0xff] }
  0x4f   :  { %2011 = vmatpush1.bf16.msra.mxu1 %v2010_v58  ;;  %v632_v51 = vld [vmem:[#allocation4 + $0x1170] sm:$0xff]  ;;  %v261_v53 = vld [vmem:[#allocation4 + $0x5d8] sm:$0xff]  ;;  %v639_v54 = vld [vmem:[#allocation4 + $0x11a8] sm:$0xff]  ;;  %v2030_v56 = vpack.c.bf16 %v248_v48, %v242_v47 }
  0x50   :  { %2139 = vmatpush1.bf16.msra.mxu0 %v2138_v59  ;;  %2013 = vmatprep.subr.bf16.mxu1 %v2012_v60  ;;  %v645_v55 = vld [vmem:[#allocation4 + $0x11d8] sm:$0xff]  ;;  %v2158_v57 = vpack.c.bf16 %v632_v51, %v626_v49  ;;  %v2032_v58 = vpack.c.bf16 %v261_v53, %v255_v52  ;;  %v254_v59 = vld [vmem:[#allocation4 + $0x5a0] sm:$0xff]  ;;  %v260_v60 = vld [vmem:[#allocation4 + $0x5d0] sm:$0xff] }
  0x51   :  { %2141 = vmatprep.subr.bf16.mxu0 %v2140_v0  ;;  %v638_v61 = vld [vmem:[#allocation4 + $0x11a0] sm:$0xff]  ;;  %v2160_v62 = vpack.c.bf16 %v645_v55, %v639_v54  ;;  %v644_v63 = vld [vmem:[#allocation4 + $0x11d0] sm:$0xff]  ;;  %v267_v0 = vld [vmem:[#allocation4 + $0x608] sm:$0xff]  ;;  %v2034_v4 = vpack.c.bf16 %v260_v60, %v254_v59 }
  0x52   :  { %v273_v1 = vld [vmem:[#allocation4 + $0x638] sm:$0xff]  ;;  %v651_v2 = vld [vmem:[#allocation4 + $0x1208] sm:$0xff]  ;;  %v2162_v5 = vpack.c.bf16 %v644_v63, %v638_v61  ;;  %v266_v7 = vld [vmem:[#allocation4 + $0x600] sm:$0xff] }
  0x53   :  { %2015 = vmatpush1.bf16.msra.mxu1 %v2014_v6  ;;  %v657_v3 = vld [vmem:[#allocation4 + $0x1238] sm:$0xff]  ;;  %v2036_v6 = vpack.c.bf16 %v273_v1, %v267_v0  ;;  %v656_v11 = vld [vmem:[#allocation4 + $0x1230] sm:$0xff]  ;;  %v279_v12 = vld [vmem:[#allocation4 + $0x668] sm:$0xff] }
  0x54   :  { %2143 = vmatpush1.bf16.msra.mxu0 %v2142_v8  ;;  %2017 = vmatprep.subr.bf16.mxu1 %v2016_v9  ;;  %v272_v8 = vld [vmem:[#allocation4 + $0x630] sm:$0xff]  ;;  %v650_v9 = vld [vmem:[#allocation4 + $0x1200] sm:$0xff]  ;;  %v2164_v10 = vpack.c.bf16 %v657_v3, %v651_v2  ;;  %v663_v14 = vld [vmem:[#allocation4 + $0x1268] sm:$0xff] }
  0x55   :  { %2145 = vmatprep.subr.bf16.mxu0 %v2144_v13  ;;  %v285_v13 = vld [vmem:[#allocation4 + $0x698] sm:$0xff]  ;;  %v42_v17 = vld [vmem:[#allocation2] sm:$0xff]  ;;  %v2038_v18 = vpack.c.bf16 %v272_v8, %v266_v7  ;;  %v284_v23 = vld [vmem:[#allocation4 + $0x690] sm:$0xff] }
  0x56   :  { %v669_v15 = vld [vmem:[#allocation4 + $0x1298] sm:$0xff]  ;;  %v46_v19 = vld [vmem:[#allocation2 + $0x20] sm:$0xff]  ;;  %v291_v27 = vld [vmem:[#allocation4 + $0x6c8] sm:$0xff] }
  0x57   :  { %2019 = vmatpush1.bf16.msra.mxu1 %v2018_v20  ;;  %v2166_v20 = vpack.c.bf16 %v656_v11, %v650_v9  ;;  %v662_v24 = vld [vmem:[#allocation4 + $0x1260] sm:$0xff]  ;;  %v2168_v25 = vpack.c.bf16 %v669_v15, %v663_v14  ;;  %v297_v28 = vld [vmem:[#allocation4 + $0x6f8] sm:$0xff]  ;;  %v675_v29 = vld [vmem:[#allocation4 + $0x12c8] sm:$0xff] }
  0x58   :  { %2147 = vmatpush1.bf16.msra.mxu0 %v2146_v21  ;;  %2021 = vmatprep.subr.bf16.mxu1 %v2020_v22  ;;  %v2040_v21 = vpack.c.bf16 %v285_v13, %v279_v12  ;;  %v278_v22 = vld [vmem:[#allocation4 + $0x660] sm:$0xff]  ;;  %v681_v30 = vld [vmem:[#allocation4 + $0x12f8] sm:$0xff]  ;;  %v296_v35 = vld [vmem:[#allocation4 + $0x6f0] sm:$0xff] }
  0x59   :  { %2149 = vmatprep.subr.bf16.mxu0 %v2148_v26  ;;  %v668_v26 = vld [vmem:[#allocation4 + $0x1290] sm:$0xff]  ;;  %v2042_v31 = vpack.c.bf16 %v284_v23, %v278_v22  ;;  %v674_v36 = vld [vmem:[#allocation4 + $0x12c0] sm:$0xff]  ;;  %v2172_v37 = vpack.c.bf16 %v681_v30, %v675_v29  ;;  %v303_v39 = vld [vmem:[#allocation4 + $0x728] sm:$0xff] }
  0x5a   :  { %v309_v40 = vld [vmem:[#allocation4 + $0x758] sm:$0xff]  ;;  %v687_v41 = vld [vmem:[#allocation4 + $0x1328] sm:$0xff]  ;;  %v308_v47 = vld [vmem:[#allocation4 + $0x750] sm:$0xff] }
  0x5b   :  { %2023 = vmatpush1.bf16.msra.mxu1 %v2022_v32  ;;  %v2170_v32 = vpack.c.bf16 %v668_v26, %v662_v24  ;;  %v693_v42 = vld [vmem:[#allocation4 + $0x1358] sm:$0xff]  ;;  %v686_v48 = vld [vmem:[#allocation4 + $0x1320] sm:$0xff]  ;;  %v315_v51 = vld [vmem:[#allocation4 + $0x788] sm:$0xff] }
  0x5c   :  { %2151 = vmatpush1.bf16.msra.mxu0 %v2150_v33  ;;  %2025 = vmatprep.subr.bf16.mxu1 %v2024_v34  ;;  %v2044_v33 = vpack.c.bf16 %v297_v28, %v291_v27  ;;  %v290_v34 = vld [vmem:[#allocation4 + $0x6c0] sm:$0xff]  ;;  %v2176_v49 = vpack.c.bf16 %v693_v42, %v687_v41  ;;  %v321_v52 = vld [vmem:[#allocation4 + $0x7b8] sm:$0xff]  ;;  %v699_v53 = vld [vmem:[#allocation4 + $0x1388] sm:$0xff] }
  0x5d   :  { %2153 = vmatprep.subr.bf16.mxu0 %v2152_v38  ;;  %v680_v38 = vld [vmem:[#allocation4 + $0x12f0] sm:$0xff]  ;;  %v2046_v43 = vpack.c.bf16 %v296_v35, %v290_v34  ;;  %v705_v54 = vld [vmem:[#allocation4 + $0x13b8] sm:$0xff]  ;;  %v2052_v59 = vpack.c.bf16 %v321_v52, %v315_v51  ;;  %v698_v60 = vld [vmem:[#allocation4 + $0x1380] sm:$0xff] }
  0x5e   :  { %v704_v61 = vld [vmem:[#allocation4 + $0x13b0] sm:$0xff]  ;;  %v2180_v63 = vpack.c.bf16 %v705_v54, %v699_v53  ;;  %v333_v0 = vld [vmem:[#allocation4 + $0x818] sm:$0xff]  ;;  %v711_v1 = vld [vmem:[#allocation4 + $0x13e8] sm:$0xff] }
  0x5f   :  { %2027 = vmatpush1.bf16.msra.mxu1 %v2026_v44  ;;  %v2174_v44 = vpack.c.bf16 %v680_v38, %v674_v36  ;;  %v51_v2 = vld [vmem:[#allocation2 + $0x48] sm:$0xff]  ;;  %v717_v3 = vld [vmem:[#allocation4 + $0x1418] sm:$0xff]  ;;  %v326_v7 = vld [vmem:[#allocation4 + $0x7e0] sm:$0xff] }
  0x60   :  { %2155 = vmatpush1.bf16.msra.mxu0 %v2154_v45  ;;  %2029 = vmatprep.subr.bf16.mxu1 %v2028_v46  ;;  %v2048_v45 = vpack.c.bf16 %v309_v40, %v303_v39  ;;  %v302_v46 = vld [vmem:[#allocation4 + $0x720] sm:$0xff]  ;;  %v332_v8 = vld [vmem:[#allocation4 + $0x810] sm:$0xff]  ;;  %v339_v14 = vld [vmem:[#allocation4 + $0x848] sm:$0xff]  ;;  %v2184_v15 = vpack.c.bf16 %v717_v3, %v711_v1 }
  0x61   :  { %2157 = vmatprep.subr.bf16.mxu0 %v2156_v50  ;;  %v692_v50 = vld [vmem:[#allocation4 + $0x1350] sm:$0xff]  ;;  %v2050_v55 = vpack.c.bf16 %v308_v47, %v302_v46  ;;  %v54_v9 = vld [vmem:[#allocation2 + $0x60] sm:$0xff]  ;;  %v2058_v23 = vpack.c.bf16 %v332_v8, %v326_v7  ;;  %v735_v34 = vld [vmem:[#allocation4 + $0x14a8] sm:$0xff] }
  0x62   :  { %v710_v12 = vld [vmem:[#allocation4 + $0x13e0] sm:$0xff]  ;;  %v716_v13 = vld [vmem:[#allocation4 + $0x1410] sm:$0xff]  ;;  %v67_v35 = vld [vmem:[#allocation2 + $0xc8] sm:$0xff] }
  0x63   :  { %2031 = vmatpush1.bf16.msra.mxu1 %v2030_v56  ;;  %v314_v56 = vld [vmem:[#allocation4 + $0x780] sm:$0xff]  ;;  %v2186_v27 = vpack.c.bf16 %v716_v13, %v710_v12  ;;  %v728_v30 = vld [vmem:[#allocation4 + $0x1470] sm:$0xff]  ;;  %v741_v36 = vld [vmem:[#allocation4 + $0x14d8] sm:$0xff] }
  0x64   :  { %2159 = vmatpush1.bf16.msra.mxu0 %v2158_v57  ;;  %2033 = vmatprep.subr.bf16.mxu1 %v2032_v58  ;;  %v320_v57 = vld [vmem:[#allocation4 + $0x7b0] sm:$0xff]  ;;  %v2178_v58 = vpack.c.bf16 %v692_v50, %v686_v48  ;;  %v58_v22 = vld [vmem:[#allocation2 + $0x80] sm:$0xff]  ;;  %v2192_v47 = vpack.c.bf16 %v741_v36, %v735_v34  ;;  %v363_v48 = vld [vmem:[#allocation4 + $0x908] sm:$0xff] }
  0x65   :  { %2161 = vmatprep.subr.bf16.mxu0 %v2160_v62  ;;  %v327_v62 = vld [vmem:[#allocation4 + $0x7e8] sm:$0xff]  ;;  %v338_v24 = vld [vmem:[#allocation4 + $0x840] sm:$0xff]  ;;  %v740_v46 = vld [vmem:[#allocation4 + $0x14d0] sm:$0xff] }
  0x66   :  { %v2056_v11 = vpack.c.bf16 %v333_v0, %v327_v62  ;;  %v62_v26 = vld [vmem:[#allocation2 + $0xa0] sm:$0xff]  ;;  %v45_v50 = vld [vmem:[#allocation2 + $0x18] sm:$0xff]  ;;  %v747_v51 = vld [vmem:[#allocation4 + $0x1508] sm:$0xff] }
  0x67   :  { %2035 = vmatpush1.bf16.msra.mxu1 %v2034_v4  ;;  %v55_v4 = vld [vmem:[#allocation2 + $0x68] sm:$0xff]  ;;  %v722_v29 = vld [vmem:[#allocation4 + $0x1440] sm:$0xff]  ;;  %v753_v52 = vld [vmem:[#allocation4 + $0x1538] sm:$0xff] }
  0x68   :  { %2163 = vmatpush1.bf16.msra.mxu0 %v2162_v5  ;;  %2037 = vmatprep.subr.bf16.mxu1 %v2036_v6  ;;  %v50_v5 = vld [vmem:[#allocation2 + $0x40] sm:$0xff]  ;;  %v2054_v6 = vpack.c.bf16 %v320_v57, %v314_v56  ;;  %v2190_v42 = vpack.c.bf16 %v728_v30, %v722_v29  ;;  %v49_v53 = vld [vmem:[#allocation2 + $0x38] sm:$0xff]  ;;  %v375_v62 = vld [vmem:[#allocation4 + $0x968] sm:$0xff] }
  0x69   :  { %2165 = vmatprep.subr.bf16.mxu0 %v2164_v10  ;;  %v2182_v10 = vpack.c.bf16 %v704_v61, %v698_v60  ;;  %v66_v38 = vld [vmem:[#allocation2 + $0xc0] sm:$0xff]  ;;  %v2196_v60 = vpack.c.bf16 %v753_v52, %v747_v51  ;;  %v752_v61 = vld [vmem:[#allocation4 + $0x1530] sm:$0xff]  ;;  %v759_v0 = vld [vmem:[#allocation4 + $0x1568] sm:$0xff] }
  0x6a   :  { %939 = vmatmul.mubr.f32.vlgmr.msra.gmra.mrb[0].mxu1 %v42_v17  ;;  %v345_v17 = vld [vmem:[#allocation4 + $0x878] sm:$0xff]  ;;  %v350_v40 = vld [vmem:[#allocation4 + $0x8a0] sm:$0xff]  ;;  %v771_v12 = vld [vmem:[#allocation4 + $0x15c8] sm:$0xff] }
  0x6b   :  { %2039 = vmatpush1.bf16.msra.mxu1 %v2038_v18  ;;  %1117 = vmatmul.mubr.f32.vlgmr.msra.gmra.mrb[0].mxu0 %v46_v19  ;;  %v723_v18 = vld [vmem:[#allocation4 + $0x1448] sm:$0xff]  ;;  %v2060_v28 = vpack.c.bf16 %v345_v17, %v339_v14  ;;  %v70_v41 = vld [vmem:[#allocation2 + $0xe0] sm:$0xff]  ;;  %v765_v1 = vld [vmem:[#allocation4 + $0x1598] sm:$0xff] }
  0x6c   :  { %2167 = vmatpush1.bf16.msra.mxu0 %v2166_v20  ;;  %2041 = vmatprep.subr.bf16.mxu1 %v2040_v21  ;;  %v59_v19 = vld [vmem:[#allocation2 + $0x88] sm:$0xff]  ;;  %v729_v20 = vld [vmem:[#allocation4 + $0x1478] sm:$0xff]  ;;  %v362_v57 = vld [vmem:[#allocation4 + $0x900] sm:$0xff]  ;;  %v2200_v8 = vpack.c.bf16 %v765_v1, %v759_v0 }
  0x6d   :  { %2169 = vmatprep.subr.bf16.mxu0 %v2168_v25  ;;  %944 = vmatprep.mubr.f32.mxu1 %v51_v2  ;;  %v63_v21 = vld [vmem:[#allocation2 + $0xa8] sm:$0xff]  ;;  %v344_v25 = vld [vmem:[#allocation4 + $0x870] sm:$0xff]  ;;  %v758_v7 = vld [vmem:[#allocation4 + $0x1560] sm:$0xff] }
  0x6e   :  { %1122 = vmatprep.mubr.f32.mxu0 %v55_v4  ;;  %945 = vmatmul.mubr.f32.gmra.mrb[2].mxu1 %v50_v5  ;;  %v2062_v39 = vpack.c.bf16 %v344_v25, %v338_v24  ;;  %v374_v5 = vld [vmem:[#allocation4 + $0x960] sm:$0xff]  ;;  %v777_v13 = vld [vmem:[#allocation4 + $0x15f8] sm:$0xff]  ;;  %v783_v25 = vld [vmem:[#allocation4 + $0x1628] sm:$0xff] }
  0x6f   :  { %2043 = vmatpush1.bf16.msra.mxu1 %v2042_v31  ;;  %1123 = vmatmul.mubr.f32.gmra.mrb[2].mxu0 %v54_v9  ;;  %v351_v31 = vld [vmem:[#allocation4 + $0x8a8] sm:$0xff]  ;;  %v764_v9 = vld [vmem:[#allocation4 + $0x1590] sm:$0xff]  ;;  %v405_v24 = vld [vmem:[#allocation4 + $0xa58] sm:$0xff] }
  0x70   :  { %2171 = vmatpush1.bf16.msra.mxu0 %v2170_v32  ;;  %2045 = vmatprep.subr.bf16.mxu1 %v2044_v33  ;;  %v2188_v32 = vpack.c.bf16 %v729_v20, %v723_v18  ;;  %v357_v33 = vld [vmem:[#allocation4 + $0x8d8] sm:$0xff]  ;;  %v386_v18 = vld [vmem:[#allocation4 + $0x9c0] sm:$0xff]  ;;  %v788_v34 = vld [vmem:[#allocation4 + $0x1650] sm:$0xff] }
  0x71   :  { %2173 = vmatprep.subr.bf16.mxu0 %v2172_v37  ;;  %950 = vmatprep.mubr.f32.mxu1 %v59_v19  ;;  %v71_v37 = vld [vmem:[#allocation2 + $0xe8] sm:$0xff]  ;;  %v392_v19 = vld [vmem:[#allocation4 + $0x9f0] sm:$0xff]  ;;  %v770_v20 = vld [vmem:[#allocation4 + $0x15c0] sm:$0xff] }
  0x72   :  { %1128 = vmatprep.mubr.f32.mxu0 %v63_v21  ;;  %951 = vmatmul.mubr.f32.gmra.mrb[4].mxu1 %v58_v22  ;;  %v2204_v21 = vpack.c.bf16 %v777_v13, %v771_v12  ;;  %v776_v22 = vld [vmem:[#allocation4 + $0x15f0] sm:$0xff]  ;;  %v398_v30 = vld [vmem:[#allocation4 + $0xa20] sm:$0xff]  ;;  %v417_v36 = vld [vmem:[#allocation4 + $0xab8] sm:$0xff] }
  0x73   :  { %2047 = vmatpush1.bf16.msra.mxu1 %v2046_v43  ;;  %1129 = vmatmul.mubr.f32.gmra.mrb[4].mxu0 %v62_v26  ;;  %v2064_v43 = vpack.c.bf16 %v357_v33, %v351_v31  ;;  %v789_v26 = vld [vmem:[#allocation4 + $0x1658] sm:$0xff]  ;;  %v404_v31 = vld [vmem:[#allocation4 + $0xa50] sm:$0xff] }
  0x74   :  { %2175 = vmatpush1.bf16.msra.mxu0 %v2174_v44  ;;  %2049 = vmatprep.subr.bf16.mxu1 %v2048_v45  ;;  %v356_v44 = vld [vmem:[#allocation4 + $0x8d0] sm:$0xff]  ;;  %v734_v45 = vld [vmem:[#allocation4 + $0x14a0] sm:$0xff]  ;;  %v2208_v33 = vpack.c.bf16 %v789_v26, %v783_v25 }
  0x75   :  { %2177 = vmatprep.subr.bf16.mxu0 %v2176_v49  ;;  %956 = vmatprep.mubr.f32.mxu1 %v67_v35  ;;  %v369_v49 = vld [vmem:[#allocation4 + $0x938] sm:$0xff]  ;;  %v2066_v54 = vpack.c.bf16 %v356_v44, %v350_v40  ;;  %v411_v35 = vld [vmem:[#allocation4 + $0xa88] sm:$0xff]  ;;  %v794_v44 = vld [vmem:[#allocation4 + $0x1680] sm:$0xff] }
  0x76   :  { %1134 = vmatprep.mubr.f32.mxu0 %v71_v37  ;;  %957 = vmatmul.mubr.f32.gmra.mrb[6].mxu1 %v66_v38  ;;  %v2068_v56 = vpack.c.bf16 %v369_v49, %v363_v48  ;;  %v795_v37 = vld [vmem:[#allocation4 + $0x1688] sm:$0xff]  ;;  %v801_v38 = vld [vmem:[#allocation4 + $0x16b8] sm:$0xff] }
  0x77   :  { %2051 = vmatpush1.bf16.msra.mxu1 %v2050_v55  ;;  %1135 = vmatmul.mubr.f32.gmra.mrb[6].mxu0 %v70_v41  ;;  %v2194_v55 = vpack.c.bf16 %v740_v46, %v734_v45  ;;  %v2084_v41 = vpack.c.bf16 %v417_v36, %v411_v35  ;;  %v2212_v45 = vpack.c.bf16 %v801_v38, %v795_v37  ;;  %v800_v46 = vld [vmem:[#allocation4 + $0x16b0] sm:$0xff]  ;;  %v429_v48 = vld [vmem:[#allocation4 + $0xb18] sm:$0xff]  ;;  %v807_v49 = vld [vmem:[#allocation4 + $0x16e8] sm:$0xff] }
  0x78   :  { %2179 = vmatpush1.bf16.msra.mxu0 %v2178_v58  ;;  %2053 = vmatprep.subr.bf16.mxu1 %v2052_v59  ;;  %v368_v58 = vld [vmem:[#allocation4 + $0x930] sm:$0xff]  ;;  %v746_v59 = vld [vmem:[#allocation4 + $0x1500] sm:$0xff]  ;;  %v2214_v52 = vpack.c.bf16 %v800_v46, %v794_v44  ;;  %v95_v35 = vld [vmem:[#allocation4 + $0xa8] sm:$0xff] }
  0x79   :  { %2181 = vmatprep.subr.bf16.mxu0 %v2180_v63  ;;  %1027 = vmatprep.mubr.f32.mxu1 %v45_v50  ;;  %v381_v63 = vld [vmem:[#allocation4 + $0x998] sm:$0xff]  ;;  %v2070_v2 = vpack.c.bf16 %v368_v58, %v362_v57  ;;  %v2198_v3 = vpack.c.bf16 %v752_v61, %v746_v59  ;;  %v812_v58 = vld [vmem:[#allocation4 + $0x1710] sm:$0xff]  ;;  %v435_v59 = vld [vmem:[#allocation4 + $0xb48] sm:$0xff] }
  0x7a   :  { %1205 = vmatprep.mubr.f32.mxu0 %v49_v53  ;;  %v2072_v4 = vpack.c.bf16 %v381_v63, %v375_v62  ;;  %v813_v50 = vld [vmem:[#allocation4 + $0x1718] sm:$0xff]  ;;  %v819_v61 = vld [vmem:[#allocation4 + $0x1748] sm:$0xff]  ;;  %v52_v44 = vld [vmem:[#allocation2 + $0x50] sm:$0xff] }
  0x7b   :  { %2055 = vmatpush1.bf16.msra.mxu1 %v2054_v6  ;;  %v380_v6 = vld [vmem:[#allocation4 + $0x990] sm:$0xff]  ;;  %v2216_v57 = vpack.c.bf16 %v813_v50, %v807_v49  ;;  %v825_v62 = vld [vmem:[#allocation4 + $0x1778] sm:$0xff]  ;;  %v91_v38 = vld [vmem:[#allocation4 + $0x88] sm:$0xff] }
  0x7c   :  { %2183 = vmatpush1.bf16.msra.mxu0 %v2182_v10  ;;  %2057 = vmatprep.subr.bf16.mxu1 %v2056_v11  ;;  %v387_v10 = vld [vmem:[#allocation4 + $0x9c8] sm:$0xff]  ;;  %v393_v11 = vld [vmem:[#allocation4 + $0x9f8] sm:$0xff]  ;;  %v2074_v14 = vpack.c.bf16 %v380_v6, %v374_v5  ;;  %v2220_v5 = vpack.c.bf16 %v825_v62, %v819_v61  ;;  %v824_v6 = vld [vmem:[#allocation4 + $0x1770] sm:$0xff] }
  0x7d   :  { %2185 = vmatprep.subr.bf16.mxu0 %v2184_v15  ;;  %v2202_v15 = vpack.c.bf16 %v764_v9, %v758_v7  ;;  %v2076_v17 = vpack.c.bf16 %v393_v11, %v387_v10  ;;  %v447_v7 = vld [vmem:[#allocation4 + $0xba8] sm:$0xff]  ;;  %v837_v10 = vld [vmem:[#allocation4 + $0x17d8] sm:$0xff]  ;;  %v90_v46 = vld [vmem:[#allocation4 + $0x80] sm:$0xff] }
  0x7e   :  { %v831_v9 = vld [vmem:[#allocation4 + $0x17a8] sm:$0xff]  ;;  %v53_v37 = vld [vmem:[#allocation2 + $0x58] sm:$0xff]  ;;  %v102_v62 = vld [vmem:[#allocation4 + $0xe0] sm:$0xff] }
  0x7f   :  { %2059 = vmatpush1.bf16.msra.mxu1 %v2058_v23  ;;  %v399_v23 = vld [vmem:[#allocation4 + $0xa28] sm:$0xff]  ;;  %v101_v50 = vld [vmem:[#allocation4 + $0xd8] sm:$0xff] }
  0x80   :  { %2187 = vmatpush1.bf16.msra.mxu0 %v2186_v27  ;;  %2061 = vmatprep.subr.bf16.mxu1 %v2060_v28  ;;  %v2078_v27 = vpack.c.bf16 %v392_v19, %v386_v18  ;;  %v2206_v28 = vpack.c.bf16 %v776_v22, %v770_v20  ;;  %v2080_v29 = vpack.c.bf16 %v405_v24, %v399_v23  ;;  %v836_v19 = vld [vmem:[#allocation4 + $0x17d0] sm:$0xff]  ;;  %v77_v20 = vld [vmem:[#allocation4 + $0x18] sm:$0xff]  ;;  %v79_v22 = vld [vmem:[#allocation4 + $0x28] sm:$0xff] }
  0x81   :  { %2189 = vmatprep.subr.bf16.mxu0 %v2188_v32  ;;  %v782_v32 = vld [vmem:[#allocation4 + $0x1620] sm:$0xff]  ;;  %v2224_v18 = vpack.c.bf16 %v837_v10, %v831_v9  ;;  %v85_v23 = vld [vmem:[#allocation4 + $0x58] sm:$0xff]  ;;  %v112_v9 = vld [vmem:[#allocation4 + $0x130] sm:$0xff] }
  0x82   :  { %v2210_v40 = vpack.c.bf16 %v788_v34, %v782_v32  ;;  %v84_v32 = vld [vmem:[#allocation4 + $0x50] sm:$0xff]  ;;  %v89_v34 = vld [vmem:[#allocation4 + $0x78] sm:$0xff]  ;;  %v118_v10 = vld [vmem:[#allocation4 + $0x160] sm:$0xff] }
  0x83   :  { %2063 = vmatpush1.bf16.msra.mxu1 %v2062_v39  ;;  %v2082_v39 = vpack.c.bf16 %v404_v31, %v398_v30  ;;  %v2484_v30 = vpack.c.bf16 %v85_v23, %v79_v22  ;;  %v78_v31 = vld [vmem:[#allocation4 + $0x20] sm:$0xff]  ;;  %v72_v22 = vld [vmem:[#allocation2 + $0xf0] sm:$0xff]  ;;  %v2242_v23 = vpack.c.bf16 %v118_v10, %v112_v9 }
  0x84   :  { %2191 = vmatpush1.bf16.msra.mxu0 %v2190_v42  ;;  %2065 = vmatprep.subr.bf16.mxu1 %v2064_v43  ;;  %v410_v42 = vld [vmem:[#allocation4 + $0xa80] sm:$0xff]  ;;  %v416_v43 = vld [vmem:[#allocation4 + $0xab0] sm:$0xff] }
  0x85   :  { %2193 = vmatprep.subr.bf16.mxu0 %v2192_v47  ;;  %v423_v47 = vld [vmem:[#allocation4 + $0xae8] sm:$0xff]  ;;  %v2086_v51 = vpack.c.bf16 %v416_v43, %v410_v42  ;;  %v88_v42 = vld [vmem:[#allocation4 + $0x70] sm:$0xff]  ;;  %v94_v43 = vld [vmem:[#allocation4 + $0xa0] sm:$0xff] }
  0x86   :  { %v2088_v53 = vpack.c.bf16 %v429_v48, %v423_v47  ;;  %v96_v47 = vld [vmem:[#allocation4 + $0xb0] sm:$0xff]  ;;  %v178_v10 = vld [vmem:[#allocation4 + $0x340] sm:$0xff] }
  0x87   :  { %2067 = vmatpush1.bf16.msra.mxu1 %v2066_v54  ;;  %v422_v54 = vld [vmem:[#allocation4 + $0xae0] sm:$0xff]  ;;  %v56_v48 = vld [vmem:[#allocation2 + $0x70] sm:$0xff] }
  0x88   :  { %2195 = vmatpush1.bf16.msra.mxu0 %v2194_v55  ;;  %2069 = vmatprep.subr.bf16.mxu1 %v2068_v56  ;;  %v428_v55 = vld [vmem:[#allocation4 + $0xb10] sm:$0xff]  ;;  %v806_v56 = vld [vmem:[#allocation4 + $0x16e0] sm:$0xff] }
  0x89   :  { %2197 = vmatprep.subr.bf16.mxu0 %v2196_v60  ;;  %v441_v60 = vld [vmem:[#allocation4 + $0xb78] sm:$0xff]  ;;  %v2090_v63 = vpack.c.bf16 %v428_v55, %v422_v54  ;;  %v2218_v0 = vpack.c.bf16 %v812_v58, %v806_v56  ;;  %v103_v54 = vld [vmem:[#allocation4 + $0xe8] sm:$0xff]  ;;  %v2490_v56 = vpack.c.bf16 %v96_v47, %v90_v46  ;;  %v100_v58 = vld [vmem:[#allocation4 + $0xd0] sm:$0xff] }
  0x8a   :  { %v2092_v1 = vpack.c.bf16 %v441_v60, %v435_v59  ;;  %v109_v55 = vld [vmem:[#allocation4 + $0x118] sm:$0xff]  ;;  %v106_v59 = vld [vmem:[#allocation4 + $0x100] sm:$0xff]  ;;  %v60_v60 = vld [vmem:[#allocation2 + $0x90] sm:$0xff] }
  0x8b   :  { %2071 = vmatpush1.bf16.msra.mxu1 %v2070_v2  ;;  %v434_v2 = vld [vmem:[#allocation4 + $0xb40] sm:$0xff]  ;;  %v157_v46 = vld [vmem:[#allocation4 + $0x298] sm:$0xff]  ;;  %v172_v9 = vld [vmem:[#allocation4 + $0x310] sm:$0xff] }
  0x8c   :  { %2199 = vmatpush1.bf16.msra.mxu0 %v2198_v3  ;;  %2073 = vmatprep.subr.bf16.mxu1 %v2072_v4  ;;  %v440_v3 = vld [vmem:[#allocation4 + $0xb70] sm:$0xff]  ;;  %v818_v4 = vld [vmem:[#allocation4 + $0x1740] sm:$0xff] }
  0x8d   :  { %2201 = vmatprep.subr.bf16.mxu0 %v2200_v8  ;;  %v453_v8 = vld [vmem:[#allocation4 + $0xbd8] sm:$0xff]  ;;  %v2094_v11 = vpack.c.bf16 %v440_v3, %v434_v2  ;;  %v2222_v12 = vpack.c.bf16 %v824_v6, %v818_v4  ;;  %v119_v3 = vld [vmem:[#allocation4 + $0x168] sm:$0xff]  ;;  %v2238_v4 = vpack.c.bf16 %v106_v59, %v100_v58 }
  0x8e   :  { %v2096_v13 = vpack.c.bf16 %v453_v8, %v447_v7  ;;  %v113_v2 = vld [vmem:[#allocation4 + $0x138] sm:$0xff]  ;;  %v115_v6 = vld [vmem:[#allocation4 + $0x148] sm:$0xff] }
  0x8f   :  { %2075 = vmatpush1.bf16.msra.mxu1 %v2074_v14  ;;  %v446_v14 = vld [vmem:[#allocation4 + $0xba0] sm:$0xff]  ;;  %v121_v7 = vld [vmem:[#allocation4 + $0x178] sm:$0xff] }
  0x90   :  { %2203 = vmatpush1.bf16.msra.mxu0 %v2202_v15  ;;  %2077 = vmatprep.subr.bf16.mxu1 %v2076_v17  ;;  %v452_v15 = vld [vmem:[#allocation4 + $0xbd0] sm:$0xff]  ;;  %v830_v17 = vld [vmem:[#allocation4 + $0x17a0] sm:$0xff]  ;;  %v169_v58 = vld [vmem:[#allocation4 + $0x2f8] sm:$0xff] }
  0x91   :  { %2205 = vmatprep.subr.bf16.mxu0 %v2204_v21  ;;  %v83_v21 = vld [vmem:[#allocation4 + $0x48] sm:$0xff]  ;;  %v2098_v24 = vpack.c.bf16 %v452_v15, %v446_v14  ;;  %v2226_v25 = vpack.c.bf16 %v836_v19, %v830_v17  ;;  %v125_v14 = vld [vmem:[#allocation4 + $0x198] sm:$0xff] }
  0x92   :  { %v2228_v26 = vpack.c.bf16 %v83_v21, %v77_v20  ;;  %v131_v15 = vld [vmem:[#allocation4 + $0x1c8] sm:$0xff]  ;;  %v73_v17 = vld [vmem:[#allocation2 + $0xf8] sm:$0xff]  ;;  %v68_v21 = vld [vmem:[#allocation2 + $0xd0] sm:$0xff] }
  0x93   :  { %2079 = vmatpush1.bf16.msra.mxu1 %v2078_v27  ;;  %v76_v27 = vld [vmem:[#allocation4 + $0x10] sm:$0xff]  ;;  %v127_v19 = vld [vmem:[#allocation4 + $0x1a8] sm:$0xff]  ;;  %v133_v20 = vld [vmem:[#allocation4 + $0x1d8] sm:$0xff] }
  0x94   :  { %2207 = vmatpush1.bf16.msra.mxu0 %v2206_v28  ;;  %2081 = vmatprep.subr.bf16.mxu1 %v2080_v29  ;;  %v82_v28 = vld [vmem:[#allocation4 + $0x40] sm:$0xff]  ;;  %v44_v29 = vld [vmem:[#allocation2 + $0x10] sm:$0xff] }
  0x95   :  { %2209 = vmatprep.subr.bf16.mxu0 %v2208_v33  ;;  %v48_v33 = vld [vmem:[#allocation2 + $0x30] sm:$0xff]  ;;  %v2230_v36 = vpack.c.bf16 %v82_v28, %v76_v27  ;;  %v130_v27 = vld [vmem:[#allocation4 + $0x1c0] sm:$0xff] }
  0x96   :  { %v126_v28 = vld [vmem:[#allocation4 + $0x1a0] sm:$0xff] }
  0x97   :  { %2083 = vmatpush1.bf16.msra.mxu1 %v2082_v39  ;;  %v97_v39 = vld [vmem:[#allocation4 + $0xb8] sm:$0xff] }
  0x98   :  { %2211 = vmatpush1.bf16.msra.mxu0 %v2210_v40  ;;  %2085 = vmatprep.subr.bf16.mxu1 %v2084_v41  ;;  %v2486_v40 = vpack.c.bf16 %v84_v32, %v78_v31  ;;  %v57_v41 = vld [vmem:[#allocation2 + $0x78] sm:$0xff]  ;;  %v2488_v49 = vpack.c.bf16 %v97_v39, %v91_v38  ;;  %v143_v32 = vld [vmem:[#allocation4 + $0x228] sm:$0xff]  ;;  %v136_v38 = vld [vmem:[#allocation4 + $0x1f0] sm:$0xff] }
  0x99   :  { %2213 = vmatprep.subr.bf16.mxu0 %v2212_v45  ;;  %v2232_v45 = vpack.c.bf16 %v95_v35, %v89_v34  ;;  %v137_v31 = vld [vmem:[#allocation4 + $0x1f8] sm:$0xff]  ;;  %v142_v39 = vld [vmem:[#allocation4 + $0x220] sm:$0xff] }
  0x9a   :  { %v145_v34 = vld [vmem:[#allocation4 + $0x238] sm:$0xff]  ;;  %v2250_v47 = vpack.c.bf16 %v142_v39, %v136_v38  ;;  %v204_v38 = vld [vmem:[#allocation4 + $0x410] sm:$0xff] }
  0x9b   :  { %2087 = vmatpush1.bf16.msra.mxu1 %v2086_v51  ;;  %v107_v51 = vld [vmem:[#allocation4 + $0x108] sm:$0xff]  ;;  %v209_v39 = vld [vmem:[#allocation4 + $0x438] sm:$0xff] }
  0x9c   :  { %2215 = vmatpush1.bf16.msra.mxu0 %v2214_v52  ;;  %2089 = vmatprep.subr.bf16.mxu1 %v2088_v53  ;;  %v2234_v52 = vpack.c.bf16 %v94_v43, %v88_v42  ;;  %v61_v53 = vld [vmem:[#allocation2 + $0x98] sm:$0xff]  ;;  %v2236_v61 = vpack.c.bf16 %v107_v51, %v101_v50  ;;  %v144_v42 = vld [vmem:[#allocation4 + $0x230] sm:$0xff]  ;;  %v154_v51 = vld [vmem:[#allocation4 + $0x280] sm:$0xff] }
  0x9d   :  { %2217 = vmatprep.subr.bf16.mxu0 %v2216_v57  ;;  %v65_v57 = vld [vmem:[#allocation2 + $0xb8] sm:$0xff]  ;;  %v148_v50 = vld [vmem:[#allocation4 + $0x250] sm:$0xff] }
  0x9e   :  { %v149_v43 = vld [vmem:[#allocation4 + $0x258] sm:$0xff]  ;;  %v2254_v59 = vpack.c.bf16 %v154_v51, %v148_v50  ;;  %v216_v50 = vld [vmem:[#allocation4 + $0x470] sm:$0xff] }
  0x9f   :  { %2091 = vmatpush1.bf16.msra.mxu1 %v2090_v63  ;;  %v108_v63 = vld [vmem:[#allocation4 + $0x110] sm:$0xff]  ;;  %v221_v51 = vld [vmem:[#allocation4 + $0x498] sm:$0xff] }
  0xa0   :  { %2219 = vmatpush1.bf16.msra.mxu0 %v2218_v0  ;;  %2093 = vmatprep.subr.bf16.mxu1 %v2092_v1  ;;  %v64_v0 = vld [vmem:[#allocation2 + $0xb0] sm:$0xff]  ;;  %v2492_v1 = vpack.c.bf16 %v109_v55, %v103_v54  ;;  %v2494_v8 = vpack.c.bf16 %v108_v63, %v102_v62  ;;  %v161_v55 = vld [vmem:[#allocation4 + $0x2b8] sm:$0xff]  ;;  %v166_v62 = vld [vmem:[#allocation4 + $0x2e0] sm:$0xff] }
  0xa1   :  { %2221 = vmatprep.subr.bf16.mxu0 %v2220_v5  ;;  %v69_v5 = vld [vmem:[#allocation2 + $0xd8] sm:$0xff]  ;;  %v156_v54 = vld [vmem:[#allocation4 + $0x290] sm:$0xff]  ;;  %v162_v63 = vld [vmem:[#allocation4 + $0x2c0] sm:$0xff] }
  0xa3   :  { %2095 = vmatpush1.bf16.msra.mxu1 %v2094_v11  ;;  %v114_v11 = vld [vmem:[#allocation4 + $0x140] sm:$0xff] }
  0xa4   :  { %2223 = vmatpush1.bf16.msra.mxu0 %v2222_v12  ;;  %2097 = vmatprep.subr.bf16.mxu1 %v2096_v13  ;;  %v2240_v12 = vpack.c.bf16 %v119_v3, %v113_v2  ;;  %v120_v13 = vld [vmem:[#allocation4 + $0x170] sm:$0xff]  ;;  %v173_v2 = vld [vmem:[#allocation4 + $0x318] sm:$0xff]  ;;  %v179_v3 = vld [vmem:[#allocation4 + $0x348] sm:$0xff] }
  0xa5   :  { %2225 = vmatprep.subr.bf16.mxu0 %v2224_v18  ;;  %v2496_v18 = vpack.c.bf16 %v121_v7, %v115_v6 }
  0xa7   :  { %2099 = vmatpush1.bf16.msra.mxu1 %v2098_v24  ;;  %v2498_v24 = vpack.c.bf16 %v120_v13, %v114_v11  ;;  %v174_v11 = vld [vmem:[#allocation4 + $0x320] sm:$0xff]  ;;  %v180_v13 = vld [vmem:[#allocation4 + $0x350] sm:$0xff] }
  0xa8   :  { %2227 = vmatpush1.bf16.msra.mxu0 %v2226_v25  ;;  %2229 = vmatprep.subr.bf16.mxu1 %v2228_v26  ;;  %v2244_v25 = vpack.c.bf16 %v131_v15, %v125_v14  ;;  %v124_v26 = vld [vmem:[#allocation4 + $0x190] sm:$0xff]  ;;  %v185_v14 = vld [vmem:[#allocation4 + $0x378] sm:$0xff]  ;;  %v191_v15 = vld [vmem:[#allocation4 + $0x3a8] sm:$0xff] }
  0xa9   :  { %2485 = vmatprep.subr.bf16.mxu0 %v2484_v30  ;;  %v132_v30 = vld [vmem:[#allocation4 + $0x1d0] sm:$0xff]  ;;  %v2246_v35 = vpack.c.bf16 %v130_v27, %v124_v26  ;;  %v197_v27 = vld [vmem:[#allocation4 + $0x3d8] sm:$0xff] }
  0xaa   :  { %1028 = vmatmul.mubr.f32.vlgmr.msra.gmra.mrb[0].mxu1 %v44_v29  ;;  %v2500_v29 = vpack.c.bf16 %v133_v20, %v127_v19  ;;  %v2262_v19 = vpack.c.bf16 %v178_v10, %v172_v9  ;;  %v2518_v20 = vpack.c.bf16 %v180_v13, %v174_v11  ;;  %v192_v26 = vld [vmem:[#allocation4 + $0x3b0] sm:$0xff]  ;;  %v245_v10 = vld [vmem:[#allocation4 + $0x558] sm:$0xff]  ;;  %v251_v11 = vld [vmem:[#allocation4 + $0x588] sm:$0xff] }
  0xab   :  { %1206 = vmatmul.mubr.f32.vlgmr.msra.gmra.mrb[0].mxu0 %v48_v33  ;;  %2231 = vmatpush1.bf16.msra.mxu1 %v2230_v36  ;;  %v139_v33 = vld [vmem:[#allocation4 + $0x208] sm:$0xff]  ;;  %v2502_v36 = vpack.c.bf16 %v132_v30, %v126_v28  ;;  %v205_v30 = vld [vmem:[#allocation4 + $0x418] sm:$0xff]  ;;  %v240_v9 = vld [vmem:[#allocation4 + $0x530] sm:$0xff] }
  0xac   :  { %2487 = vmatpush1.bf16.msra.mxu0 %v2486_v40  ;;  %1033 = vmatprep.mubr.f32.mxu1 %v53_v37  ;;  %v2248_v37 = vpack.c.bf16 %v143_v32, %v137_v31  ;;  %v138_v40 = vld [vmem:[#allocation4 + $0x200] sm:$0xff]  ;;  %v203_v28 = vld [vmem:[#allocation4 + $0x408] sm:$0xff]  ;;  %v253_v13 = vld [vmem:[#allocation4 + $0x598] sm:$0xff] }
  0xad   :  { %1211 = vmatprep.mubr.f32.mxu0 %v57_v41  ;;  %2233 = vmatprep.subr.bf16.mxu1 %v2232_v45  ;;  %v2504_v41 = vpack.c.bf16 %v145_v34, %v139_v33  ;;  %v151_v45 = vld [vmem:[#allocation4 + $0x268] sm:$0xff]  ;;  %v2268_v33 = vpack.c.bf16 %v203_v28, %v197_v27  ;;  %v196_v34 = vld [vmem:[#allocation4 + $0x3d0] sm:$0xff] }
  0xae   :  { %1034 = vmatmul.mubr.f32.gmra.mrb[2].mxu1 %v52_v44  ;;  %2489 = vmatprep.subr.bf16.mxu0 %v2488_v49  ;;  %v155_v44 = vld [vmem:[#allocation4 + $0x288] sm:$0xff] }
  0xaf   :  { %1212 = vmatmul.mubr.f32.gmra.mrb[2].mxu0 %v56_v48  ;;  %2235 = vmatpush1.bf16.msra.mxu1 %v2234_v52  ;;  %v2506_v48 = vpack.c.bf16 %v144_v42, %v138_v40  ;;  %v2252_v49 = vpack.c.bf16 %v155_v44, %v149_v43  ;;  %v150_v52 = vld [vmem:[#allocation4 + $0x260] sm:$0xff]  ;;  %v215_v40 = vld [vmem:[#allocation4 + $0x468] sm:$0xff]  ;;  %v217_v42 = vld [vmem:[#allocation4 + $0x478] sm:$0xff] }
  0xb0   :  { %2491 = vmatpush1.bf16.msra.mxu0 %v2490_v56  ;;  %1039 = vmatprep.mubr.f32.mxu1 %v61_v53  ;;  %v2508_v53 = vpack.c.bf16 %v157_v46, %v151_v45  ;;  %v167_v56 = vld [vmem:[#allocation4 + $0x2e8] sm:$0xff]  ;;  %v2272_v45 = vpack.c.bf16 %v215_v40, %v209_v39  ;;  %v208_v46 = vld [vmem:[#allocation4 + $0x430] sm:$0xff] }
  0xb1   :  { %1217 = vmatprep.mubr.f32.mxu0 %v65_v57  ;;  %2237 = vmatprep.subr.bf16.mxu1 %v2236_v61  ;;  %v163_v57 = vld [vmem:[#allocation4 + $0x2c8] sm:$0xff]  ;;  %v160_v61 = vld [vmem:[#allocation4 + $0x2b0] sm:$0xff] }
  0xb2   :  { %1040 = vmatmul.mubr.f32.gmra.mrb[4].mxu1 %v60_v60  ;;  %2493 = vmatprep.subr.bf16.mxu0 %v2492_v1  ;;  %v2256_v60 = vpack.c.bf16 %v167_v56, %v161_v55  ;;  %v168_v1 = vld [vmem:[#allocation4 + $0x2f0] sm:$0xff]  ;;  %v2258_v6 = vpack.c.bf16 %v166_v62, %v160_v61  ;;  %v233_v62 = vld [vmem:[#allocation4 + $0x4f8] sm:$0xff] }
  0xb3   :  { %1218 = vmatmul.mubr.f32.gmra.mrb[4].mxu0 %v64_v0  ;;  %2239 = vmatpush1.bf16.msra.mxu1 %v2238_v4  ;;  %v2512_v0 = vpack.c.bf16 %v169_v58, %v163_v57  ;;  %v175_v4 = vld [vmem:[#allocation4 + $0x328] sm:$0xff]  ;;  %v2514_v7 = vpack.c.bf16 %v168_v1, %v162_v63  ;;  %v220_v58 = vld [vmem:[#allocation4 + $0x490] sm:$0xff]  ;;  %v241_v1 = vld [vmem:[#allocation4 + $0x538] sm:$0xff] }
  0xb4   :  { %2495 = vmatpush1.bf16.msra.mxu0 %v2494_v8  ;;  %1045 = vmatprep.mubr.f32.mxu1 %v69_v5  ;;  %v181_v5 = vld [vmem:[#allocation4 + $0x358] sm:$0xff]  ;;  %v2260_v8 = vpack.c.bf16 %v179_v3, %v173_v2  ;;  %v228_v61 = vld [vmem:[#allocation4 + $0x4d0] sm:$0xff]  ;;  %v239_v63 = vld [vmem:[#allocation4 + $0x528] sm:$0xff] }
  0xb5   :  { %1223 = vmatprep.mubr.f32.mxu0 %v73_v17  ;;  %2241 = vmatprep.subr.bf16.mxu1 %v2240_v12  ;;  %v2516_v12 = vpack.c.bf16 %v181_v5, %v175_v4  ;;  %v187_v17 = vld [vmem:[#allocation4 + $0x388] sm:$0xff]  ;;  %v2280_v4 = vpack.c.bf16 %v239_v63, %v233_v62  ;;  %v232_v5 = vld [vmem:[#allocation4 + $0x4f0] sm:$0xff]  ;;  %v301_v62 = vld [vmem:[#allocation4 + $0x718] sm:$0xff] }
  0xb6   :  { %1046 = vmatmul.mubr.f32.gmra.mrb[6].mxu1 %v68_v21  ;;  %2497 = vmatprep.subr.bf16.mxu0 %v2496_v18  ;;  %v193_v18 = vld [vmem:[#allocation4 + $0x3b8] sm:$0xff]  ;;  %v2264_v21 = vpack.c.bf16 %v191_v15, %v185_v14 }
  0xb7   :  { %1224 = vmatmul.mubr.f32.gmra.mrb[6].mxu0 %v72_v22  ;;  %2243 = vmatpush1.bf16.msra.mxu1 %v2242_v23  ;;  %v184_v22 = vld [vmem:[#allocation4 + $0x370] sm:$0xff]  ;;  %v190_v23 = vld [vmem:[#allocation4 + $0x3a0] sm:$0xff] }
  0xb8   :  { %2499 = vmatpush1.bf16.msra.mxu0 %v2498_v24  ;;  %2245 = vmatprep.subr.bf16.mxu1 %v2244_v25  ;;  %v186_v24 = vld [vmem:[#allocation4 + $0x380] sm:$0xff]  ;;  %v2520_v25 = vpack.c.bf16 %v193_v18, %v187_v17  ;;  %v2266_v31 = vpack.c.bf16 %v190_v23, %v184_v22  ;;  %v2284_v17 = vpack.c.bf16 %v251_v11, %v245_v10  ;;  %v244_v18 = vld [vmem:[#allocation4 + $0x550] sm:$0xff]  ;;  %v257_v23 = vld [vmem:[#allocation4 + $0x5b8] sm:$0xff] }
  0xb9   :  { %2501 = vmatprep.subr.bf16.mxu0 %v2500_v29  ;;  %1294 = vmatprep.mubr.f32.mxu1 %v2971_v16  ;;  %v199_v29 = vld [vmem:[#allocation4 + $0x3e8] sm:$0xff]  ;;  %v2522_v32 = vpack.c.bf16 %v192_v26, %v186_v24  ;;  %v252_v22 = vld [vmem:[#allocation4 + $0x590] sm:$0xff]  ;;  %v265_v26 = vld [vmem:[#allocation4 + $0x5f8] sm:$0xff] }
  0xba   :  { %1650 = vmatprep.mubr.f32.mxu0 %v2971_v16  ;;  %v2510_v16 = vpack.c.bf16 %v156_v54, %v150_v52  ;;  %v227_v52 = vld [vmem:[#allocation4 + $0x4c8] sm:$0xff]  ;;  %v229_v54 = vld [vmem:[#allocation4 + $0x4d8] sm:$0xff] }
  0xbb   :  { %2247 = vmatpush1.bf16.msra.mxu1 %v2246_v35  ;;  %v202_v35 = vld [vmem:[#allocation4 + $0x400] sm:$0xff]  ;;  %v2276_v57 = vpack.c.bf16 %v227_v52, %v221_v51  ;;  %v263_v24 = vld [vmem:[#allocation4 + $0x5e8] sm:$0xff]  ;;  %v313_v11 = vld [vmem:[#allocation4 + $0x778] sm:$0xff] }
  0xbc   :  { %2503 = vmatpush1.bf16.msra.mxu0 %v2502_v36  ;;  %2249 = vmatprep.subr.bf16.mxu1 %v2248_v37  ;;  %v198_v36 = vld [vmem:[#allocation4 + $0x3e0] sm:$0xff]  ;;  %v2524_v37 = vpack.c.bf16 %v205_v30, %v199_v29  ;;  %v2270_v43 = vpack.c.bf16 %v202_v35, %v196_v34  ;;  %v2288_v29 = vpack.c.bf16 %v263_v24, %v257_v23  ;;  %v256_v30 = vld [vmem:[#allocation4 + $0x5b0] sm:$0xff]  ;;  %v269_v35 = vld [vmem:[#allocation4 + $0x618] sm:$0xff] }
  0xbd   :  { %2505 = vmatprep.subr.bf16.mxu0 %v2504_v41  ;;  %v211_v41 = vld [vmem:[#allocation4 + $0x448] sm:$0xff]  ;;  %v2526_v44 = vpack.c.bf16 %v204_v38, %v198_v36  ;;  %v264_v34 = vld [vmem:[#allocation4 + $0x5f0] sm:$0xff]  ;;  %v277_v38 = vld [vmem:[#allocation4 + $0x658] sm:$0xff] }
  0xbe   :  { %v275_v36 = vld [vmem:[#allocation4 + $0x648] sm:$0xff] }
  0xbf   :  { %2251 = vmatpush1.bf16.msra.mxu1 %v2250_v47  ;;  %v214_v47 = vld [vmem:[#allocation4 + $0x460] sm:$0xff]  ;;  %v307_v10 = vld [vmem:[#allocation4 + $0x748] sm:$0xff] }
  0xc0   :  { %2507 = vmatpush1.bf16.msra.mxu0 %v2506_v48  ;;  %2253 = vmatprep.subr.bf16.mxu1 %v2252_v49  ;;  %v210_v48 = vld [vmem:[#allocation4 + $0x440] sm:$0xff]  ;;  %v2528_v49 = vpack.c.bf16 %v217_v42, %v211_v41  ;;  %v2274_v55 = vpack.c.bf16 %v214_v47, %v208_v46  ;;  %v2292_v41 = vpack.c.bf16 %v275_v36, %v269_v35  ;;  %v268_v42 = vld [vmem:[#allocation4 + $0x610] sm:$0xff]  ;;  %v281_v47 = vld [vmem:[#allocation4 + $0x678] sm:$0xff] }
  0xc1   :  { %2509 = vmatprep.subr.bf16.mxu0 %v2508_v53  ;;  %v223_v53 = vld [vmem:[#allocation4 + $0x4a8] sm:$0xff]  ;;  %v2530_v56 = vpack.c.bf16 %v216_v50, %v210_v48  ;;  %v276_v46 = vld [vmem:[#allocation4 + $0x650] sm:$0xff]  ;;  %v289_v50 = vld [vmem:[#allocation4 + $0x6b8] sm:$0xff] }
  0xc2   :  { %v287_v48 = vld [vmem:[#allocation4 + $0x6a8] sm:$0xff]  ;;  %v324_v35 = vld [vmem:[#allocation4 + $0x7d0] sm:$0xff]  ;;  %v329_v36 = vld [vmem:[#allocation4 + $0x7f8] sm:$0xff] }
  0xc3   :  { %2255 = vmatpush1.bf16.msra.mxu1 %v2254_v59  ;;  %v226_v59 = vld [vmem:[#allocation4 + $0x4c0] sm:$0xff]  ;;  %v323_v23 = vld [vmem:[#allocation4 + $0x7c8] sm:$0xff] }
  0xc4   :  { %2511 = vmatpush1.bf16.msra.mxu0 %v2510_v16  ;;  %2257 = vmatprep.subr.bf16.mxu1 %v2256_v60  ;;  %v222_v16 = vld [vmem:[#allocation4 + $0x4a0] sm:$0xff]  ;;  %v2532_v60 = vpack.c.bf16 %v229_v54, %v223_v53  ;;  %v2278_v2 = vpack.c.bf16 %v226_v59, %v220_v58  ;;  %v2296_v53 = vpack.c.bf16 %v287_v48, %v281_v47  ;;  %v280_v54 = vld [vmem:[#allocation4 + $0x670] sm:$0xff]  ;;  %v293_v59 = vld [vmem:[#allocation4 + $0x6d8] sm:$0xff] }
  0xc5   :  { %2513 = vmatprep.subr.bf16.mxu0 %v2512_v0  ;;  %v235_v0 = vld [vmem:[#allocation4 + $0x508] sm:$0xff]  ;;  %v2534_v3 = vpack.c.bf16 %v228_v61, %v222_v16  ;;  %v288_v58 = vld [vmem:[#allocation4 + $0x6b0] sm:$0xff]  ;;  %v330_v47 = vld [vmem:[#allocation4 + $0x800] sm:$0xff] }
  0xc6   :  { %v299_v16 = vld [vmem:[#allocation4 + $0x708] sm:$0xff] }
  0xc7   :  { %2259 = vmatpush1.bf16.msra.mxu1 %v2258_v6  ;;  %v238_v6 = vld [vmem:[#allocation4 + $0x520] sm:$0xff]  ;;  %v295_v61 = vld [vmem:[#allocation4 + $0x6e8] sm:$0xff] }
  0xc8   :  { %2515 = vmatpush1.bf16.msra.mxu0 %v2514_v7  ;;  %2261 = vmatprep.subr.bf16.mxu1 %v2260_v8  ;;  %v234_v7 = vld [vmem:[#allocation4 + $0x500] sm:$0xff]  ;;  %v2536_v8 = vpack.c.bf16 %v241_v1, %v235_v0  ;;  %v2282_v14 = vpack.c.bf16 %v238_v6, %v232_v5  ;;  %v2300_v1 = vpack.c.bf16 %v299_v16, %v293_v59  ;;  %v300_v6 = vld [vmem:[#allocation4 + $0x710] sm:$0xff]  ;;  %v2845_v24 = vld [vmem:[#allocation2 + $0x88] sm:$0xff] }
  0xc9   :  { %2517 = vmatprep.subr.bf16.mxu0 %v2516_v12  ;;  %v247_v12 = vld [vmem:[#allocation4 + $0x568] sm:$0xff]  ;;  %v2538_v15 = vpack.c.bf16 %v240_v9, %v234_v7  ;;  %v2556_v5 = vpack.c.bf16 %v301_v62, %v295_v61  ;;  %v305_v7 = vld [vmem:[#allocation4 + $0x738] sm:$0xff]  ;;  %v346_v59 = vld [vmem:[#allocation4 + $0x880] sm:$0xff] }
  0xca   :  { %v2843_v9 = vld [vmem:[#allocation2 + $0x48] sm:$0xff]  ;;  %v342_v16 = vld [vmem:[#allocation4 + $0x860] sm:$0xff]  ;;  %v348_v61 = vld [vmem:[#allocation4 + $0x890] sm:$0xff] }
  0xcb   :  { %2263 = vmatpush1.bf16.msra.mxu1 %v2262_v19  ;;  %v250_v19 = vld [vmem:[#allocation4 + $0x580] sm:$0xff]  ;;  %v353_v62 = vld [vmem:[#allocation4 + $0x8b8] sm:$0xff] }
  0xcc   :  { %2519 = vmatpush1.bf16.msra.mxu0 %v2518_v20  ;;  %2265 = vmatprep.subr.bf16.mxu1 %v2264_v21  ;;  %v246_v20 = vld [vmem:[#allocation4 + $0x560] sm:$0xff]  ;;  %v2540_v21 = vpack.c.bf16 %v253_v13, %v247_v12  ;;  %v2286_v27 = vpack.c.bf16 %v250_v19, %v244_v18 }
  0xcd   :  { %2521 = vmatprep.subr.bf16.mxu0 %v2520_v25  ;;  %v259_v25 = vld [vmem:[#allocation4 + $0x5c8] sm:$0xff]  ;;  %v2542_v28 = vpack.c.bf16 %v252_v22, %v246_v20  ;;  %v2844_v12 = vld [vmem:[#allocation2 + $0x40] sm:$0xff]  ;;  %v2560_v20 = vpack.c.bf16 %v313_v11, %v307_v10  ;;  %v317_v22 = vld [vmem:[#allocation4 + $0x798] sm:$0xff] }
  0xce   :  { %v310_v18 = vld [vmem:[#allocation4 + $0x760] sm:$0xff]  ;;  %v365_v10 = vld [vmem:[#allocation4 + $0x918] sm:$0xff]  ;;  %v371_v11 = vld [vmem:[#allocation4 + $0x948] sm:$0xff] }
  0xcf   :  { %2267 = vmatpush1.bf16.msra.mxu1 %v2266_v31  ;;  %v262_v31 = vld [vmem:[#allocation4 + $0x5e0] sm:$0xff] }
  0xd0   :  { %2523 = vmatpush1.bf16.msra.mxu0 %v2522_v32  ;;  %2269 = vmatprep.subr.bf16.mxu1 %v2268_v33  ;;  %v258_v32 = vld [vmem:[#allocation4 + $0x5c0] sm:$0xff]  ;;  %v2544_v33 = vpack.c.bf16 %v265_v26, %v259_v25  ;;  %v2290_v39 = vpack.c.bf16 %v262_v31, %v256_v30  ;;  %v319_v25 = vld [vmem:[#allocation4 + $0x7a8] sm:$0xff]  ;;  %v325_v26 = vld [vmem:[#allocation4 + $0x7d8] sm:$0xff]  ;;  %v2308_v30 = vpack.c.bf16 %v323_v23, %v317_v22 }
  0xd1   :  { %2525 = vmatprep.subr.bf16.mxu0 %v2524_v37  ;;  %v271_v37 = vld [vmem:[#allocation4 + $0x628] sm:$0xff]  ;;  %v2546_v40 = vpack.c.bf16 %v264_v34, %v258_v32  ;;  %v306_v19 = vld [vmem:[#allocation4 + $0x740] sm:$0xff]  ;;  %v316_v31 = vld [vmem:[#allocation4 + $0x790] sm:$0xff]  ;;  %v2564_v34 = vpack.c.bf16 %v325_v26, %v319_v25 }
  0xd2   :  { %v322_v32 = vld [vmem:[#allocation4 + $0x7c0] sm:$0xff]  ;;  %v372_v22 = vld [vmem:[#allocation4 + $0x950] sm:$0xff]  ;;  %v377_v23 = vld [vmem:[#allocation4 + $0x978] sm:$0xff] }
  0xd3   :  { %2271 = vmatpush1.bf16.msra.mxu1 %v2270_v43  ;;  %v274_v43 = vld [vmem:[#allocation4 + $0x640] sm:$0xff]  ;;  %v379_v25 = vld [vmem:[#allocation4 + $0x988] sm:$0xff]  ;;  %v385_v26 = vld [vmem:[#allocation4 + $0x9b8] sm:$0xff] }
  0xd4   :  { %2527 = vmatpush1.bf16.msra.mxu0 %v2526_v44  ;;  %2273 = vmatprep.subr.bf16.mxu1 %v2272_v45  ;;  %v270_v44 = vld [vmem:[#allocation4 + $0x620] sm:$0xff]  ;;  %v2548_v45 = vpack.c.bf16 %v277_v38, %v271_v37  ;;  %v2294_v51 = vpack.c.bf16 %v274_v43, %v268_v42  ;;  %v335_v37 = vld [vmem:[#allocation4 + $0x828] sm:$0xff]  ;;  %v2310_v42 = vpack.c.bf16 %v322_v32, %v316_v31 }
  0xd5   :  { %2529 = vmatprep.subr.bf16.mxu0 %v2528_v49  ;;  %v283_v49 = vld [vmem:[#allocation4 + $0x688] sm:$0xff]  ;;  %v2550_v52 = vpack.c.bf16 %v276_v46, %v270_v44  ;;  %v2312_v44 = vpack.c.bf16 %v335_v37, %v329_v36  ;;  %v334_v46 = vld [vmem:[#allocation4 + $0x820] sm:$0xff] }
  0xd6   :  { %v2847_v38 = vld [vmem:[#allocation2 + $0xc8] sm:$0xff]  ;;  %v382_v31 = vld [vmem:[#allocation4 + $0x9a0] sm:$0xff] }
  0xd7   :  { %2275 = vmatpush1.bf16.msra.mxu1 %v2274_v55  ;;  %v286_v55 = vld [vmem:[#allocation4 + $0x6a0] sm:$0xff]  ;;  %v395_v36 = vld [vmem:[#allocation4 + $0xa08] sm:$0xff] }
  0xd8   :  { %2531 = vmatpush1.bf16.msra.mxu0 %v2530_v56  ;;  %2277 = vmatprep.subr.bf16.mxu1 %v2276_v57  ;;  %v282_v56 = vld [vmem:[#allocation4 + $0x680] sm:$0xff]  ;;  %v2552_v57 = vpack.c.bf16 %v289_v50, %v283_v49  ;;  %v2298_v63 = vpack.c.bf16 %v286_v55, %v280_v54  ;;  %v336_v49 = vld [vmem:[#allocation4 + $0x830] sm:$0xff]  ;;  %v341_v50 = vld [vmem:[#allocation4 + $0x858] sm:$0xff] }
  0xd9   :  { %2533 = vmatprep.subr.bf16.mxu0 %v2532_v60  ;;  %v2842_v60 = vld [vmem:[#allocation2] sm:$0xff]  ;;  %v2554_v0 = vpack.c.bf16 %v288_v58, %v282_v56  ;;  %v349_v54 = vld [vmem:[#allocation4 + $0x898] sm:$0xff]  ;;  %v2570_v56 = vpack.c.bf16 %v336_v49, %v330_v47  ;;  %v340_v58 = vld [vmem:[#allocation4 + $0x850] sm:$0xff] }
  0xda   :  { %v378_v32 = vld [vmem:[#allocation4 + $0x980] sm:$0xff]  ;;  %v391_v37 = vld [vmem:[#allocation4 + $0x9e8] sm:$0xff]  ;;  %v401_v47 = vld [vmem:[#allocation4 + $0xa38] sm:$0xff] }
  0xdb   :  { %2279 = vmatpush1.bf16.msra.mxu1 %v2278_v2  ;;  %v292_v2 = vld [vmem:[#allocation4 + $0x6d0] sm:$0xff]  ;;  %v403_v49 = vld [vmem:[#allocation4 + $0xa48] sm:$0xff] }
  0xdc   :  { %2535 = vmatpush1.bf16.msra.mxu0 %v2534_v3  ;;  %2281 = vmatprep.subr.bf16.mxu1 %v2280_v4  ;;  %v298_v3 = vld [vmem:[#allocation4 + $0x700] sm:$0xff] }
  0xdd   :  { %2537 = vmatprep.subr.bf16.mxu0 %v2536_v8  ;;  %v294_v4 = vld [vmem:[#allocation4 + $0x6e0] sm:$0xff]  ;;  %v311_v8 = vld [vmem:[#allocation4 + $0x768] sm:$0xff]  ;;  %v2302_v13 = vpack.c.bf16 %v298_v3, %v292_v2  ;;  %v2318_v2 = vpack.c.bf16 %v346_v59, %v340_v58  ;;  %v2574_v3 = vpack.c.bf16 %v348_v61, %v342_v16  ;;  %v408_v58 = vld [vmem:[#allocation4 + $0xa70] sm:$0xff] }
  0xde   :  { %v413_v59 = vld [vmem:[#allocation4 + $0xa98] sm:$0xff]  ;;  %v419_v16 = vld [vmem:[#allocation4 + $0xac8] sm:$0xff] }
  0xdf   :  { %2283 = vmatpush1.bf16.msra.mxu1 %v2282_v14  ;;  %v2558_v14 = vpack.c.bf16 %v300_v6, %v294_v4  ;;  %v358_v6 = vld [vmem:[#allocation4 + $0x8e0] sm:$0xff]  ;;  %v421_v61 = vld [vmem:[#allocation4 + $0xad8] sm:$0xff] }
  0xe0   :  { %2539 = vmatpush1.bf16.msra.mxu0 %v2538_v15  ;;  %2285 = vmatprep.subr.bf16.mxu1 %v2284_v17  ;;  %v2304_v15 = vpack.c.bf16 %v311_v8, %v305_v7  ;;  %v304_v17 = vld [vmem:[#allocation4 + $0x730] sm:$0xff]  ;;  %v354_v7 = vld [vmem:[#allocation4 + $0x8c0] sm:$0xff] }
  0xe1   :  { %2541 = vmatprep.subr.bf16.mxu0 %v2540_v21  ;;  %v312_v21 = vld [vmem:[#allocation4 + $0x770] sm:$0xff] }
  0xe3   :  { %2287 = vmatpush1.bf16.msra.mxu1 %v2286_v27  ;;  %v2846_v27 = vld [vmem:[#allocation2 + $0x80] sm:$0xff] }
  0xe4   :  { %2543 = vmatpush1.bf16.msra.mxu0 %v2542_v28  ;;  %2289 = vmatprep.subr.bf16.mxu1 %v2288_v29  ;;  %v2306_v28 = vpack.c.bf16 %v310_v18, %v304_v17  ;;  %v2562_v29 = vpack.c.bf16 %v312_v21, %v306_v19  ;;  %v2324_v17 = vpack.c.bf16 %v371_v11, %v365_v10  ;;  %v364_v18 = vld [vmem:[#allocation4 + $0x910] sm:$0xff]  ;;  %v370_v19 = vld [vmem:[#allocation4 + $0x940] sm:$0xff] }
  0xe5   :  { %2545 = vmatprep.subr.bf16.mxu0 %v2544_v33  ;;  %v318_v33 = vld [vmem:[#allocation4 + $0x7a0] sm:$0xff] }
  0xe6   :  { %v2566_v43 = vpack.c.bf16 %v324_v35, %v318_v33  ;;  %v2584_v33 = vpack.c.bf16 %v385_v26, %v379_v25  ;;  %v389_v35 = vld [vmem:[#allocation4 + $0x9d8] sm:$0xff]  ;;  %v436_v26 = vld [vmem:[#allocation4 + $0xb50] sm:$0xff] }
  0xe7   :  { %2291 = vmatpush1.bf16.msra.mxu1 %v2290_v39  ;;  %v331_v39 = vld [vmem:[#allocation4 + $0x808] sm:$0xff] }
  0xe8   :  { %2547 = vmatpush1.bf16.msra.mxu0 %v2546_v40  ;;  %2293 = vmatprep.subr.bf16.mxu1 %v2292_v41  ;;  %v337_v40 = vld [vmem:[#allocation4 + $0x838] sm:$0xff]  ;;  %v2848_v41 = vld [vmem:[#allocation2 + $0xc0] sm:$0xff] }
  0xe9   :  { %2549 = vmatprep.subr.bf16.mxu0 %v2548_v45  ;;  %v328_v45 = vld [vmem:[#allocation4 + $0x7f0] sm:$0xff]  ;;  %v2568_v48 = vpack.c.bf16 %v337_v40, %v331_v39 }
  0xea   :  { %1295 = vmatmul.mubr.f32.vlgmr.msra.gmra.mrb[8].mxu1 %v2842_v60  ;;  %v2314_v55 = vpack.c.bf16 %v334_v46, %v328_v45  ;;  %v396_v46 = vld [vmem:[#allocation4 + $0xa10] sm:$0xff] }
  0xeb   :  { %2295 = vmatpush1.bf16.msra.mxu1 %v2294_v51  ;;  %1651 = vmatmul.mubr.f32.vlgmr.msra.gmra.mrb[8].mxu0 %v2842_v60  ;;  %v347_v51 = vld [vmem:[#allocation4 + $0x888] sm:$0xff] }
  0xec   :  { %2551 = vmatpush1.bf16.msra.mxu0 %v2550_v52  ;;  %2297 = vmatprep.subr.bf16.mxu1 %v2296_v53  ;;  %v2849_v52 = vld [vmem:[#allocation2 + $0x18] sm:$0xff]  ;;  %v343_v53 = vld [vmem:[#allocation4 + $0x868] sm:$0xff] }
  0xed   :  { %2553 = vmatprep.subr.bf16.mxu0 %v2552_v57  ;;  %1300 = vmatprep.mubr.f32.mxu1 %v2843_v9  ;;  %v2316_v57 = vpack.c.bf16 %v347_v51, %v341_v50  ;;  %v2572_v60 = vpack.c.bf16 %v349_v54, %v343_v53  ;;  %v409_v50 = vld [vmem:[#allocation4 + $0xa78] sm:$0xff]  ;;  %v400_v54 = vld [vmem:[#allocation4 + $0xa30] sm:$0xff] }
  0xee   :  { %1656 = vmatprep.mubr.f32.mxu0 %v2843_v9  ;;  %1301 = vmatmul.mubr.f32.gmra.mrb[10].mxu1 %v2844_v12  ;;  %v360_v9 = vld [vmem:[#allocation4 + $0x8f0] sm:$0xff] }
  0xef   :  { %2299 = vmatpush1.bf16.msra.mxu1 %v2298_v63  ;;  %1657 = vmatmul.mubr.f32.gmra.mrb[10].mxu0 %v2844_v12  ;;  %v359_v63 = vld [vmem:[#allocation4 + $0x8e8] sm:$0xff] }
  0xf0   :  { %2555 = vmatpush1.bf16.msra.mxu0 %v2554_v0  ;;  %2301 = vmatprep.subr.bf16.mxu1 %v2300_v1  ;;  %v355_v0 = vld [vmem:[#allocation4 + $0x8c8] sm:$0xff]  ;;  %v361_v1 = vld [vmem:[#allocation4 + $0x8f8] sm:$0xff]  ;;  %v2320_v4 = vpack.c.bf16 %v359_v63, %v353_v62 }
  0xf1   :  { %2557 = vmatprep.subr.bf16.mxu0 %v2556_v5  ;;  %1306 = vmatprep.mubr.f32.mxu1 %v2845_v24  ;;  %v352_v5 = vld [vmem:[#allocation4 + $0x8b0] sm:$0xff]  ;;  %v2576_v8 = vpack.c.bf16 %v361_v1, %v355_v0  ;;  %v367_v12 = vld [vmem:[#allocation4 + $0x928] sm:$0xff]  ;;  %v2340_v0 = vpack.c.bf16 %v419_v16, %v413_v59 }
  0xf2   :  { %1662 = vmatprep.mubr.f32.mxu0 %v2845_v24  ;;  %1307 = vmatmul.mubr.f32.gmra.mrb[12].mxu1 %v2846_v27  ;;  %v383_v24 = vld [vmem:[#allocation4 + $0x9a8] sm:$0xff]  ;;  %v412_v1 = vld [vmem:[#allocation4 + $0xa90] sm:$0xff] }
  0xf3   :  { %2303 = vmatpush1.bf16.msra.mxu1 %v2302_v13  ;;  %1663 = vmatmul.mubr.f32.gmra.mrb[12].mxu0 %v2846_v27  ;;  %v373_v13 = vld [vmem:[#allocation4 + $0x958] sm:$0xff]  ;;  %v2326_v27 = vpack.c.bf16 %v370_v19, %v364_v18  ;;  %v432_v18 = vld [vmem:[#allocation4 + $0xb30] sm:$0xff] }
  0xf4   :  { %2559 = vmatpush1.bf16.msra.mxu0 %v2558_v14  ;;  %2305 = vmatprep.subr.bf16.mxu1 %v2304_v15  ;;  %v2322_v14 = vpack.c.bf16 %v358_v6, %v352_v5  ;;  %v2578_v15 = vpack.c.bf16 %v360_v9, %v354_v7  ;;  %v2580_v21 = vpack.c.bf16 %v373_v13, %v367_v12  ;;  %v420_v5 = vld [vmem:[#allocation4 + $0xad0] sm:$0xff]  ;;  %v425_v6 = vld [vmem:[#allocation4 + $0xaf8] sm:$0xff]  ;;  %v431_v7 = vld [vmem:[#allocation4 + $0xb28] sm:$0xff] }
  0xf5   :  { %2561 = vmatprep.subr.bf16.mxu0 %v2560_v20  ;;  %1312 = vmatprep.mubr.f32.mxu1 %v2847_v38  ;;  %v366_v20 = vld [vmem:[#allocation4 + $0x920] sm:$0xff]  ;;  %v433_v9 = vld [vmem:[#allocation4 + $0xb38] sm:$0xff]  ;;  %v2344_v12 = vpack.c.bf16 %v431_v7, %v425_v6  ;;  %v424_v13 = vld [vmem:[#allocation4 + $0xaf0] sm:$0xff] }
  0xf6   :  { %1668 = vmatprep.mubr.f32.mxu0 %v2847_v38  ;;  %1313 = vmatmul.mubr.f32.gmra.mrb[14].mxu1 %v2848_v41  ;;  %v397_v38 = vld [vmem:[#allocation4 + $0xa18] sm:$0xff] }
  0xf7   :  { %2307 = vmatpush1.bf16.msra.mxu1 %v2306_v28  ;;  %1669 = vmatmul.mubr.f32.gmra.mrb[14].mxu0 %v2848_v41  ;;  %v2582_v28 = vpack.c.bf16 %v372_v22, %v366_v20  ;;  %v2332_v41 = vpack.c.bf16 %v395_v36, %v389_v35  ;;  %v2588_v45 = vpack.c.bf16 %v397_v38, %v391_v37  ;;  %v437_v19 = vld [vmem:[#allocation4 + $0xb58] sm:$0xff]  ;;  %v443_v20 = vld [vmem:[#allocation4 + $0xb88] sm:$0xff]  ;;  %v448_v38 = vld [vmem:[#allocation4 + $0xbb0] sm:$0xff] }
  0xf8   :  { %2563 = vmatpush1.bf16.msra.mxu0 %v2562_v29  ;;  %2309 = vmatprep.subr.bf16.mxu1 %v2308_v30  ;;  %v2328_v29 = vpack.c.bf16 %v383_v24, %v377_v23  ;;  %v376_v30 = vld [vmem:[#allocation4 + $0x970] sm:$0xff]  ;;  %v445_v22 = vld [vmem:[#allocation4 + $0xb98] sm:$0xff]  ;;  %v2348_v25 = vpack.c.bf16 %v443_v20, %v437_v19  ;;  %v499_v19 = vld [vmem:[#allocation4 + $0xd48] sm:$0xff] }
  0xf9   :  { %2565 = vmatprep.subr.bf16.mxu0 %v2564_v34  ;;  %1383 = vmatprep.mubr.f32.mxu1 %v2849_v52  ;;  %v384_v34 = vld [vmem:[#allocation4 + $0x9b0] sm:$0xff]  ;;  %v2330_v39 = vpack.c.bf16 %v382_v31, %v376_v30  ;;  %v449_v31 = vld [vmem:[#allocation4 + $0xbb8] sm:$0xff] }
  0xfa   :  { %1739 = vmatprep.mubr.f32.mxu0 %v2849_v52  ;;  %v2586_v40 = vpack.c.bf16 %v384_v34, %v378_v32  ;;  %v444_v30 = vld [vmem:[#allocation4 + $0xb90] sm:$0xff]  ;;  %v455_v32 = vld [vmem:[#allocation4 + $0xbe8] sm:$0xff]  ;;  %v457_v34 = vld [vmem:[#allocation4 + $0xbf8] sm:$0xff] }
  0xfb   :  { %2311 = vmatpush1.bf16.msra.mxu1 %v2310_v42  ;;  %v388_v42 = vld [vmem:[#allocation4 + $0x9d0] sm:$0xff]  ;;  %v2352_v37 = vpack.c.bf16 %v455_v32, %v449_v31  ;;  %v493_v6 = vld [vmem:[#allocation4 + $0xd18] sm:$0xff]  ;;  %v515_v31 = vld [vmem:[#allocation4 + $0xdc8] sm:$0xff] }
  0xfc   :  { %2567 = vmatpush1.bf16.msra.mxu0 %v2566_v43  ;;  %2313 = vmatprep.subr.bf16.mxu1 %v2312_v44  ;;  %v394_v43 = vld [vmem:[#allocation4 + $0xa00] sm:$0xff]  ;;  %v505_v20 = vld [vmem:[#allocation4 + $0xd78] sm:$0xff] }
  0xfd   :  { %2569 = vmatprep.subr.bf16.mxu0 %v2568_v48  ;;  %v390_v44 = vld [vmem:[#allocation4 + $0x9e0] sm:$0xff]  ;;  %v407_v48 = vld [vmem:[#allocation4 + $0xa68] sm:$0xff]  ;;  %v2334_v51 = vpack.c.bf16 %v394_v43, %v388_v42  ;;  %v456_v42 = vld [vmem:[#allocation4 + $0xbf0] sm:$0xff] }
  0xfe   :  { %v2590_v52 = vpack.c.bf16 %v396_v46, %v390_v44  ;;  %v2336_v53 = vpack.c.bf16 %v407_v48, %v401_v47  ;;  %v461_v43 = vld [vmem:[#allocation4 + $0xc18] sm:$0xff]  ;;  %v467_v44 = vld [vmem:[#allocation4 + $0xc48] sm:$0xff] }
  0xff   :  { %2315 = vmatpush1.bf16.msra.mxu1 %v2314_v55  ;;  %v406_v55 = vld [vmem:[#allocation4 + $0xa60] sm:$0xff]  ;;  %v469_v46 = vld [vmem:[#allocation4 + $0xc58] sm:$0xff] }
 0x100   :  { %2571 = vmatpush1.bf16.msra.mxu0 %v2570_v56  ;;  %2317 = vmatprep.subr.bf16.mxu1 %v2316_v57  ;;  %v402_v56 = vld [vmem:[#allocation4 + $0xa40] sm:$0xff]  ;;  %v2592_v57 = vpack.c.bf16 %v409_v50, %v403_v49  ;;  %v2338_v62 = vpack.c.bf16 %v406_v55, %v400_v54  ;;  %v2356_v49 = vpack.c.bf16 %v467_v44, %v461_v43  ;;  %v460_v50 = vld [vmem:[#allocation4 + $0xc10] sm:$0xff]  ;;  %v473_v55 = vld [vmem:[#allocation4 + $0xc78] sm:$0xff] }
 0x101   :  { %2573 = vmatprep.subr.bf16.mxu0 %v2572_v60  ;;  %v415_v60 = vld [vmem:[#allocation4 + $0xaa8] sm:$0xff]  ;;  %v2594_v63 = vpack.c.bf16 %v408_v58, %v402_v56  ;;  %v468_v54 = vld [vmem:[#allocation4 + $0xc50] sm:$0xff]  ;;  %v481_v58 = vld [vmem:[#allocation4 + $0xcb8] sm:$0xff] }
 0x102   :  { %v479_v56 = vld [vmem:[#allocation4 + $0xca8] sm:$0xff]  ;;  %v2853_v32 = vld [vmem:[#allocation2 + $0x98] sm:$0xff]  ;;  %v516_v43 = vld [vmem:[#allocation4 + $0xdd0] sm:$0xff] }
 0x103   :  { %2319 = vmatpush1.bf16.msra.mxu1 %v2318_v2  ;;  %v418_v2 = vld [vmem:[#allocation4 + $0xac0] sm:$0xff]  ;;  %v521_v44 = vld [vmem:[#allocation4 + $0xdf8] sm:$0xff] }
 0x104   :  { %2575 = vmatpush1.bf16.msra.mxu0 %v2574_v3  ;;  %2321 = vmatprep.subr.bf16.mxu1 %v2320_v4  ;;  %v414_v3 = vld [vmem:[#allocation4 + $0xaa0] sm:$0xff]  ;;  %v2596_v4 = vpack.c.bf16 %v421_v61, %v415_v60  ;;  %v2342_v10 = vpack.c.bf16 %v418_v2, %v412_v1  ;;  %v2360_v60 = vpack.c.bf16 %v479_v56, %v473_v55  ;;  %v472_v61 = vld [vmem:[#allocation4 + $0xc70] sm:$0xff]  ;;  %v485_v2 = vld [vmem:[#allocation4 + $0xcd8] sm:$0xff] }
 0x105   :  { %2577 = vmatprep.subr.bf16.mxu0 %v2576_v8  ;;  %v427_v8 = vld [vmem:[#allocation4 + $0xb08] sm:$0xff]  ;;  %v2598_v11 = vpack.c.bf16 %v420_v5, %v414_v3  ;;  %v480_v1 = vld [vmem:[#allocation4 + $0xcb0] sm:$0xff]  ;;  %v522_v55 = vld [vmem:[#allocation4 + $0xe00] sm:$0xff] }
 0x106   :  { %v491_v3 = vld [vmem:[#allocation4 + $0xd08] sm:$0xff] }
 0x107   :  { %2323 = vmatpush1.bf16.msra.mxu1 %v2322_v14  ;;  %v430_v14 = vld [vmem:[#allocation4 + $0xb20] sm:$0xff]  ;;  %v487_v5 = vld [vmem:[#allocation4 + $0xce8] sm:$0xff] }
 0x108   :  { %2579 = vmatpush1.bf16.msra.mxu0 %v2578_v15  ;;  %2325 = vmatprep.subr.bf16.mxu1 %v2324_v17  ;;  %v426_v15 = vld [vmem:[#allocation4 + $0xb00] sm:$0xff]  ;;  %v2600_v17 = vpack.c.bf16 %v433_v9, %v427_v8  ;;  %v2346_v23 = vpack.c.bf16 %v430_v14, %v424_v13  ;;  %v2364_v9 = vpack.c.bf16 %v491_v3, %v485_v2  ;;  %v492_v14 = vld [vmem:[#allocation4 + $0xd10] sm:$0xff] }
 0x109   :  { %2581 = vmatprep.subr.bf16.mxu0 %v2580_v21  ;;  %v439_v21 = vld [vmem:[#allocation4 + $0xb68] sm:$0xff]  ;;  %v2602_v24 = vpack.c.bf16 %v432_v18, %v426_v15  ;;  %v2620_v13 = vpack.c.bf16 %v493_v6, %v487_v5  ;;  %v497_v15 = vld [vmem:[#allocation4 + $0xd38] sm:$0xff]  ;;  %v538_v2 = vld [vmem:[#allocation4 + $0xe80] sm:$0xff] }
 0x10a   :  { %v2851_v18 = vld [vmem:[#allocation2 + $0x58] sm:$0xff]  ;;  %v534_v3 = vld [vmem:[#allocation4 + $0xe60] sm:$0xff]  ;;  %v540_v5 = vld [vmem:[#allocation4 + $0xe90] sm:$0xff] }
 0x10b   :  { %2327 = vmatpush1.bf16.msra.mxu1 %v2326_v27  ;;  %v442_v27 = vld [vmem:[#allocation4 + $0xb80] sm:$0xff]  ;;  %v545_v6 = vld [vmem:[#allocation4 + $0xeb8] sm:$0xff] }
 0x10c   :  { %2583 = vmatpush1.bf16.msra.mxu0 %v2582_v28  ;;  %2329 = vmatprep.subr.bf16.mxu1 %v2328_v29  ;;  %v438_v28 = vld [vmem:[#allocation4 + $0xb60] sm:$0xff]  ;;  %v2604_v29 = vpack.c.bf16 %v445_v22, %v439_v21  ;;  %v2350_v35 = vpack.c.bf16 %v442_v27, %v436_v26  ;;  %v2852_v21 = vld [vmem:[#allocation2 + $0x50] sm:$0xff] }
 0x10d   :  { %2585 = vmatprep.subr.bf16.mxu0 %v2584_v33  ;;  %v451_v33 = vld [vmem:[#allocation4 + $0xbc8] sm:$0xff]  ;;  %v2606_v36 = vpack.c.bf16 %v444_v30, %v438_v28  ;;  %v502_v26 = vld [vmem:[#allocation4 + $0xd60] sm:$0xff]  ;;  %v2624_v28 = vpack.c.bf16 %v505_v20, %v499_v19  ;;  %v509_v30 = vld [vmem:[#allocation4 + $0xd98] sm:$0xff] }
 0x10e   :  { %v498_v27 = vld [vmem:[#allocation4 + $0xd40] sm:$0xff]  ;;  %v557_v19 = vld [vmem:[#allocation4 + $0xf18] sm:$0xff]  ;;  %v563_v20 = vld [vmem:[#allocation4 + $0xf48] sm:$0xff] }
 0x10f   :  { %2331 = vmatpush1.bf16.msra.mxu1 %v2330_v39  ;;  %v454_v39 = vld [vmem:[#allocation4 + $0xbe0] sm:$0xff] }
 0x110   :  { %2587 = vmatpush1.bf16.msra.mxu0 %v2586_v40  ;;  %2333 = vmatprep.subr.bf16.mxu1 %v2332_v41  ;;  %v450_v40 = vld [vmem:[#allocation4 + $0xbc0] sm:$0xff]  ;;  %v2608_v41 = vpack.c.bf16 %v457_v34, %v451_v33  ;;  %v2354_v47 = vpack.c.bf16 %v454_v39, %v448_v38  ;;  %v511_v33 = vld [vmem:[#allocation4 + $0xda8] sm:$0xff]  ;;  %v517_v34 = vld [vmem:[#allocation4 + $0xdd8] sm:$0xff]  ;;  %v2372_v38 = vpack.c.bf16 %v515_v31, %v509_v30 }
 0x111   :  { %2589 = vmatprep.subr.bf16.mxu0 %v2588_v45  ;;  %v463_v45 = vld [vmem:[#allocation4 + $0xc28] sm:$0xff]  ;;  %v2610_v48 = vpack.c.bf16 %v456_v42, %v450_v40  ;;  %v508_v39 = vld [vmem:[#allocation4 + $0xd90] sm:$0xff]  ;;  %v514_v40 = vld [vmem:[#allocation4 + $0xdc0] sm:$0xff]  ;;  %v2628_v42 = vpack.c.bf16 %v517_v34, %v511_v33 }
 0x112   :  { %v564_v30 = vld [vmem:[#allocation4 + $0xf50] sm:$0xff]  ;;  %v569_v31 = vld [vmem:[#allocation4 + $0xf78] sm:$0xff]  ;;  %v571_v33 = vld [vmem:[#allocation4 + $0xf88] sm:$0xff] }
 0x113   :  { %2335 = vmatpush1.bf16.msra.mxu1 %v2334_v51  ;;  %v466_v51 = vld [vmem:[#allocation4 + $0xc40] sm:$0xff]  ;;  %v577_v34 = vld [vmem:[#allocation4 + $0xfb8] sm:$0xff] }
 0x114   :  { %2591 = vmatpush1.bf16.msra.mxu0 %v2590_v52  ;;  %2337 = vmatprep.subr.bf16.mxu1 %v2336_v53  ;;  %v462_v52 = vld [vmem:[#allocation4 + $0xc20] sm:$0xff]  ;;  %v2612_v53 = vpack.c.bf16 %v469_v46, %v463_v45  ;;  %v2358_v59 = vpack.c.bf16 %v466_v51, %v460_v50  ;;  %v527_v45 = vld [vmem:[#allocation4 + $0xe28] sm:$0xff]  ;;  %v2855_v46 = vld [vmem:[#allocation2 + $0xd8] sm:$0xff]  ;;  %v2374_v50 = vpack.c.bf16 %v514_v40, %v508_v39 }
 0x115   :  { %2593 = vmatprep.subr.bf16.mxu0 %v2592_v57  ;;  %v475_v57 = vld [vmem:[#allocation4 + $0xc88] sm:$0xff]  ;;  %v2614_v16 = vpack.c.bf16 %v468_v54, %v462_v52  ;;  %v2376_v52 = vpack.c.bf16 %v527_v45, %v521_v44  ;;  %v526_v54 = vld [vmem:[#allocation4 + $0xe20] sm:$0xff] }
 0x116   :  { %v574_v39 = vld [vmem:[#allocation4 + $0xfa0] sm:$0xff]  ;;  %v587_v44 = vld [vmem:[#allocation4 + $0x1008] sm:$0xff] }
 0x117   :  { %2339 = vmatpush1.bf16.msra.mxu1 %v2338_v62  ;;  %v478_v62 = vld [vmem:[#allocation4 + $0xca0] sm:$0xff]  ;;  %v583_v45 = vld [vmem:[#allocation4 + $0xfe8] sm:$0xff] }
 0x118   :  { %2595 = vmatpush1.bf16.msra.mxu0 %v2594_v63  ;;  %2341 = vmatprep.subr.bf16.mxu1 %v2340_v0  ;;  %v474_v63 = vld [vmem:[#allocation4 + $0xc80] sm:$0xff]  ;;  %v2616_v0 = vpack.c.bf16 %v481_v58, %v475_v57  ;;  %v2362_v7 = vpack.c.bf16 %v478_v62, %v472_v61  ;;  %v528_v57 = vld [vmem:[#allocation4 + $0xe30] sm:$0xff]  ;;  %v533_v58 = vld [vmem:[#allocation4 + $0xe58] sm:$0xff] }
 0x119   :  { %2597 = vmatprep.subr.bf16.mxu0 %v2596_v4  ;;  %v2850_v4 = vld [vmem:[#allocation2 + $0x10] sm:$0xff]  ;;  %v2618_v8 = vpack.c.bf16 %v480_v1, %v474_v63  ;;  %v541_v61 = vld [vmem:[#allocation4 + $0xe98] sm:$0xff]  ;;  %v2634_v63 = vpack.c.bf16 %v528_v57, %v522_v55  ;;  %v570_v40 = vld [vmem:[#allocation4 + $0xf80] sm:$0xff] }
 0x11a   :  { %v532_v1 = vld [vmem:[#allocation4 + $0xe50] sm:$0xff]  ;;  %v593_v55 = vld [vmem:[#allocation4 + $0x1038] sm:$0xff]  ;;  %v595_v57 = vld [vmem:[#allocation4 + $0x1048] sm:$0xff] }
 0x11b   :  { %2343 = vmatpush1.bf16.msra.mxu1 %v2342_v10  ;;  %v484_v10 = vld [vmem:[#allocation4 + $0xcd0] sm:$0xff] }
 0x11c   :  { %2599 = vmatpush1.bf16.msra.mxu0 %v2598_v11  ;;  %2345 = vmatprep.subr.bf16.mxu1 %v2344_v12  ;;  %v490_v11 = vld [vmem:[#allocation4 + $0xd00] sm:$0xff] }
 0x11d   :  { %2601 = vmatprep.subr.bf16.mxu0 %v2600_v17  ;;  %v486_v12 = vld [vmem:[#allocation4 + $0xce0] sm:$0xff]  ;;  %v503_v17 = vld [vmem:[#allocation4 + $0xd68] sm:$0xff]  ;;  %v2366_v22 = vpack.c.bf16 %v490_v11, %v484_v10  ;;  %v2382_v10 = vpack.c.bf16 %v538_v2, %v532_v1  ;;  %v2638_v11 = vpack.c.bf16 %v540_v5, %v534_v3  ;;  %v600_v1 = vld [vmem:[#allocation4 + $0x1070] sm:$0xff] }
 0x11e   :  { %v605_v2 = vld [vmem:[#allocation4 + $0x1098] sm:$0xff]  ;;  %v611_v3 = vld [vmem:[#allocation4 + $0x10c8] sm:$0xff] }
 0x11f   :  { %2347 = vmatpush1.bf16.msra.mxu1 %v2346_v23  ;;  %v2622_v23 = vpack.c.bf16 %v492_v14, %v486_v12  ;;  %v550_v14 = vld [vmem:[#allocation4 + $0xee0] sm:$0xff]  ;;  %v613_v5 = vld [vmem:[#allocation4 + $0x10d8] sm:$0xff] }
 0x120   :  { %2603 = vmatpush1.bf16.msra.mxu0 %v2602_v24  ;;  %2349 = vmatprep.subr.bf16.mxu1 %v2348_v25  ;;  %v2368_v24 = vpack.c.bf16 %v503_v17, %v497_v15  ;;  %v496_v25 = vld [vmem:[#allocation4 + $0xd30] sm:$0xff]  ;;  %v546_v15 = vld [vmem:[#allocation4 + $0xec0] sm:$0xff] }
 0x121   :  { %2605 = vmatprep.subr.bf16.mxu0 %v2604_v29  ;;  %v504_v29 = vld [vmem:[#allocation4 + $0xd70] sm:$0xff] }
 0x123   :  { %2351 = vmatpush1.bf16.msra.mxu1 %v2350_v35  ;;  %v2854_v35 = vld [vmem:[#allocation2 + $0x90] sm:$0xff] }
 0x124   :  { %2607 = vmatpush1.bf16.msra.mxu0 %v2606_v36  ;;  %2353 = vmatprep.subr.bf16.mxu1 %v2352_v37  ;;  %v2370_v36 = vpack.c.bf16 %v502_v26, %v496_v25  ;;  %v2626_v37 = vpack.c.bf16 %v504_v29, %v498_v27  ;;  %v2388_v25 = vpack.c.bf16 %v563_v20, %v557_v19  ;;  %v556_v26 = vld [vmem:[#allocation4 + $0xf10] sm:$0xff]  ;;  %v562_v27 = vld [vmem:[#allocation4 + $0xf40] sm:$0xff] }
 0x125   :  { %2609 = vmatprep.subr.bf16.mxu0 %v2608_v41  ;;  %v510_v41 = vld [vmem:[#allocation4 + $0xda0] sm:$0xff] }
 0x126   :  { %v2630_v51 = vpack.c.bf16 %v516_v43, %v510_v41  ;;  %v2648_v41 = vpack.c.bf16 %v577_v34, %v571_v33  ;;  %v581_v43 = vld [vmem:[#allocation4 + $0xfd8] sm:$0xff]  ;;  %v628_v34 = vld [vmem:[#allocation4 + $0x1150] sm:$0xff] }
 0x127   :  { %2355 = vmatpush1.bf16.msra.mxu1 %v2354_v47  ;;  %v523_v47 = vld [vmem:[#allocation4 + $0xe08] sm:$0xff] }
 0x128   :  { %2611 = vmatpush1.bf16.msra.mxu0 %v2610_v48  ;;  %2357 = vmatprep.subr.bf16.mxu1 %v2356_v49  ;;  %v529_v48 = vld [vmem:[#allocation4 + $0xe38] sm:$0xff]  ;;  %v2856_v49 = vld [vmem:[#allocation2 + $0xd0] sm:$0xff] }
 0x129   :  { %2613 = vmatprep.subr.bf16.mxu0 %v2612_v53  ;;  %v520_v53 = vld [vmem:[#allocation4 + $0xdf0] sm:$0xff]  ;;  %v2632_v56 = vpack.c.bf16 %v529_v48, %v523_v47 }
 0x12a   :  { %1384 = vmatmul.mubr.f32.vlgmr.msra.gmra.mrb[8].mxu1 %v2850_v4  ;;  %v2378_v62 = vpack.c.bf16 %v526_v54, %v520_v53  ;;  %v588_v54 = vld [vmem:[#allocation4 + $0x1010] sm:$0xff] }
 0x12b   :  { %2359 = vmatpush1.bf16.msra.mxu1 %v2358_v59  ;;  %1740 = vmatmul.mubr.f32.vlgmr.msra.gmra.mrb[8].mxu0 %v2850_v4  ;;  %v539_v59 = vld [vmem:[#allocation4 + $0xe88] sm:$0xff] }
 0x12c   :  { %2615 = vmatpush1.bf16.msra.mxu0 %v2614_v16  ;;  %2361 = vmatprep.subr.bf16.mxu1 %v2360_v60  ;;  %v2857_v16 = vld [vmem:[#allocation2 + $0x28] sm:$0xff] }
 0x12d   :  { %2617 = vmatprep.subr.bf16.mxu0 %v2616_v0  ;;  %1389 = vmatprep.mubr.f32.mxu1 %v2851_v18  ;;  %v535_v60 = vld [vmem:[#allocation4 + $0xe68] sm:$0xff]  ;;  %v2380_v0 = vpack.c.bf16 %v539_v59, %v533_v58  ;;  %v601_v58 = vld [vmem:[#allocation4 + $0x1078] sm:$0xff] }
 0x12e   :  { %1745 = vmatprep.mubr.f32.mxu0 %v2851_v18  ;;  %1390 = vmatmul.mubr.f32.gmra.mrb[10].mxu1 %v2852_v21  ;;  %v2636_v4 = vpack.c.bf16 %v541_v61, %v535_v60  ;;  %v552_v18 = vld [vmem:[#allocation4 + $0xef0] sm:$0xff] }
 0x12f   :  { %2363 = vmatpush1.bf16.msra.mxu1 %v2362_v7  ;;  %1746 = vmatmul.mubr.f32.gmra.mrb[10].mxu0 %v2852_v21  ;;  %v551_v7 = vld [vmem:[#allocation4 + $0xee8] sm:$0xff]  ;;  %v592_v61 = vld [vmem:[#allocation4 + $0x1030] sm:$0xff] }
 0x130   :  { %2619 = vmatpush1.bf16.msra.mxu0 %v2618_v8  ;;  %2365 = vmatprep.subr.bf16.mxu1 %v2364_v9  ;;  %v547_v8 = vld [vmem:[#allocation4 + $0xec8] sm:$0xff]  ;;  %v553_v9 = vld [vmem:[#allocation4 + $0xef8] sm:$0xff]  ;;  %v2384_v12 = vpack.c.bf16 %v551_v7, %v545_v6 }
 0x131   :  { %2621 = vmatprep.subr.bf16.mxu0 %v2620_v13  ;;  %1395 = vmatprep.mubr.f32.mxu1 %v2853_v32  ;;  %v544_v13 = vld [vmem:[#allocation4 + $0xeb0] sm:$0xff]  ;;  %v2640_v17 = vpack.c.bf16 %v553_v9, %v547_v8  ;;  %v559_v21 = vld [vmem:[#allocation4 + $0xf28] sm:$0xff]  ;;  %v2404_v8 = vpack.c.bf16 %v611_v3, %v605_v2 }
 0x132   :  { %1751 = vmatprep.mubr.f32.mxu0 %v2853_v32  ;;  %1396 = vmatmul.mubr.f32.gmra.mrb[12].mxu1 %v2854_v35  ;;  %v575_v32 = vld [vmem:[#allocation4 + $0xfa8] sm:$0xff]  ;;  %v604_v9 = vld [vmem:[#allocation4 + $0x1090] sm:$0xff] }
 0x133   :  { %2367 = vmatpush1.bf16.msra.mxu1 %v2366_v22  ;;  %1752 = vmatmul.mubr.f32.gmra.mrb[12].mxu0 %v2854_v35  ;;  %v565_v22 = vld [vmem:[#allocation4 + $0xf58] sm:$0xff]  ;;  %v2390_v35 = vpack.c.bf16 %v562_v27, %v556_v26  ;;  %v624_v26 = vld [vmem:[#allocation4 + $0x1130] sm:$0xff] }
 0x134   :  { %2623 = vmatpush1.bf16.msra.mxu0 %v2622_v23  ;;  %2369 = vmatprep.subr.bf16.mxu1 %v2368_v24  ;;  %v2386_v23 = vpack.c.bf16 %v550_v14, %v544_v13  ;;  %v2642_v24 = vpack.c.bf16 %v552_v18, %v546_v15  ;;  %v2644_v29 = vpack.c.bf16 %v565_v22, %v559_v21  ;;  %v612_v13 = vld [vmem:[#allocation4 + $0x10d0] sm:$0xff]  ;;  %v617_v14 = vld [vmem:[#allocation4 + $0x10f8] sm:$0xff]  ;;  %v623_v15 = vld [vmem:[#allocation4 + $0x1128] sm:$0xff] }
 0x135   :  { %2625 = vmatprep.subr.bf16.mxu0 %v2624_v28  ;;  %1401 = vmatprep.mubr.f32.mxu1 %v2855_v46  ;;  %v558_v28 = vld [vmem:[#allocation4 + $0xf20] sm:$0xff]  ;;  %v625_v18 = vld [vmem:[#allocation4 + $0x1138] sm:$0xff]  ;;  %v2408_v21 = vpack.c.bf16 %v623_v15, %v617_v14  ;;  %v616_v22 = vld [vmem:[#allocation4 + $0x10f0] sm:$0xff] }
 0x136   :  { %1757 = vmatprep.mubr.f32.mxu0 %v2855_v46  ;;  %1402 = vmatmul.mubr.f32.gmra.mrb[14].mxu1 %v2856_v49  ;;  %v589_v46 = vld [vmem:[#allocation4 + $0x1018] sm:$0xff] }
 0x137   :  { %2371 = vmatpush1.bf16.msra.mxu1 %v2370_v36  ;;  %1758 = vmatmul.mubr.f32.gmra.mrb[14].mxu0 %v2856_v49  ;;  %v2646_v36 = vpack.c.bf16 %v564_v30, %v558_v28  ;;  %v2396_v49 = vpack.c.bf16 %v587_v44, %v581_v43  ;;  %v2652_v53 = vpack.c.bf16 %v589_v46, %v583_v45  ;;  %v629_v27 = vld [vmem:[#allocation4 + $0x1158] sm:$0xff]  ;;  %v635_v28 = vld [vmem:[#allocation4 + $0x1188] sm:$0xff]  ;;  %v640_v46 = vld [vmem:[#allocation4 + $0x11b0] sm:$0xff] }
 0x138   :  { %2627 = vmatpush1.bf16.msra.mxu0 %v2626_v37  ;;  %2373 = vmatprep.subr.bf16.mxu1 %v2372_v38  ;;  %v2392_v37 = vpack.c.bf16 %v575_v32, %v569_v31  ;;  %v568_v38 = vld [vmem:[#allocation4 + $0xf70] sm:$0xff]  ;;  %v637_v30 = vld [vmem:[#allocation4 + $0x1198] sm:$0xff]  ;;  %v2412_v33 = vpack.c.bf16 %v635_v28, %v629_v27  ;;  %v691_v27 = vld [vmem:[#allocation4 + $0x1348] sm:$0xff] }
 0x139   :  { %2629 = vmatprep.subr.bf16.mxu0 %v2628_v42  ;;  %1472 = vmatprep.mubr.f32.mxu1 %v2857_v16  ;;  %v576_v42 = vld [vmem:[#allocation4 + $0xfb0] sm:$0xff]  ;;  %v2394_v47 = vpack.c.bf16 %v574_v39, %v568_v38  ;;  %v641_v39 = vld [vmem:[#allocation4 + $0x11b8] sm:$0xff] }
 0x13a   :  { %1828 = vmatprep.mubr.f32.mxu0 %v2857_v16  ;;  %v2650_v48 = vpack.c.bf16 %v576_v42, %v570_v40  ;;  %v636_v38 = vld [vmem:[#allocation4 + $0x1190] sm:$0xff]  ;;  %v647_v40 = vld [vmem:[#allocation4 + $0x11e8] sm:$0xff]  ;;  %v649_v42 = vld [vmem:[#allocation4 + $0x11f8] sm:$0xff] }
 0x13b   :  { %2375 = vmatpush1.bf16.msra.mxu1 %v2374_v50  ;;  %v580_v50 = vld [vmem:[#allocation4 + $0xfd0] sm:$0xff]  ;;  %v2416_v45 = vpack.c.bf16 %v647_v40, %v641_v39  ;;  %v685_v14 = vld [vmem:[#allocation4 + $0x1318] sm:$0xff]  ;;  %v707_v40 = vld [vmem:[#allocation4 + $0x13c8] sm:$0xff] }
 0x13c   :  { %2631 = vmatpush1.bf16.msra.mxu0 %v2630_v51  ;;  %2377 = vmatprep.subr.bf16.mxu1 %v2376_v52  ;;  %v586_v51 = vld [vmem:[#allocation4 + $0x1000] sm:$0xff]  ;;  %v697_v28 = vld [vmem:[#allocation4 + $0x1378] sm:$0xff] }
 0x13d   :  { %2633 = vmatprep.subr.bf16.mxu0 %v2632_v56  ;;  %v582_v52 = vld [vmem:[#allocation4 + $0xfe0] sm:$0xff]  ;;  %v599_v56 = vld [vmem:[#allocation4 + $0x1068] sm:$0xff]  ;;  %v2398_v59 = vpack.c.bf16 %v586_v51, %v580_v50  ;;  %v648_v50 = vld [vmem:[#allocation4 + $0x11f0] sm:$0xff] }
 0x13e   :  { %v2654_v16 = vpack.c.bf16 %v588_v54, %v582_v52  ;;  %v2400_v60 = vpack.c.bf16 %v599_v56, %v593_v55  ;;  %v653_v51 = vld [vmem:[#allocation4 + $0x1218] sm:$0xff]  ;;  %v659_v52 = vld [vmem:[#allocation4 + $0x1248] sm:$0xff] }
 0x13f   :  { %2379 = vmatpush1.bf16.msra.mxu1 %v2378_v62  ;;  %v598_v62 = vld [vmem:[#allocation4 + $0x1060] sm:$0xff]  ;;  %v661_v54 = vld [vmem:[#allocation4 + $0x1258] sm:$0xff] }
 0x140   :  { %2635 = vmatpush1.bf16.msra.mxu0 %v2634_v63  ;;  %2381 = vmatprep.subr.bf16.mxu1 %v2380_v0  ;;  %v594_v63 = vld [vmem:[#allocation4 + $0x1040] sm:$0xff]  ;;  %v2656_v0 = vpack.c.bf16 %v601_v58, %v595_v57  ;;  %v2402_v6 = vpack.c.bf16 %v598_v62, %v592_v61  ;;  %v2420_v57 = vpack.c.bf16 %v659_v52, %v653_v51  ;;  %v652_v58 = vld [vmem:[#allocation4 + $0x1210] sm:$0xff]  ;;  %v665_v62 = vld [vmem:[#allocation4 + $0x1278] sm:$0xff] }
 0x141   :  { %2637 = vmatprep.subr.bf16.mxu0 %v2636_v4  ;;  %v607_v4 = vld [vmem:[#allocation4 + $0x10a8] sm:$0xff]  ;;  %v2658_v7 = vpack.c.bf16 %v600_v1, %v594_v63  ;;  %v660_v61 = vld [vmem:[#allocation4 + $0x1250] sm:$0xff]  ;;  %v673_v1 = vld [vmem:[#allocation4 + $0x12b8] sm:$0xff] }
 0x142   :  { %v671_v63 = vld [vmem:[#allocation4 + $0x12a8] sm:$0xff]  ;;  %v701_v39 = vld [vmem:[#allocation4 + $0x1398] sm:$0xff]  ;;  %v702_v51 = vld [vmem:[#allocation4 + $0x13a0] sm:$0xff] }
 0x143   :  { %2383 = vmatpush1.bf16.msra.mxu1 %v2382_v10  ;;  %v610_v10 = vld [vmem:[#allocation4 + $0x10c0] sm:$0xff] }
 0x144   :  { %2639 = vmatpush1.bf16.msra.mxu0 %v2638_v11  ;;  %2385 = vmatprep.subr.bf16.mxu1 %v2384_v12  ;;  %v606_v11 = vld [vmem:[#allocation4 + $0x10a0] sm:$0xff]  ;;  %v2660_v12 = vpack.c.bf16 %v613_v5, %v607_v4  ;;  %v2406_v19 = vpack.c.bf16 %v610_v10, %v604_v9  ;;  %v2424_v4 = vpack.c.bf16 %v671_v63, %v665_v62  ;;  %v664_v5 = vld [vmem:[#allocation4 + $0x1270] sm:$0xff]  ;;  %v677_v10 = vld [vmem:[#allocation4 + $0x12d8] sm:$0xff] }
 0x145   :  { %2641 = vmatprep.subr.bf16.mxu0 %v2640_v17  ;;  %v619_v17 = vld [vmem:[#allocation4 + $0x1108] sm:$0xff]  ;;  %v2662_v20 = vpack.c.bf16 %v612_v13, %v606_v11  ;;  %v672_v9 = vld [vmem:[#allocation4 + $0x12b0] sm:$0xff] }
 0x146   :  { %v683_v11 = vld [vmem:[#allocation4 + $0x1308] sm:$0xff] }
 0x147   :  { %2387 = vmatpush1.bf16.msra.mxu1 %v2386_v23  ;;  %v622_v23 = vld [vmem:[#allocation4 + $0x1120] sm:$0xff]  ;;  %v679_v13 = vld [vmem:[#allocation4 + $0x12e8] sm:$0xff] }
 0x148   :  { %2643 = vmatpush1.bf16.msra.mxu0 %v2642_v24  ;;  %2389 = vmatprep.subr.bf16.mxu1 %v2388_v25  ;;  %v618_v24 = vld [vmem:[#allocation4 + $0x1100] sm:$0xff]  ;;  %v2664_v25 = vpack.c.bf16 %v625_v18, %v619_v17  ;;  %v2410_v31 = vpack.c.bf16 %v622_v23, %v616_v22  ;;  %v2428_v18 = vpack.c.bf16 %v683_v11, %v677_v10  ;;  %v684_v23 = vld [vmem:[#allocation4 + $0x1310] sm:$0xff]  ;;  %v727_v10 = vld [vmem:[#allocation4 + $0x1468] sm:$0xff] }
 0x149   :  { %2645 = vmatprep.subr.bf16.mxu0 %v2644_v29  ;;  %v631_v29 = vld [vmem:[#allocation4 + $0x1168] sm:$0xff]  ;;  %v2666_v32 = vpack.c.bf16 %v624_v26, %v618_v24  ;;  %v2684_v22 = vpack.c.bf16 %v685_v14, %v679_v13  ;;  %v689_v24 = vld [vmem:[#allocation4 + $0x1338] sm:$0xff] }
 0x14a   :  { %v2859_v26 = vld [vmem:[#allocation2 + $0x68] sm:$0xff]  ;;  %v733_v11 = vld [vmem:[#allocation4 + $0x1498] sm:$0xff] }
 0x14b   :  { %2391 = vmatpush1.bf16.msra.mxu1 %v2390_v35  ;;  %v634_v35 = vld [vmem:[#allocation4 + $0x1180] sm:$0xff] }
 0x14c   :  { %2647 = vmatpush1.bf16.msra.mxu0 %v2646_v36  ;;  %2393 = vmatprep.subr.bf16.mxu1 %v2392_v37  ;;  %v630_v36 = vld [vmem:[#allocation4 + $0x1160] sm:$0xff]  ;;  %v2668_v37 = vpack.c.bf16 %v637_v30, %v631_v29  ;;  %v2414_v43 = vpack.c.bf16 %v634_v35, %v628_v34  ;;  %v844_v29 = vlaneseq  ;;  %v688_v34 = vld [vmem:[#allocation4 + $0x1330] sm:$0xff] }
 0x14d   :  { %2649 = vmatprep.subr.bf16.mxu0 %v2648_v41  ;;  %v643_v41 = vld [vmem:[#allocation4 + $0x11c8] sm:$0xff]  ;;  %v2670_v44 = vpack.c.bf16 %v636_v38, %v630_v36  ;;  %v2860_v30 = vld [vmem:[#allocation2 + $0x60] sm:$0xff]  ;;  %v696_v38 = vld [vmem:[#allocation4 + $0x1370] sm:$0xff] }
 0x14e   :  { %v694_v35 = vld [vmem:[#allocation4 + $0x1360] sm:$0xff] }
 0x14f   :  { %2395 = vmatpush1.bf16.msra.mxu1 %v2394_v47  ;;  %v646_v47 = vld [vmem:[#allocation4 + $0x11e0] sm:$0xff] }
 0x150   :  { %2651 = vmatpush1.bf16.msra.mxu0 %v2650_v48  ;;  %2397 = vmatprep.subr.bf16.mxu1 %v2396_v49  ;;  %v642_v48 = vld [vmem:[#allocation4 + $0x11c0] sm:$0xff]  ;;  %v2672_v49 = vpack.c.bf16 %v649_v42, %v643_v41  ;;  %v2418_v55 = vpack.c.bf16 %v646_v47, %v640_v46  ;;  %v2861_v41 = vld [vmem:[#allocation2 + $0xa8] sm:$0xff]  ;;  %v2434_v46 = vpack.c.bf16 %v694_v35, %v688_v34 }
 0x151   :  { %2653 = vmatprep.subr.bf16.mxu0 %v2652_v53  ;;  %v655_v53 = vld [vmem:[#allocation4 + $0x1228] sm:$0xff]  ;;  %v2674_v56 = vpack.c.bf16 %v648_v50, %v642_v48  ;;  %v690_v36 = vld [vmem:[#allocation4 + $0x1340] sm:$0xff]  ;;  %v2436_v48 = vpack.c.bf16 %v707_v40, %v701_v39 }
 0x152   :  { %v703_v42 = vld [vmem:[#allocation4 + $0x13a8] sm:$0xff]  ;;  %v2690_v47 = vpack.c.bf16 %v696_v38, %v690_v36  ;;  %v706_v50 = vld [vmem:[#allocation4 + $0x13c0] sm:$0xff]  ;;  %v736_v36 = vld [vmem:[#allocation4 + $0x14b0] sm:$0xff] }
 0x153   :  { %2399 = vmatpush1.bf16.msra.mxu1 %v2398_v59  ;;  %v658_v59 = vld [vmem:[#allocation4 + $0x1240] sm:$0xff] }
 0x154   :  { %2655 = vmatpush1.bf16.msra.mxu0 %v2654_v16  ;;  %2401 = vmatprep.subr.bf16.mxu1 %v2400_v60  ;;  %v654_v16 = vld [vmem:[#allocation4 + $0x1220] sm:$0xff]  ;;  %v2676_v60 = vpack.c.bf16 %v661_v54, %v655_v53  ;;  %v2422_v2 = vpack.c.bf16 %v658_v59, %v652_v58  ;;  %v708_v53 = vld [vmem:[#allocation4 + $0x13d0] sm:$0xff]  ;;  %v713_v54 = vld [vmem:[#allocation4 + $0x13f8] sm:$0xff] }
 0x155   :  { %2657 = vmatprep.subr.bf16.mxu0 %v2656_v0  ;;  %v667_v0 = vld [vmem:[#allocation4 + $0x1288] sm:$0xff]  ;;  %v2678_v3 = vpack.c.bf16 %v660_v61, %v654_v16  ;;  %v721_v59 = vld [vmem:[#allocation4 + $0x1438] sm:$0xff]  ;;  %v2864_v16 = vld [vmem:[#allocation2 + $0xe0] sm:$0xff]  ;;  %v2694_v63 = vpack.c.bf16 %v708_v53, %v702_v51 }
 0x156   :  { %v715_v58 = vld [vmem:[#allocation4 + $0x1408] sm:$0xff]  ;;  %v2982_v61 = vld [vmem:[%s3081_s2] sm:$0x3f] }
 0x157   :  { %2403 = vmatpush1.bf16.msra.mxu1 %v2402_v6  ;;  %v670_v6 = vld [vmem:[#allocation4 + $0x12a0] sm:$0xff] }
 0x158   :  { %2659 = vmatpush1.bf16.msra.mxu0 %v2658_v7  ;;  %2405 = vmatprep.subr.bf16.mxu1 %v2404_v8  ;;  %v666_v7 = vld [vmem:[#allocation4 + $0x1280] sm:$0xff]  ;;  %v2680_v8 = vpack.c.bf16 %v673_v1, %v667_v0  ;;  %v2426_v15 = vpack.c.bf16 %v670_v6, %v664_v5  ;;  %v712_v1 = vld [vmem:[#allocation4 + $0x13f0] sm:$0xff]  ;;  %v725_v6 = vld [vmem:[#allocation4 + $0x1458] sm:$0xff] }
 0x159   :  { %2661 = vmatprep.subr.bf16.mxu0 %v2660_v12  ;;  %v2858_v12 = vld [vmem:[#allocation2 + $0x20] sm:$0xff]  ;;  %v2682_v17 = vpack.c.bf16 %v672_v9, %v666_v7  ;;  %v720_v5 = vld [vmem:[#allocation4 + $0x1430] sm:$0xff]  ;;  %v731_v7 = vld [vmem:[#allocation4 + $0x1488] sm:$0xff] }
 0x15a   :  { %v738_v38 = vld [vmem:[#allocation4 + $0x14c0] sm:$0xff] }
 0x15b   :  { %2407 = vmatpush1.bf16.msra.mxu1 %v2406_v19  ;;  %v676_v19 = vld [vmem:[#allocation4 + $0x12d0] sm:$0xff] }
 0x15c   :  { %2663 = vmatpush1.bf16.msra.mxu0 %v2662_v20  ;;  %2409 = vmatprep.subr.bf16.mxu1 %v2408_v21  ;;  %v682_v20 = vld [vmem:[#allocation4 + $0x1300] sm:$0xff] }
 0x15d   :  { %2665 = vmatprep.subr.bf16.mxu0 %v2664_v25  ;;  %v678_v21 = vld [vmem:[#allocation4 + $0x12e0] sm:$0xff]  ;;  %v695_v25 = vld [vmem:[#allocation4 + $0x1368] sm:$0xff] }
 0x15f   :  { %2411 = vmatpush1.bf16.msra.mxu1 %v2410_v31  ;;  %v2430_v31 = vpack.c.bf16 %v682_v20, %v676_v19  ;;  %v726_v19 = vld [vmem:[#allocation4 + $0x1460] sm:$0xff] }
 0x160   :  { %2667 = vmatpush1.bf16.msra.mxu0 %v2666_v32  ;;  %2413 = vmatprep.subr.bf16.mxu1 %v2412_v33  ;;  %v2686_v32 = vpack.c.bf16 %v684_v23, %v678_v21  ;;  %v2432_v33 = vpack.c.bf16 %v695_v25, %v689_v24  ;;  %v2700_v21 = vpack.c.bf16 %v733_v11, %v727_v10  ;;  %v737_v23 = vld [vmem:[#allocation4 + $0x14b8] sm:$0xff]  ;;  %v743_v24 = vld [vmem:[#allocation4 + $0x14e8] sm:$0xff] }
 0x161   :  { %2669 = vmatprep.subr.bf16.mxu0 %v2668_v37  ;;  %v2688_v37 = vpack.c.bf16 %v697_v28, %v691_v27  ;;  %v739_v28 = vld [vmem:[#allocation4 + $0x14c8] sm:$0xff]  ;;  %v2448_v35 = vpack.c.bf16 %v743_v24, %v737_v23  ;;  %v773_v23 = vld [vmem:[#allocation4 + $0x15d8] sm:$0xff] }
 0x162   :  { %v779_v24 = vld [vmem:[#allocation4 + $0x1608] sm:$0xff] }
 0x163   :  { %2415 = vmatpush1.bf16.msra.mxu1 %v2414_v43  ;;  %v709_v43 = vld [vmem:[#allocation4 + $0x13d8] sm:$0xff] }
 0x164   :  { %2671 = vmatpush1.bf16.msra.mxu0 %v2670_v44  ;;  %2417 = vmatprep.subr.bf16.mxu1 %v2416_v45  ;;  %v2976_v44 = vshrl.u32 %v844_v29, 7  ;;  %v2862_v45 = vld [vmem:[#allocation2 + $0xa0] sm:$0xff]  ;;  %v2692_v52 = vpack.c.bf16 %v709_v43, %v703_v42  ;;  %v745_v29 = vld [vmem:[#allocation4 + $0x14f8] sm:$0xff]  ;;  %v744_v42 = vld [vmem:[#allocation4 + $0x14f0] sm:$0xff] }
 0x165   :  { %2673 = vmatprep.subr.bf16.mxu0 %v2672_v49  ;;  %v700_v49 = vld [vmem:[#allocation4 + $0x1390] sm:$0xff]  ;;  %v749_v43 = vld [vmem:[#allocation4 + $0x1518] sm:$0xff] }
 0x166   :  { %v850_v62 = vsub.s32 1, %v2976_v44 }
 0x167   :  { %2419 = vmatpush1.bf16.msra.mxu1 %v2418_v55  ;;  %v719_v55 = vld [vmem:[#allocation4 + $0x1428] sm:$0xff] }
 0x168   :  { %2675 = vmatpush1.bf16.msra.mxu0 %v2674_v56  ;;  %2421 = vmatprep.subr.bf16.mxu1 %v2420_v57  ;;  %v2863_v56 = vld [vmem:[#allocation2 + $0xe8] sm:$0xff]  ;;  %v846_v57 = vsub.s32 0, %v2976_v44  ;;  %v2440_v0 = vpack.c.bf16 %v719_v55, %v713_v54  ;;  %v2706_v55 = vpack.c.bf16 %v744_v42, %v738_v38 }
 0x169   :  { %2677 = vmatprep.subr.bf16.mxu0 %v2676_v60  ;;  %v2438_v60 = vpack.c.bf16 %v706_v50, %v700_v49  ;;  %v751_v49 = vld [vmem:[#allocation4 + $0x1528] sm:$0xff]  ;;  %v757_v50 = vld [vmem:[#allocation4 + $0x1558] sm:$0xff] }
 0x16a   :  { %1473 = vmatmul.mubr.f32.vlgmr.msra.gmra.mrb[8].mxu1 %v2858_v12  ;;  %v2986_v9 = vrot.slane %v2982_v61, %v846_v57  ;;  %v748_v57 = vld [vmem:[#allocation4 + $0x1510] sm:$0xff]  ;;  %v791_v42 = vld [vmem:[#allocation4 + $0x1668] sm:$0xff] }
 0x16b   :  { %2423 = vmatpush1.bf16.msra.mxu1 %v2422_v2  ;;  %1829 = vmatmul.mubr.f32.vlgmr.msra.gmra.mrb[8].mxu0 %v2858_v12  ;;  %v718_v2 = vld [vmem:[#allocation4 + $0x1420] sm:$0xff]  ;;  %v2989_v12 = vrot.slane %v2982_v61, %v850_v62  ;;  %v2708_v62 = vpack.c.bf16 %v757_v50, %v751_v49 }
 0x16c   :  { %2679 = vmatpush1.bf16.msra.mxu0 %v2678_v3  ;;  %2425 = vmatprep.subr.bf16.mxu1 %v2424_v4  ;;  %v714_v3 = vld [vmem:[#allocation4 + $0x1400] sm:$0xff]  ;;  %v2696_v4 = vpack.c.bf16 %v721_v59, %v715_v58  ;;  %v2442_v13 = vpack.c.bf16 %v718_v2, %v712_v1  ;;  %v767_v1 = vld [vmem:[#allocation4 + $0x15a8] sm:$0xff] }
 0x16d   :  { %2681 = vmatprep.subr.bf16.mxu0 %v2680_v8  ;;  %1478 = vmatprep.mubr.f32.mxu1 %v2859_v26  ;;  %v2865_v8 = vld [vmem:[#allocation2 + $0x38] sm:$0xff]  ;;  %v2698_v14 = vpack.c.bf16 %v720_v5, %v714_v3  ;;  %v754_v58 = vld [vmem:[#allocation4 + $0x1540] sm:$0xff]  ;;  %v763_v5 = vld [vmem:[#allocation4 + $0x1588] sm:$0xff] }
 0x16e   :  { %1834 = vmatprep.mubr.f32.mxu0 %v2859_v26  ;;  %1479 = vmatmul.mubr.f32.gmra.mrb[10].mxu1 %v2860_v30  ;;  %v750_v59 = vld [vmem:[#allocation4 + $0x1520] sm:$0xff]  ;;  %v2454_v10 = vpack.c.bf16 %v754_v58, %v748_v57 }
 0x16f   :  { %2427 = vmatpush1.bf16.msra.mxu1 %v2426_v15  ;;  %1835 = vmatmul.mubr.f32.gmra.mrb[10].mxu0 %v2860_v30  ;;  %v2444_v15 = vpack.c.bf16 %v731_v7, %v725_v6  ;;  %v769_v6 = vld [vmem:[#allocation4 + $0x15b8] sm:$0xff]  ;;  %v790_v49 = vld [vmem:[#allocation4 + $0x1660] sm:$0xff] }
 0x170   :  { %2683 = vmatpush1.bf16.msra.mxu0 %v2682_v17  ;;  %2429 = vmatprep.subr.bf16.mxu1 %v2428_v18  ;;  %v724_v17 = vld [vmem:[#allocation4 + $0x1450] sm:$0xff]  ;;  %v730_v18 = vld [vmem:[#allocation4 + $0x1480] sm:$0xff] }
 0x171   :  { %2685 = vmatprep.subr.bf16.mxu0 %v2684_v22  ;;  %1484 = vmatprep.mubr.f32.mxu1 %v2861_v41  ;;  %v732_v22 = vld [vmem:[#allocation4 + $0x1490] sm:$0xff]  ;;  %v786_v50 = vld [vmem:[#allocation4 + $0x1640] sm:$0xff] }
 0x172   :  { %1840 = vmatprep.mubr.f32.mxu0 %v2861_v41  ;;  %1485 = vmatmul.mubr.f32.gmra.mrb[12].mxu1 %v2862_v45  ;;  %v2702_v34 = vpack.c.bf16 %v732_v22, %v726_v19  ;;  %v2704_v41 = vpack.c.bf16 %v745_v29, %v739_v28  ;;  %v768_v22 = vld [vmem:[#allocation4 + $0x15b0] sm:$0xff]  ;;  %v775_v28 = vld [vmem:[#allocation4 + $0x15e8] sm:$0xff]  ;;  %v781_v29 = vld [vmem:[#allocation4 + $0x1618] sm:$0xff] }
 0x173   :  { %2431 = vmatpush1.bf16.msra.mxu1 %v2430_v31  ;;  %1841 = vmatmul.mubr.f32.gmra.mrb[12].mxu0 %v2862_v45  ;;  %v755_v45 = vld [vmem:[#allocation4 + $0x1548] sm:$0xff] }
 0x174   :  { %2687 = vmatpush1.bf16.msra.mxu0 %v2686_v32  ;;  %2433 = vmatprep.subr.bf16.mxu1 %v2432_v33  ;;  %v2446_v32 = vpack.c.bf16 %v730_v18, %v724_v17  ;;  %v766_v17 = vld [vmem:[#allocation4 + $0x15a0] sm:$0xff] }
 0x175   :  { %2689 = vmatprep.subr.bf16.mxu0 %v2688_v37  ;;  %1490 = vmatprep.mubr.f32.mxu1 %v2863_v56  ;;  %v742_v37 = vld [vmem:[#allocation4 + $0x14e0] sm:$0xff] }
 0x176   :  { %1846 = vmatprep.mubr.f32.mxu0 %v2863_v56  ;;  %1491 = vmatmul.mubr.f32.gmra.mrb[14].mxu1 %v2864_v16  ;;  %v2450_v53 = vpack.c.bf16 %v742_v37, %v736_v36  ;;  %v2452_v56 = vpack.c.bf16 %v755_v45, %v749_v43  ;;  %v762_v18 = vld [vmem:[#allocation4 + $0x1580] sm:$0xff]  ;;  %v772_v36 = vld [vmem:[#allocation4 + $0x15d0] sm:$0xff]  ;;  %v793_v43 = vld [vmem:[#allocation4 + $0x1678] sm:$0xff] }
 0x177   :  { %2435 = vmatpush1.bf16.msra.mxu1 %v2434_v46  ;;  %1847 = vmatmul.mubr.f32.gmra.mrb[14].mxu0 %v2864_v16  ;;  %v774_v37 = vld [vmem:[#allocation4 + $0x15e0] sm:$0xff] }
 0x178   :  { %2691 = vmatpush1.bf16.msra.mxu0 %v2690_v47  ;;  %2437 = vmatprep.subr.bf16.mxu1 %v2436_v48 }
 0x179   :  { %2693 = vmatprep.subr.bf16.mxu0 %v2692_v52  ;;  %1561 = vmatprep.mubr.f32.mxu1 %v2865_v8 }
 0x17a   :  { %1917 = vmatprep.mubr.f32.mxu0 %v2865_v8 }
 0x17b   :  { %2439 = vmatpush1.bf16.msra.mxu1 %v2438_v60 }
 0x17c   :  { %2695 = vmatpush1.bf16.msra.mxu0 %v2694_v63  ;;  %2441 = vmatprep.subr.bf16.mxu1 %v2440_v0  ;;  %v756_v63 = vld [vmem:[#allocation4 + $0x1550] sm:$0xff]  ;;  %v761_v0 = vld [vmem:[#allocation4 + $0x1578] sm:$0xff] }
 0x17d   :  { %v1029_v20 = vpop.f32.mrb[0].mxu1  ;;  %2697 = vmatprep.subr.bf16.mxu0 %v2696_v4 }
 0x17e   :  { %v2740_v25 = vadd.f32 %v1029_v20, %v2986_v9  ;;  %v1207_v26 = vpop.f32.mrb[0].mxu0  ;;  %v1031_v27 = vpop.f32.mrb[1].mxu1 }
 0x17f   :  { %v2742_v30 = vadd.f32 %v1031_v27, %v2989_v12  ;;  %v1209_v31 = vpop.f32.mrb[1].mxu0  ;;  %2443 = vmatpush1.bf16.msra.mxu1 %v2442_v13  ;;  %v2710_v13 = vpack.c.bf16 %v756_v63, %v750_v59 }
 0x180   :  { %v2741_v33 = vadd.f32 %v2740_v25, %v1207_v26  ;;  %2699 = vmatpush1.bf16.msra.mxu0 %v2698_v14  ;;  %2445 = vmatprep.subr.bf16.mxu1 %v2444_v15  ;;  %v2456_v14 = vpack.c.bf16 %v767_v1, %v761_v0  ;;  %v760_v15 = vld [vmem:[#allocation4 + $0x1570] sm:$0xff]  ;;  %v809_v1 = vld [vmem:[#allocation4 + $0x16f8] sm:$0xff] }
 0x181   :  { %v2743_v39 = vadd.f32 %v2742_v30, %v1209_v31  ;;  %v1035_v40 = vpop.f32.mrb[2].mxu1  ;;  %2701 = vmatprep.subr.bf16.mxu0 %v2700_v21  ;;  %v2712_v21 = vpack.c.bf16 %v769_v6, %v763_v5  ;;  %v804_v0 = vld [vmem:[#allocation4 + $0x16d0] sm:$0xff] }
 0x182   :  { %1942 = vst [vmem:[%s3082_s3] sm:$0xff] %v2741_v33  ;;  %v2744_v46 = vadd.f32 %v1035_v40, %v2986_v9  ;;  %v1213_v47 = vpop.f32.mrb[2].mxu0  ;;  %v1037_v48 = vpop.f32.mrb[3].mxu1  ;;  %v780_v40 = vld [vmem:[#allocation4 + $0x1610] sm:$0xff] }
 0x183   :  { %1943 = vst [vmem:[%s3082_s3 + $0x8] sm:$0xff] %v2743_v39  ;;  %v2746_v51 = vadd.f32 %v1037_v48, %v2989_v12  ;;  %v1215_v52 = vpop.f32.mrb[3].mxu0  ;;  %2447 = vmatpush1.bf16.msra.mxu1 %v2446_v32  ;;  %v2458_v32 = vpack.c.bf16 %v766_v17, %v760_v15  ;;  %v2716_v39 = vpack.c.bf16 %v781_v29, %v775_v28  ;;  %v784_v48 = vld [vmem:[#allocation4 + $0x1630] sm:$0xff]  ;;  %v821_v15 = vld [vmem:[#allocation4 + $0x1758] sm:$0xff]  ;;  %v827_v17 = vld [vmem:[#allocation4 + $0x1788] sm:$0xff] }
 0x184   :  { %v2745_v54 = vadd.f32 %v2744_v46, %v1213_v47  ;;  %2703 = vmatpush1.bf16.msra.mxu0 %v2702_v34  ;;  %2449 = vmatprep.subr.bf16.mxu1 %v2448_v35  ;;  %v2714_v34 = vpack.c.bf16 %v768_v22, %v762_v18  ;;  %v2460_v35 = vpack.c.bf16 %v779_v24, %v773_v23  ;;  %v823_v18 = vld [vmem:[#allocation4 + $0x1768] sm:$0xff]  ;;  %v820_v23 = vld [vmem:[#allocation4 + $0x1750] sm:$0xff]  ;;  %v826_v24 = vld [vmem:[#allocation4 + $0x1780] sm:$0xff] }
 0x185   :  { %v2747_v16 = vadd.f32 %v2746_v51, %v1215_v52  ;;  %v1041_v60 = vpop.f32.mrb[4].mxu1  ;;  %2705 = vmatprep.subr.bf16.mxu0 %v2704_v41  ;;  %v785_v41 = vld [vmem:[#allocation4 + $0x1638] sm:$0xff]  ;;  %v2718_v46 = vpack.c.bf16 %v780_v40, %v774_v37  ;;  %v792_v52 = vld [vmem:[#allocation4 + $0x1670] sm:$0xff]  ;;  %v2466_v57 = vpack.c.bf16 %v790_v49, %v784_v48  ;;  %v2476_v22 = vpack.c.bf16 %v827_v17, %v821_v15  ;;  %v839_v29 = vld [vmem:[#allocation4 + $0x17e8] sm:$0xff] }
 0x186   :  { %1948 = vst [vmem:[%s3082_s3 + $0x30] sm:$0xff] %v2745_v54  ;;  %v2748_v2 = vadd.f32 %v1041_v60, %v2986_v9  ;;  %v1219_v3 = vpop.f32.mrb[4].mxu0  ;;  %v1043_v4 = vpop.f32.mrb[5].mxu1  ;;  %v2464_v47 = vpack.c.bf16 %v791_v42, %v785_v41  ;;  %v803_v54 = vld [vmem:[#allocation4 + $0x16c8] sm:$0xff]  ;;  %v2722_v58 = vpack.c.bf16 %v792_v52, %v786_v50  ;;  %v802_v60 = vld [vmem:[#allocation4 + $0x16c0] sm:$0xff]  ;;  %v833_v28 = vld [vmem:[#allocation4 + $0x17b8] sm:$0xff] }
 0x187   :  { %1949 = vst [vmem:[%s3082_s3 + $0x38] sm:$0xff] %v2747_v16  ;;  %v2750_v7 = vadd.f32 %v1043_v4, %v2989_v12  ;;  %v1221_v8 = vpop.f32.mrb[5].mxu0  ;;  %2451 = vmatpush1.bf16.msra.mxu1 %v2450_v53  ;;  %v797_v53 = vld [vmem:[#allocation4 + $0x1698] sm:$0xff]  ;;  %v796_v16 = vld [vmem:[#allocation4 + $0x1690] sm:$0xff]  ;;  %v834_v37 = vld [vmem:[#allocation4 + $0x17c0] sm:$0xff]  ;;  %v854_v48 = vsub.s32 2, %v2976_v44 }
 0x188   :  { %v2749_v11 = vadd.f32 %v2748_v2, %v1219_v3  ;;  %2707 = vmatpush1.bf16.msra.mxu0 %v2706_v55  ;;  %2453 = vmatprep.subr.bf16.mxu1 %v2452_v56  ;;  %v799_v55 = vld [vmem:[#allocation4 + $0x16a8] sm:$0xff]  ;;  %v805_v56 = vld [vmem:[#allocation4 + $0x16d8] sm:$0xff]  ;;  %v2468_v59 = vpack.c.bf16 %v803_v54, %v797_v53  ;;  %v2470_v5 = vpack.c.bf16 %v802_v60, %v796_v16  ;;  %v2866_v41 = vld [vmem:[#allocation2 + $0x30] sm:$0xff]  ;;  %v862_v49 = vsub.s32 4, %v2976_v44 }
 0x189   :  { %v2751_v19 = vadd.f32 %v2750_v7, %v1221_v8  ;;  %v1047_v20 = vpop.f32.mrb[6].mxu1  ;;  %2709 = vmatprep.subr.bf16.mxu0 %v2708_v62  ;;  %v798_v62 = vld [vmem:[#allocation4 + $0x16a0] sm:$0xff]  ;;  %v2724_v63 = vpack.c.bf16 %v805_v56, %v799_v55  ;;  %v815_v2 = vld [vmem:[#allocation4 + $0x1728] sm:$0xff]  ;;  %v817_v4 = vld [vmem:[#allocation4 + $0x1738] sm:$0xff]  ;;  %v858_v50 = vsub.s32 3, %v2976_v44  ;;  %v855_v52 = vrot.slane %v2982_v61, %v854_v48 }
 0x18a   :  { %1954 = vst [vmem:[%s3082_s3 + $0x60] sm:$0xff] %v2749_v11  ;;  %v2752_v25 = vadd.f32 %v1047_v20, %v2986_v9  ;;  %v1225_v26 = vpop.f32.mrb[6].mxu0  ;;  %v1049_v27 = vpop.f32.mrb[7].mxu1  ;;  %v778_v9 = vld [vmem:[#allocation4 + $0x1600] sm:$0xff]  ;;  %v811_v3 = vld [vmem:[#allocation4 + $0x1708] sm:$0xff]  ;;  %v2726_v6 = vpack.c.bf16 %v804_v0, %v798_v62  ;;  %v2472_v7 = vpack.c.bf16 %v815_v2, %v809_v1  ;;  %v808_v8 = vld [vmem:[#allocation4 + $0x16f0] sm:$0xff]  ;;  %v863_v53 = vrot.slane %v2982_v61, %v862_v49 }
 0x18b   :  { %1955 = vst [vmem:[%s3082_s3 + $0x68] sm:$0xff] %v2751_v19  ;;  %v2754_v30 = vadd.f32 %v1049_v27, %v2989_v12  ;;  %v1227_v31 = vpop.f32.mrb[7].mxu0  ;;  %2455 = vmatpush1.bf16.msra.mxu1 %v2454_v10  ;;  %v787_v12 = vld [vmem:[#allocation4 + $0x1648] sm:$0xff]  ;;  %v2462_v45 = vpack.c.bf16 %v778_v9, %v772_v36  ;;  %v814_v10 = vld [vmem:[#allocation4 + $0x1720] sm:$0xff]  ;;  %v829_v19 = vld [vmem:[#allocation4 + $0x1798] sm:$0xff]  ;;  %v859_v54 = vrot.slane %v2982_v61, %v858_v50 }
 0x18c   :  { %v2753_v33 = vadd.f32 %v2752_v25, %v1225_v26  ;;  %2711 = vmatpush1.bf16.msra.mxu0 %v2710_v13  ;;  %2457 = vmatprep.subr.bf16.mxu1 %v2456_v14  ;;  %v2720_v51 = vpack.c.bf16 %v793_v43, %v787_v12  ;;  %v810_v11 = vld [vmem:[#allocation4 + $0x1700] sm:$0xff]  ;;  %v2728_v13 = vpack.c.bf16 %v817_v4, %v811_v3  ;;  %v816_v14 = vld [vmem:[#allocation4 + $0x1730] sm:$0xff]  ;;  %v2867_v42 = vld [vmem:[#allocation2 + $0x78] sm:$0xff] }
 0x18d   :  { %v2755_v38 = vadd.f32 %v2754_v30, %v1227_v31  ;;  %2713 = vmatprep.subr.bf16.mxu0 %v2712_v21  ;;  %v2474_v20 = vpack.c.bf16 %v814_v10, %v808_v8  ;;  %v2730_v21 = vpack.c.bf16 %v816_v14, %v810_v11  ;;  %v822_v25 = vld [vmem:[#allocation4 + $0x1760] sm:$0xff]  ;;  %v2732_v26 = vpack.c.bf16 %v829_v19, %v823_v18  ;;  %v828_v27 = vld [vmem:[#allocation4 + $0x1790] sm:$0xff]  ;;  %v835_v30 = vld [vmem:[#allocation4 + $0x17c8] sm:$0xff] }
 0x18e   :  { %1960 = vst [vmem:[%s3082_s3 + $0x90] sm:$0xff] %v2753_v33  ;;  %v841_v31 = vld [vmem:[#allocation4 + $0x17f8] sm:$0xff]  ;;  %v2734_v33 = vpack.c.bf16 %v828_v27, %v822_v25  ;;  %v838_v36 = vld [vmem:[#allocation4 + $0x17e0] sm:$0xff]  ;;  %v2868_v12 = vld [vmem:[#allocation2 + $0x70] sm:$0xff] }
 0x18f   :  { %1961 = vst [vmem:[%s3082_s3 + $0x98] sm:$0xff] %v2755_v38  ;;  %2459 = vmatpush1.bf16.msra.mxu1 %v2458_v32  ;;  %v2478_v32 = vpack.c.bf16 %v826_v24, %v820_v23  ;;  %v2736_v9 = vpack.c.bf16 %v841_v31, %v835_v30  ;;  %v840_v38 = vld [vmem:[#allocation4 + $0x17f0] sm:$0xff]  ;;  %v2869_v43 = vld [vmem:[#allocation2 + $0xb8] sm:$0xff] }
 0x190   :  { %2715 = vmatpush1.bf16.msra.mxu0 %v2714_v34  ;;  %2461 = vmatprep.subr.bf16.mxu1 %v2460_v35  ;;  %v2480_v34 = vpack.c.bf16 %v839_v29, %v833_v28  ;;  %v832_v35 = vld [vmem:[#allocation4 + $0x17b0] sm:$0xff]  ;;  %v2738_v40 = vpack.c.bf16 %v840_v38, %v834_v37 }
 0x191   :  { %2717 = vmatprep.subr.bf16.mxu0 %v2716_v39  ;;  %v2482_v39 = vpack.c.bf16 %v838_v36, %v832_v35 }
 0x193   :  { %2463 = vmatpush1.bf16.msra.mxu1 %v2462_v45  ;;  %v2870_v45 = vld [vmem:[#allocation2 + $0xb0] sm:$0xff] }
 0x194   :  { %2719 = vmatpush1.bf16.msra.mxu0 %v2718_v46  ;;  %2465 = vmatprep.subr.bf16.mxu1 %v2464_v47  ;;  %v2871_v46 = vld [vmem:[#allocation2 + $0xf8] sm:$0xff]  ;;  %v2872_v47 = vld [vmem:[#allocation2 + $0xf0] sm:$0xff] }
 0x195   :  { %2721 = vmatprep.subr.bf16.mxu0 %v2720_v51  ;;  %v866_v51 = vsub.s32 5, %v2976_v44 }
 0x197   :  { %2467 = vmatpush1.bf16.msra.mxu1 %v2466_v57  ;;  %v867_v55 = vrot.slane %v2982_v61, %v866_v51 }
 0x198   :  { %2723 = vmatpush1.bf16.msra.mxu0 %v2722_v58  ;;  %2469 = vmatprep.subr.bf16.mxu1 %v2468_v59 }
 0x199   :  { %2725 = vmatprep.subr.bf16.mxu0 %v2724_v63 }
 0x19b   :  { %2471 = vmatpush1.bf16.msra.mxu1 %v2470_v5 }
 0x19c   :  { %2727 = vmatpush1.bf16.msra.mxu0 %v2726_v6  ;;  %2473 = vmatprep.subr.bf16.mxu1 %v2472_v7 }
 0x19d   :  { %2729 = vmatprep.subr.bf16.mxu0 %v2728_v13 }
 0x19f   :  { %2475 = vmatpush1.bf16.msra.mxu1 %v2474_v20 }
 0x1a0   :  { %2731 = vmatpush1.bf16.msra.mxu0 %v2730_v21  ;;  %2477 = vmatprep.subr.bf16.mxu1 %v2476_v22 }
 0x1a1   :  { %2733 = vmatprep.subr.bf16.mxu0 %v2732_v26 }
 0x1a3   :  { %2479 = vmatpush1.bf16.msra.mxu1 %v2478_v32 }
 0x1a4   :  { %2735 = vmatpush1.bf16.msra.mxu0 %v2734_v33  ;;  %2481 = vmatprep.subr.bf16.mxu1 %v2480_v34 }
 0x1a5   :  { %2737 = vmatprep.subr.bf16.mxu0 %v2736_v9 }
 0x1a7   :  { %2483 = vmatpush1.bf16.msra.mxu1 %v2482_v39 }
 0x1a8   :  { %2739 = vmatpush1.bf16.msra.mxu0 %v2738_v40 }
 0x1aa   :  { %1562 = vmatmul.mubr.f32.vlgmr.msra.gmra.mrb[8].mxu1 %v2866_v41 }
 0x1ab   :  { %1918 = vmatmul.mubr.f32.vlgmr.msra.gmra.mrb[8].mxu0 %v2866_v41  ;;  %1567 = vmatprep.mubr.f32.mxu1 %v2867_v42 }
 0x1ac   :  { %1923 = vmatprep.mubr.f32.mxu0 %v2867_v42 }
 0x1ae   :  { %1568 = vmatmul.mubr.f32.gmra.mrb[10].mxu1 %v2868_v12 }
 0x1af   :  { %1924 = vmatmul.mubr.f32.gmra.mrb[10].mxu0 %v2868_v12  ;;  %1573 = vmatprep.mubr.f32.mxu1 %v2869_v43 }
 0x1b0   :  { %1929 = vmatprep.mubr.f32.mxu0 %v2869_v43 }
 0x1b2   :  { %1574 = vmatmul.mubr.f32.gmra.mrb[12].mxu1 %v2870_v45 }
 0x1b3   :  { %1930 = vmatmul.mubr.f32.gmra.mrb[12].mxu0 %v2870_v45  ;;  %1579 = vmatprep.mubr.f32.mxu1 %v2871_v46 }
 0x1b4   :  { %1935 = vmatprep.mubr.f32.mxu0 %v2871_v46 }
 0x1b6   :  { %1580 = vmatmul.mubr.f32.gmra.mrb[14].mxu1 %v2872_v47 }
 0x1b7   :  { %1936 = vmatmul.mubr.f32.gmra.mrb[14].mxu0 %v2872_v47 }
 0x27d   :  { %v1563_v56 = vpop.f32.mrb[8].mxu1 }
 0x27e   :  { %v2756_v57 = vadd.f32 %v1563_v56, %v855_v52  ;;  %v1919_v58 = vpop.f32.mrb[8].mxu0  ;;  %v1565_v59 = vpop.f32.mrb[9].mxu1 }
 0x27f   :  { %v2764_v16 = vadd.f32 %v1919_v58, %v863_v53  ;;  %v2757_v60 = vadd.f32 %v1565_v59, %v859_v54  ;;  %v1921_v62 = vpop.f32.mrb[9].mxu0 }
 0x280   :  { %1944 = vst [vmem:[%s3082_s3 + $0x10] sm:$0xff] %v2756_v57  ;;  %v2765_v44 = vadd.f32 %v1921_v62, %v867_v55 }
 0x281   :  { %1946 = vst [vmem:[%s3082_s3 + $0x20] sm:$0xff] %v2764_v16  ;;  %1945 = vst [vmem:[%s3082_s3 + $0x18] sm:$0xff] %v2757_v60  ;;  %v1569_v61 = vpop.f32.mrb[10].mxu1 }
 0x282   :  { %1947 = vst [vmem:[%s3082_s3 + $0x28] sm:$0xff] %v2765_v44  ;;  %v2758_v63 = vadd.f32 %v1569_v61, %v855_v52  ;;  %v1925_v0 = vpop.f32.mrb[10].mxu0  ;;  %v1571_v1 = vpop.f32.mrb[11].mxu1 }
 0x283   :  { %v2766_v2 = vadd.f32 %v1925_v0, %v863_v53  ;;  %v2759_v3 = vadd.f32 %v1571_v1, %v859_v54  ;;  %v1927_v4 = vpop.f32.mrb[11].mxu0 }
 0x284   :  { %1950 = vst [vmem:[%s3082_s3 + $0x40] sm:$0xff] %v2758_v63  ;;  %v2767_v5 = vadd.f32 %v1927_v4, %v867_v55 }
 0x285   :  { %1952 = vst [vmem:[%s3082_s3 + $0x50] sm:$0xff] %v2766_v2  ;;  %1951 = vst [vmem:[%s3082_s3 + $0x48] sm:$0xff] %v2759_v3  ;;  %v1575_v6 = vpop.f32.mrb[12].mxu1 }
 0x286   :  { %1953 = vst [vmem:[%s3082_s3 + $0x58] sm:$0xff] %v2767_v5  ;;  %v2760_v7 = vadd.f32 %v1575_v6, %v855_v52  ;;  %v1931_v8 = vpop.f32.mrb[12].mxu0  ;;  %v1577_v10 = vpop.f32.mrb[13].mxu1 }
 0x287   :  { %v2768_v11 = vadd.f32 %v1931_v8, %v863_v53  ;;  %v2761_v13 = vadd.f32 %v1577_v10, %v859_v54  ;;  %v1933_v14 = vpop.f32.mrb[13].mxu0 }
 0x288   :  { %1956 = vst [vmem:[%s3082_s3 + $0x70] sm:$0xff] %v2760_v7  ;;  %v2769_v15 = vadd.f32 %v1933_v14, %v867_v55 }
 0x289   :  { %1958 = vst [vmem:[%s3082_s3 + $0x80] sm:$0xff] %v2768_v11  ;;  %1957 = vst [vmem:[%s3082_s3 + $0x78] sm:$0xff] %v2761_v13  ;;  %v1581_v17 = vpop.f32.mrb[14].mxu1 }
 0x28a   :  { %1959 = vst [vmem:[%s3082_s3 + $0x88] sm:$0xff] %v2769_v15  ;;  %v2762_v18 = vadd.f32 %v1581_v17, %v855_v52  ;;  %v1937_v19 = vpop.f32.mrb[14].mxu0  ;;  %v1583_v20 = vpop.f32.mrb[15].mxu1 }
 0x28b   :  { %v2770_v21 = vadd.f32 %v1937_v19, %v863_v53  ;;  %v2763_v22 = vadd.f32 %v1583_v20, %v859_v54  ;;  %v1939_v23 = vpop.f32.mrb[15].mxu0 }
 0x28c   :  { %1962 = vst [vmem:[%s3082_s3 + $0xa0] sm:$0xff] %v2762_v18  ;;  %v2771_v24 = vadd.f32 %v1939_v23, %v867_v55 }
 0x28d   :  { %1964 = vst [vmem:[%s3082_s3 + $0xb0] sm:$0xff] %v2770_v21  ;;  %1963 = vst [vmem:[%s3082_s3 + $0xa8] sm:$0xff] %v2763_v22 }
 0x28e   :  { %1965 = vst [vmem:[%s3082_s3 + $0xb8] sm:$0xff] %v2771_v24 }
 0x28f   :  { %1970 = vsyncpa [#allocation3], 1 }
 0x290   :  { %1971 = vsyncpa [#allocation5], 1 }

</bundles_post_ra>
